<compile_context>
chip_gen: v5e
topology: v5e:2x2
jax: 0.10.0
libtpu: 0.0.40
codegen_flags: <defaults>
</compile_context>

<pallas_src>
import jax
import jax.numpy as jnp
from jax.experimental import pallas as pl
from jax.experimental.pallas import tpu as pltpu

C1, C2, C3 = 1028, 512, 256
LANE = 128
SUBLANE = 8


def _round_up(x, mult):
    return (x + mult - 1) // mult * mult


C1_PAD = _round_up(C1, LANE)  # 1152 — exact zero-padding of the 1028-wide layer


def _mlp_kernel(x_ref, w1_ref, b1_ref, w2_ref, b2_ref, w3_ref, b3_ref,
                w4_ref, b4_ref, o_ref):
    # Fused 4-layer MLP on one batch tile: four bf16 MXU matmuls with f32
    # accumulation, bias-add + ReLU on the VPU in f32, activations re-cast to
    # bf16 between layers. All weights are VMEM-resident across grid steps.
    x = x_ref[...]  # bf16 (TILE_B, M_PAD)

    h = jnp.dot(x, w1_ref[...], preferred_element_type=jnp.float32) + b1_ref[...]
    h = jnp.maximum(h, 0.0).astype(jnp.bfloat16)

    h = jnp.dot(h, w2_ref[...], preferred_element_type=jnp.float32) + b2_ref[...]
    h = jnp.maximum(h, 0.0).astype(jnp.bfloat16)

    h = jnp.dot(h, w3_ref[...], preferred_element_type=jnp.float32) + b3_ref[...]
    h = jnp.maximum(h, 0.0).astype(jnp.bfloat16)

    o = jnp.dot(h, w4_ref[...], preferred_element_type=jnp.float32) + b4_ref[...]
    o_ref[...] = o.astype(o_ref.dtype)  # lane-dense (TILE_B, OUT_PAD) store


def init_params(key, m, numacc):
    """Deterministic init mimicking torch.nn.Linear default (uniform +-1/sqrt(fan_in)).
    Weights stored transposed: (in_features, out_features); bias (1, out_features)."""
    dims = [(m, C1), (C1, C2), (C2, C3), (C3, numacc)]
    params = []
    for (fan_in, fan_out) in dims:
        key, kw, kb = jax.random.split(key, 3)
        bound = 1.0 / jnp.sqrt(jnp.float32(fan_in))
        w = jax.random.uniform(kw, (fan_in, fan_out), jnp.float32, -bound, bound)
        bias = jax.random.uniform(kb, (1, fan_out), jnp.float32, -bound, bound)
        params.append((w, bias))
    return params


def prepare_params(params):
    """One-time conversion: lane-align (pad with zeros, numerically exact) and
    cast weights to bf16 (biases stay f32). Reuse the result across eval calls
    so the cast/pad is not redone every step."""
    (w1, b1), (w2, b2), (w3, b3), (w4, b4) = params
    m, c1 = w1.shape
    numacc = w4.shape[1]
    m_pad = _round_up(m, LANE)
    out_pad = _round_up(numacc, LANE)

    w1p = jnp.zeros((m_pad, C1_PAD), jnp.bfloat16).at[:m, :c1].set(w1.astype(jnp.bfloat16))
    b1p = jnp.zeros((1, C1_PAD), jnp.float32).at[:, :c1].set(b1.astype(jnp.float32))
    w2p = jnp.zeros((C1_PAD, C2), jnp.bfloat16).at[:c1, :].set(w2.astype(jnp.bfloat16))
    b2p = b2.astype(jnp.float32)
    w3p = w3.astype(jnp.bfloat16)
    b3p = b3.astype(jnp.float32)
    w4p = jnp.zeros((C3, out_pad), jnp.bfloat16).at[:, :numacc].set(w4.astype(jnp.bfloat16))
    b4p = jnp.zeros((1, out_pad), jnp.float32).at[:, :numacc].set(b4.astype(jnp.float32))

    prepped = (w1p, b1p, w2p, b2p, w3p, b3p, w4p, b4p)
    meta = (m, numacc, m_pad, out_pad)
    return prepped, meta


def target_forward(t, prepped, meta, *, tile_b=256):
    """Pallas equivalent of Target.forward. `t` may have any trailing dims;
    it is flattened from dim 1 onward (like torch flatten(start_dim=1))."""
    w1p, b1p, w2p, b2p, w3p, b3p, w4p, b4p = prepped
    m, numacc, m_pad, out_pad = meta

    b = t.shape[0]
    x = t.reshape(b, -1)
    assert x.shape[1] == m, f"expected {m} flattened features, got {x.shape[1]}"

    # Batch tiling: shrink the tile for tiny batches (avoid padding 2 -> 256),
    # cap at `tile_b` (256 works on v6e/v7x VMEM budgets; weights are ~1.8 MB bf16).
    tb = min(tile_b, _round_up(max(b, 1), SUBLANE))
    b_pad = _round_up(b, tb)
    n_b = b_pad // tb

    xp = jnp.zeros((b_pad, m_pad), jnp.bfloat16).at[:b, :m].set(x.astype(jnp.bfloat16))

    flops = 2 * b_pad * (m_pad * C1_PAD + C1_PAD * C2 + C2 * C3 + C3 * out_pad)
    bytes_accessed = int(
        xp.size * 2 + b_pad * out_pad * 4
        + sum(int(a.size) * a.dtype.itemsize for a in prepped)
    )
    cost = pl.CostEstimate(flops=int(flops), transcendentals=0,
                           bytes_accessed=bytes_accessed)

    def wspec(shape):
        # Constant index_map -> weight/bias block stays resident in VMEM
        # across all batch-grid steps (loaded from HBM once).
        return pl.BlockSpec(shape, lambda i: (0, 0))

    out = pl.pallas_call(
        _mlp_kernel,
        out_shape=jax.ShapeDtypeStruct((b_pad, out_pad), jnp.float32),
        grid=(n_b,),
        in_specs=[
            pl.BlockSpec((tb, m_pad), lambda i: (i, 0)),   # x tile (pipelined)
            wspec((m_pad, C1_PAD)), wspec((1, C1_PAD)),    # fc1
            wspec((C1_PAD, C2)),    wspec((1, C2)),        # fc2
            wspec((C2, C3)),        wspec((1, C3)),        # fc3
            wspec((C3, out_pad)),   wspec((1, out_pad)),   # out
        ],
        out_specs=pl.BlockSpec((tb, out_pad), lambda i: (i, 0)),
        compiler_params=pltpu.CompilerParams(
            dimension_semantics=("parallel",)),            # dual-TC on v7x
        cost_estimate=cost,
    )(xp, w1p, b1p, w2p, b2p, w3p, b3p, w4p, b4p)

    return out[:b, :numacc]


def reference_forward(t, params):
    """Pure-JAX f32 reference matching the PyTorch module."""
    b = t.shape[0]
    x = t.reshape(b, -1).astype(jnp.float32)
    (w1, b1), (w2, b2), (w3, b3), (w4, b4) = params
    h = jnp.maximum(x @ w1 + b1, 0.0)
    h = jnp.maximum(h @ w2 + b2, 0.0)
    h = jnp.maximum(h @ w3 + b3, 0.0)
    return h @ w4 + b4


if __name__ == "__main__":
    key = jax.random.PRNGKey(0)
    batch, m, numacc = 2, 32, 4
    k_in, k_par = jax.random.split(key)
    # Input with trailing dims that flatten to m=32 features (small state tensor).
    x = jax.random.normal(k_in, (batch, 4, 4, 2), jnp.float32)
    params = init_params(k_par, m, numacc)

    # One-time weight prep (bf16 cast + lane-exact zero padding), then forward.
    prepped, meta = prepare_params(params)
    out = target_forward(x, prepped, meta)
    out = jax.block_until_ready(out)

    ref = reference_forward(x, params)
    assert out.shape == (batch, numacc)
    # bf16 matmul inputs with f32 accumulation: loosened tolerance vs f32 reference.
    assert jnp.allclose(out, ref, atol=5e-2, rtol=5e-2), "mismatch vs JAX reference"
    print("KERNEL_OK")
</pallas_src>

<mosaic_0001>
module attributes {stable_mosaic.version = 11 : i64} {
  func.func @_mlp_kernel(%arg0: i32, %arg1: memref<8x128xbf16, #tpu.memory_space<vmem>>, %arg2: memref<128x1152xbf16, #tpu.memory_space<vmem>>, %arg3: memref<1x1152xf32, #tpu.memory_space<vmem>>, %arg4: memref<1152x512xbf16, #tpu.memory_space<vmem>>, %arg5: memref<1x512xf32, #tpu.memory_space<vmem>>, %arg6: memref<512x256xbf16, #tpu.memory_space<vmem>>, %arg7: memref<1x256xf32, #tpu.memory_space<vmem>>, %arg8: memref<256x128xbf16, #tpu.memory_space<vmem>>, %arg9: memref<1x128xf32, #tpu.memory_space<vmem>>, %arg10: memref<8x128xf32, #tpu.memory_space<vmem>>) attributes {dimension_semantics = [#tpu.dimension_semantics<parallel>], iteration_bounds = array<i64: 1>, scalar_prefetch = 0 : i64, scratch_operands = 0 : i64, tpu.core_type = #tpu.core_type<tc>, window_params = [{transform_indices = @transform_0, window_bounds = array<i64: 8, 128>}, {pipeline_mode = #tpu.pipeline_mode<synchronous>, transform_indices = @transform_1, window_bounds = array<i64: 128, 1152>}, {pipeline_mode = #tpu.pipeline_mode<synchronous>, transform_indices = @transform_2, window_bounds = array<i64: 1, 1152>}, {pipeline_mode = #tpu.pipeline_mode<synchronous>, transform_indices = @transform_3, window_bounds = array<i64: 1152, 512>}, {pipeline_mode = #tpu.pipeline_mode<synchronous>, transform_indices = @transform_4, window_bounds = array<i64: 1, 512>}, {pipeline_mode = #tpu.pipeline_mode<synchronous>, transform_indices = @transform_5, window_bounds = array<i64: 512, 256>}, {pipeline_mode = #tpu.pipeline_mode<synchronous>, transform_indices = @transform_6, window_bounds = array<i64: 1, 256>}, {pipeline_mode = #tpu.pipeline_mode<synchronous>, transform_indices = @transform_7, window_bounds = array<i64: 256, 128>}, {pipeline_mode = #tpu.pipeline_mode<synchronous>, transform_indices = @transform_8, window_bounds = array<i64: 1, 128>}, {transform_indices = @transform_9, window_bounds = array<i64: 8, 128>}]} {
    %c0 = arith.constant 0 : index
    %c0_0 = arith.constant 0 : index
    %0 = vector.load %arg1[%c0, %c0_0] : memref<8x128xbf16, #tpu.memory_space<vmem>>, vector<8x128xbf16>
    %c0_1 = arith.constant 0 : index
    %c0_2 = arith.constant 0 : index
    %1 = vector.load %arg2[%c0_1, %c0_2] : memref<128x1152xbf16, #tpu.memory_space<vmem>>, vector<128x1152xbf16>
    %cst = arith.constant dense<0.000000e+00> : vector<8x1152xf32>
    %2 = tpu.matmul %0, %1, %cst {dimension_numbers = #tpu.dot_dimension_numbers<[1], [0], [0], [1], [0, 0, 1, 1], [], []>} : vector<8x128xbf16>, vector<128x1152xbf16>, vector<8x1152xf32> -> vector<8x1152xf32>
    %c0_3 = arith.constant 0 : index
    %c0_4 = arith.constant 0 : index
    %3 = vector.load %arg3[%c0_3, %c0_4] : memref<1x1152xf32, #tpu.memory_space<vmem>>, vector<1x1152xf32>
    %4 = vector.broadcast %3 : vector<1x1152xf32> to vector<8x1152xf32>
    %5 = arith.addf %2, %4 : vector<8x1152xf32>
    %cst_5 = arith.constant 0.000000e+00 : f32
    %6 = vector.broadcast %cst_5 : f32 to vector<8x1152xf32>
    %7 = arith.maximumf %5, %6 : vector<8x1152xf32>
    %8 = arith.truncf %7 : vector<8x1152xf32> to vector<8x1152xbf16>
    %c0_6 = arith.constant 0 : index
    %c0_7 = arith.constant 0 : index
    %9 = vector.load %arg4[%c0_6, %c0_7] : memref<1152x512xbf16, #tpu.memory_space<vmem>>, vector<1152x512xbf16>
    %cst_8 = arith.constant dense<0.000000e+00> : vector<8x512xf32>
    %10 = tpu.matmul %8, %9, %cst_8 {dimension_numbers = #tpu.dot_dimension_numbers<[1], [0], [0], [1], [0, 0, 1, 1], [], []>} : vector<8x1152xbf16>, vector<1152x512xbf16>, vector<8x512xf32> -> vector<8x512xf32>
    %c0_9 = arith.constant 0 : index
    %c0_10 = arith.constant 0 : index
    %11 = vector.load %arg5[%c0_9, %c0_10] : memref<1x512xf32, #tpu.memory_space<vmem>>, vector<1x512xf32>
    %12 = vector.broadcast %11 : vector<1x512xf32> to vector<8x512xf32>
    %13 = arith.addf %10, %12 : vector<8x512xf32>
    %cst_11 = arith.constant 0.000000e+00 : f32
    %14 = vector.broadcast %cst_11 : f32 to vector<8x512xf32>
    %15 = arith.maximumf %13, %14 : vector<8x512xf32>
    %16 = arith.truncf %15 : vector<8x512xf32> to vector<8x512xbf16>
    %c0_12 = arith.constant 0 : index
    %c0_13 = arith.constant 0 : index
    %17 = vector.load %arg6[%c0_12, %c0_13] : memref<512x256xbf16, #tpu.memory_space<vmem>>, vector<512x256xbf16>
    %cst_14 = arith.constant dense<0.000000e+00> : vector<8x256xf32>
    %18 = tpu.matmul %16, %17, %cst_14 {dimension_numbers = #tpu.dot_dimension_numbers<[1], [0], [0], [1], [0, 0, 1, 1], [], []>} : vector<8x512xbf16>, vector<512x256xbf16>, vector<8x256xf32> -> vector<8x256xf32>
    %c0_15 = arith.constant 0 : index
    %c0_16 = arith.constant 0 : index
    %19 = vector.load %arg7[%c0_15, %c0_16] : memref<1x256xf32, #tpu.memory_space<vmem>>, vector<1x256xf32>
    %20 = vector.broadcast %19 : vector<1x256xf32> to vector<8x256xf32>
    %21 = arith.addf %18, %20 : vector<8x256xf32>
    %cst_17 = arith.constant 0.000000e+00 : f32
    %22 = vector.broadcast %cst_17 : f32 to vector<8x256xf32>
    %23 = arith.maximumf %21, %22 : vector<8x256xf32>
    %24 = arith.truncf %23 : vector<8x256xf32> to vector<8x256xbf16>
    %c0_18 = arith.constant 0 : index
    %c0_19 = arith.constant 0 : index
    %25 = vector.load %arg8[%c0_18, %c0_19] : memref<256x128xbf16, #tpu.memory_space<vmem>>, vector<256x128xbf16>
    %cst_20 = arith.constant dense<0.000000e+00> : vector<8x128xf32>
    %26 = tpu.matmul %24, %25, %cst_20 {dimension_numbers = #tpu.dot_dimension_numbers<[1], [0], [0], [1], [0, 0, 1, 1], [], []>} : vector<8x256xbf16>, vector<256x128xbf16>, vector<8x128xf32> -> vector<8x128xf32>
    %c0_21 = arith.constant 0 : index
    %c0_22 = arith.constant 0 : index
    %27 = vector.load %arg9[%c0_21, %c0_22] : memref<1x128xf32, #tpu.memory_space<vmem>>, vector<1x128xf32>
    %28 = vector.broadcast %27 : vector<1x128xf32> to vector<8x128xf32>
    %29 = arith.addf %26, %28 : vector<8x128xf32>
    %c0_23 = arith.constant 0 : index
    %c0_24 = arith.constant 0 : index
    %30 = vector.load %arg10[%c0_23, %c0_24] : memref<8x128xf32, #tpu.memory_space<vmem>>, vector<8x128xf32>
    tpu.vector_store %arg10[%c0_23, %c0_24], %29 {strides = array<i32>} : memref<8x128xf32, #tpu.memory_space<vmem>>, vector<8x128xf32>,
    return
  }
  func.func @transform_0(%arg0: i32) -> (i32, i32) {
    %c0_i32 = arith.constant 0 : i32
    %c0_i32_0 = arith.constant 0 : i32
    return %arg0, %c0_i32 : i32, i32
  }
  func.func @transform_1(%arg0: i32) -> (i32, i32) {
    %c0_i32 = arith.constant 0 : i32
    %c0_i32_0 = arith.constant 0 : i32
    %c0_i32_1 = arith.constant 0 : i32
    return %c0_i32, %c0_i32_0 : i32, i32
  }
  func.func @transform_2(%arg0: i32) -> (i32, i32) {
    %c0_i32 = arith.constant 0 : i32
    %c0_i32_0 = arith.constant 0 : i32
    %c0_i32_1 = arith.constant 0 : i32
    return %c0_i32, %c0_i32_0 : i32, i32
  }
  func.func @transform_3(%arg0: i32) -> (i32, i32) {
    %c0_i32 = arith.constant 0 : i32
    %c0_i32_0 = arith.constant 0 : i32
    %c0_i32_1 = arith.constant 0 : i32
    return %c0_i32, %c0_i32_0 : i32, i32
  }
  func.func @transform_4(%arg0: i32) -> (i32, i32) {
    %c0_i32 = arith.constant 0 : i32
    %c0_i32_0 = arith.constant 0 : i32
    %c0_i32_1 = arith.constant 0 : i32
    return %c0_i32, %c0_i32_0 : i32, i32
  }
  func.func @transform_5(%arg0: i32) -> (i32, i32) {
    %c0_i32 = arith.constant 0 : i32
    %c0_i32_0 = arith.constant 0 : i32
    %c0_i32_1 = arith.constant 0 : i32
    return %c0_i32, %c0_i32_0 : i32, i32
  }
  func.func @transform_6(%arg0: i32) -> (i32, i32) {
    %c0_i32 = arith.constant 0 : i32
    %c0_i32_0 = arith.constant 0 : i32
    %c0_i32_1 = arith.constant 0 : i32
    return %c0_i32, %c0_i32_0 : i32, i32
  }
  func.func @transform_7(%arg0: i32) -> (i32, i32) {
    %c0_i32 = arith.constant 0 : i32
    %c0_i32_0 = arith.constant 0 : i32
    %c0_i32_1 = arith.constant 0 : i32
    return %c0_i32, %c0_i32_0 : i32, i32
  }
  func.func @transform_8(%arg0: i32) -> (i32, i32) {
    %c0_i32 = arith.constant 0 : i32
    %c0_i32_0 = arith.constant 0 : i32
    %c0_i32_1 = arith.constant 0 : i32
    return %c0_i32, %c0_i32_0 : i32, i32
  }
  func.func @transform_9(%arg0: i32) -> (i32, i32) {
    %c0_i32 = arith.constant 0 : i32
    %c0_i32_0 = arith.constant 0 : i32
    return %arg0, %c0_i32 : i32, i32
  }
}

</mosaic_0001>

<bundles_post_ra>
// kernel: tpu_custom_call.1
= control target key start
LH: loop header
LB: loop body
LE: loop exit
PB: predicated region body
PF: predicated region fallthrough
CT: control target
= control target key end

     0   :  { %14 = vsyncpa [#allocation3], 0  ;;  %s6365_s0 = inlined_call_operand.hbm [shape: bf16[8,128], index: 0, kind: input, shape index: {}]   ;;  %s6366_s1 = inlined_call_operand.hbm [shape: bf16[128,1152], index: 1, kind: input, shape index: {}]   ;;  %s6367_s2 = inlined_call_operand.hbm [shape: f32[1,1152], index: 2, kind: input, shape index: {}]   ;;  %s6368_s3 = inlined_call_operand.hbm [shape: bf16[1152,512], index: 3, kind: input, shape index: {}]   ;;  %s6369_s4 = inlined_call_operand.hbm [shape: f32[1,512], index: 4, kind: input, shape index: {}]   ;;  %s6370_s5 = inlined_call_operand.hbm [shape: bf16[512,256], index: 5, kind: input, shape index: {}]   ;;  %s6371_s6 = inlined_call_operand.hbm [shape: f32[1,256], index: 6, kind: input, shape index: {}]   ;;  %s6372_s7 = inlined_call_operand.hbm [shape: bf16[256,128], index: 7, kind: input, shape index: {}]   ;;  %s6373_s8 = inlined_call_operand.hbm [shape: f32[1,128], index: 8, kind: input, shape index: {}]   ;;  %s6374_s9 = inlined_call_operand.hbm [shape: f32[8,128], index: 9, kind: output, shape index: {}]  }
   0x1   :  { %15 = vsyncpa [#allocation6], 0 }
   0x2   :  { %16 = vsyncpa [#allocation9], 0 }
   0x3   :  { %17 = vsyncpa [#allocation12], 0 }
   0x4   :  { %18 = vsyncpa [#allocation15], 0  ;;  %s35_s11 = sshll.u32 %s6366_s1, 4  ;;  %s36_s11 = int_to_ptr.hbm [resolvable:$true] %s35_s11 }
   0x5   :  { %19 = vsyncpa [#allocation4], 0  ;;  %s6134_s12 = smov [#allocation5]   ;;  %s59_s16 = sshll.u32 %s6368_s3, 4  ;;  %s60_s16 = int_to_ptr.hbm [resolvable:$true] %s59_s16 }
   0x6   :  { %s37_s13 = sshll.u32 %s6134_s12, 4  ;;  %s6135_s17 = smov 576   ;;  %s38_s13 = int_to_ptr.vmem [resolvable:$true] %s37_s13 }
   0x7   :  { %s6136_s18 = smov 36   ;;  %s6137_s19 = smov [#allocation8]  }
   0x8   :  { %43 = dma.hbm_to_vmem [thread:$0]  %s36_s11, 9216, %s38_s13, [#allocation6], %s6135_s17, %s6135_s17, %s6136_s18  }
   0x9   :  { %s61_s20 = sshll.u32 %s6137_s19, 4  ;;  %s6138_s21 = smov 256   ;;  %s62_s20 = int_to_ptr.vmem [resolvable:$true] %s61_s20 }
   0xa   :  { %s6139_s22 = smov 16   ;;  %s83_s24 = sshll.u32 %s6370_s5, 4  ;;  %s84_s24 = int_to_ptr.hbm [resolvable:$true] %s83_s24 }
   0xb   :  { %67 = dma.hbm_to_vmem [thread:$0]  %s60_s16, 36864, %s62_s20, [#allocation9], %s6138_s21, %s6138_s21, %s6139_s22  }
   0xc   :  { %s6140_s25 = smov [#allocation11]   ;;  %s107_s28 = sshll.u32 %s6372_s7, 4  ;;  %s108_s28 = int_to_ptr.hbm [resolvable:$true] %s107_s28 }
   0xd   :  { %s85_s26 = sshll.u32 %s6140_s25, 4  ;;  %s6141_s29 = smov 128   ;;  %s86_s26 = int_to_ptr.vmem [resolvable:$true] %s85_s26 }
   0xe   :  { %s6142_s30 = smov 8   ;;  %s6143_s10 = smov [#allocation14]  }
   0xf   :  { %91 = dma.hbm_to_vmem [thread:$0]  %s84_s24, 8192, %s86_s26, [#allocation12], %s6141_s29, %s6141_s29, %s6142_s30  }
  0x10   :  { %s109_s11 = sshll.u32 %s6143_s10, 4  ;;  %s6144_s12 = smov 64   ;;  %s110_s11 = int_to_ptr.vmem [resolvable:$true] %s109_s11 }
  0x11   :  { %s6145_s13 = smov 4   ;;  %s25_s15 = sshll.u32 %s6365_s0, 4  ;;  %s26_s15 = int_to_ptr.hbm [resolvable:$true] %s25_s15 }
  0x12   :  { %115 = dma.hbm_to_vmem [thread:$0]  %s108_s28, 2048, %s110_s11, [#allocation15], %s6144_s12, %s6144_s12, %s6145_s13  }
  0x13   :  { %s6146_s16 = smov [#allocation2]   ;;  %s49_s19 = sshll.u32 %s6367_s2, 4  ;;  %s50_s19 = int_to_ptr.hbm [resolvable:$true] %s49_s19 }
  0x14   :  { %s27_s17 = sshll.u32 %s6146_s16, 4  ;;  %s6147_s20 = smov [#allocation7]   ;;  %s28_s17 = int_to_ptr.vmem [resolvable:$true] %s27_s17 }
  0x15   :  { %30 = dma.hbm_to_vmem [thread:$0]  %s26_s15, 64, %s28_s17, [#allocation3]  }
  0x16   :  { %s51_s21 = sshll.u32 %s6147_s20, 4  ;;  %s73_s23 = sshll.u32 %s6369_s4, 4  ;;  %s52_s21 = int_to_ptr.vmem [resolvable:$true] %s51_s21  ;;  %s74_s23 = int_to_ptr.hbm [resolvable:$true] %s73_s23 }
  0x17   :  { %54 = dma.hbm_to_vmem [thread:$0]  %s50_s19, 144, %s52_s21, [#allocation6]  }
  0x18   :  { %s97_s25 = sshll.u32 %s6371_s6, 4  ;;  %s6148_s26 = smov [#allocation10]   ;;  %s98_s25 = int_to_ptr.hbm [resolvable:$true] %s97_s25 }
  0x19   :  { %s75_s27 = sshll.u32 %s6148_s26, 4  ;;  %s6149_s2 = smov [#allocation13]   ;;  %s76_s27 = int_to_ptr.vmem [resolvable:$true] %s75_s27 }
  0x1a   :  { %78 = dma.hbm_to_vmem [thread:$0]  %s74_s23, 64, %s76_s27, [#allocation9]  }
  0x1b   :  { %s99_s3 = sshll.u32 %s6149_s2, 4  ;;  %s121_s30 = sshll.u32 %s6373_s8, 4  ;;  %s100_s3 = int_to_ptr.vmem [resolvable:$true] %s99_s3  ;;  %s122_s30 = int_to_ptr.hbm [resolvable:$true] %s121_s30 }
  0x1c   :  { %102 = dma.hbm_to_vmem [thread:$0]  %s98_s25, 32, %s100_s3, [#allocation12]  }
  0x1d   :  { %s6150_s4 = smov [#allocation16]  }
  0x1e   :  { %s123_s10 = sshll.u32 %s6150_s4, 4  ;;  %s124_s10 = int_to_ptr.vmem [resolvable:$true] %s123_s10 }
  0x1f   :  { %126 = dma.hbm_to_vmem [thread:$0]  %s122_s30, 16, %s124_s10, [#allocation15]  }
  0x20   :  { %6122 = dma.done.wait [#allocation3], 64  }
  0x21   :  { %6123 = vsyncadd [#allocation3], 4294967232 }
  0x22   :  { %6124 = dma.done.wait [#allocation6], 9360  }
  0x23   :  { %6125 = vsyncadd [#allocation6], 4294957936 }
  0x24   :  { %6126 = dma.done.wait [#allocation9], 36928  }
  0x25   :  { %6127 = vsyncadd [#allocation9], 4294930368 }
  0x26   :  { %6128 = dma.done.wait [#allocation12], 8224  }
  0x27   :  { %6129 = vsyncadd [#allocation12], 4294959072 }
  0x28   :  { %6130 = dma.done.wait [#allocation15], 2064  }
  0x29   :  { %6131 = vsyncadd [#allocation15], 4294965232  ;;  %v3915_v0 = vld [vmem:[#allocation5 + $0x1f8] sm:$0xf]  ;;  %v5488_v1 = vld [vmem:[#allocation5 + $0x218] sm:$0xf0] }
  0x2a   :  { %v5484_v2 = vld [vmem:[#allocation5 + $0x1fc] sm:$0xf]  ;;  %v3916_v3 = vor.u32 %v5488_v1, %v3915_v0  ;;  %v3917_v4 = vld [vmem:[#allocation5 + $0x21c] sm:$0xf0]  ;;  %v5489_v6 = vld [vmem:[#allocation5 + $0x220] sm:$0xf0] }
  0x2b   :  { %v3923_v5 = vld [vmem:[#allocation5 + $0x200] sm:$0xf]  ;;  %v3920_v7 = vor.u32 %v5484_v2, %v3917_v4  ;;  %v5485_v9 = vld [vmem:[#allocation5 + $0x204] sm:$0xf]  ;;  %v3925_v10 = vld [vmem:[#allocation5 + $0x224] sm:$0xf0] }
  0x2c   :  { %v3924_v8 = vor.u32 %v5489_v6, %v3923_v5  ;;  %v3879_v11 = vld [vmem:[#allocation5 + $0x1b0] sm:$0xf]  ;;  %634 = vmatpush.bf16.msra.mxu0 %v3916_v3  ;;  %v3928_v12 = vor.u32 %v5485_v9, %v3925_v10  ;;  %v5479_v13 = vld [vmem:[#allocation5 + $0x1d0] sm:$0xf0]  ;;  %v3881_v15 = vld [vmem:[#allocation5 + $0x1d4] sm:$0xf0] }
  0x2d   :  { %v5475_v14 = vld [vmem:[#allocation5 + $0x1b4] sm:$0xf]  ;;  %647 = vmatpush.bf16.msra.mxu1 %v3920_v7  ;;  %v3880_v16 = vor.u32 %v5479_v13, %v3879_v11  ;;  %v3887_v18 = vld [vmem:[#allocation5 + $0x1b8] sm:$0xf]  ;;  %v5480_v19 = vld [vmem:[#allocation5 + $0x1d8] sm:$0xf0] }
  0x2e   :  { %660 = vmatpush.bf16.msra.mxu2 %v3924_v8  ;;  %v3884_v17 = vor.u32 %v5475_v14, %v3881_v15  ;;  %v5476_v20 = vld [vmem:[#allocation5 + $0x1bc] sm:$0xf]  ;;  %673 = vmatpush.bf16.msra.mxu3 %v3928_v12  ;;  %v3888_v21 = vor.u32 %v5480_v19, %v3887_v18  ;;  %v3889_v22 = vld [vmem:[#allocation5 + $0x1dc] sm:$0xf0]  ;;  %v3843_v23 = vld [vmem:[#allocation5 + $0x168] sm:$0xf] }
  0x2f   :  { %v5470_v24 = vld [vmem:[#allocation5 + $0x188] sm:$0xf0]  ;;  %v3892_v25 = vor.u32 %v5476_v20, %v3889_v22  ;;  %v3845_v27 = vld [vmem:[#allocation5 + $0x18c] sm:$0xf0]  ;;  %v5471_v30 = vld [vmem:[#allocation5 + $0x190] sm:$0xf0] }
  0x30   :  { %v5466_v26 = vld [vmem:[#allocation5 + $0x16c] sm:$0xf]  ;;  %v3851_v28 = vld [vmem:[#allocation5 + $0x170] sm:$0xf]  ;;  %635 = vmatpush.bf16.msra.mxu0 %v3880_v16  ;;  %v3844_v29 = vor.u32 %v5470_v24, %v3843_v23  ;;  %v5467_v31 = vld [vmem:[#allocation5 + $0x174] sm:$0xf] }
  0x31   :  { %v3853_v32 = vld [vmem:[#allocation5 + $0x194] sm:$0xf0]  ;;  %648 = vmatpush.bf16.msra.mxu1 %v3884_v17  ;;  %v3848_v33 = vor.u32 %v5466_v26, %v3845_v27  ;;  %v3852_v34 = vor.u32 %v5471_v30, %v3851_v28  ;;  %v3807_v35 = vld [vmem:[#allocation5 + $0x120] sm:$0xf]  ;;  %v5461_v36 = vld [vmem:[#allocation5 + $0x140] sm:$0xf0] }
  0x32   :  { %661 = vmatpush.bf16.msra.mxu2 %v3888_v21  ;;  %v5457_v37 = vld [vmem:[#allocation5 + $0x124] sm:$0xf]  ;;  %674 = vmatpush.bf16.msra.mxu3 %v3892_v25  ;;  %v3856_v38 = vor.u32 %v5467_v31, %v3853_v32  ;;  %v3809_v39 = vld [vmem:[#allocation5 + $0x144] sm:$0xf0]  ;;  %v5462_v41 = vld [vmem:[#allocation5 + $0x148] sm:$0xf0]  ;;  %v3808_v44 = vor.u32 %v5461_v36, %v3807_v35 }
  0x33   :  { %v3815_v40 = vld [vmem:[#allocation5 + $0x128] sm:$0xf]  ;;  %v5458_v42 = vld [vmem:[#allocation5 + $0x12c] sm:$0xf]  ;;  %v3817_v43 = vld [vmem:[#allocation5 + $0x14c] sm:$0xf0]  ;;  %v3812_v45 = vor.u32 %v5457_v37, %v3809_v39 }
  0x34   :  { %636 = vmatpush.bf16.msra.mxu0 %v3844_v29  ;;  %v3816_v46 = vor.u32 %v5462_v41, %v3815_v40  ;;  %v3771_v47 = vld [vmem:[#allocation5 + $0xd8] sm:$0xf]  ;;  %v5452_v48 = vld [vmem:[#allocation5 + $0xf8] sm:$0xf0]  ;;  %v3820_v50 = vor.u32 %v5458_v42, %v3817_v43  ;;  %v3773_v51 = vld [vmem:[#allocation5 + $0xfc] sm:$0xf0] }
  0x35   :  { %649 = vmatpush.bf16.msra.mxu1 %v3848_v33  ;;  %v5448_v49 = vld [vmem:[#allocation5 + $0xdc] sm:$0xf]  ;;  %v3779_v52 = vld [vmem:[#allocation5 + $0xe0] sm:$0xf]  ;;  %v5453_v53 = vld [vmem:[#allocation5 + $0x100] sm:$0xf0]  ;;  %v3772_v56 = vor.u32 %v5452_v48, %v3771_v47 }
  0x36   :  { %662 = vmatpush.bf16.msra.mxu2 %v3852_v34  ;;  %675 = vmatpush.bf16.msra.mxu3 %v3856_v38  ;;  %v5449_v54 = vld [vmem:[#allocation5 + $0xe4] sm:$0xf]  ;;  %v3781_v55 = vld [vmem:[#allocation5 + $0x104] sm:$0xf0]  ;;  %v3776_v57 = vor.u32 %v5448_v49, %v3773_v51  ;;  %v3780_v58 = vor.u32 %v5453_v53, %v3779_v52  ;;  %v3735_v59 = vld [vmem:[#allocation5 + $0x90] sm:$0xf] }
  0x37   :  { %v5443_v60 = vld [vmem:[#allocation5 + $0xb0] sm:$0xf0]  ;;  %v3784_v62 = vor.u32 %v5449_v54, %v3781_v55  ;;  %v3737_v63 = vld [vmem:[#allocation5 + $0xb4] sm:$0xf0]  ;;  %v5444_v1 = vld [vmem:[#allocation5 + $0xb8] sm:$0xf0] }
  0x38   :  { %637 = vmatpush.bf16.msra.mxu0 %v3808_v44  ;;  %v5439_v61 = vld [vmem:[#allocation5 + $0x94] sm:$0xf]  ;;  %v3743_v0 = vld [vmem:[#allocation5 + $0x98] sm:$0xf]  ;;  %v5440_v2 = vld [vmem:[#allocation5 + $0x9c] sm:$0xf]  ;;  %v3736_v4 = vor.u32 %v5443_v60, %v3735_v59 }
  0x39   :  { %650 = vmatpush.bf16.msra.mxu1 %v3812_v45  ;;  %v3745_v3 = vld [vmem:[#allocation5 + $0xbc] sm:$0xf0]  ;;  %v3740_v5 = vor.u32 %v5439_v61, %v3737_v63  ;;  %v3744_v6 = vor.u32 %v5444_v1, %v3743_v0  ;;  %v3699_v7 = vld [vmem:[#allocation5 + $0x48] sm:$0xf]  ;;  %v5434_v8 = vld [vmem:[#allocation5 + $0x68] sm:$0xf0] }
  0x3a   :  { %663 = vmatpush.bf16.msra.mxu2 %v3816_v46  ;;  %676 = vmatpush.bf16.msra.mxu3 %v3820_v50  ;;  %v5430_v9 = vld [vmem:[#allocation5 + $0x4c] sm:$0xf]  ;;  %v3748_v10 = vor.u32 %v5440_v2, %v3745_v3  ;;  %v3701_v11 = vld [vmem:[#allocation5 + $0x6c] sm:$0xf0]  ;;  %v5435_v13 = vld [vmem:[#allocation5 + $0x70] sm:$0xf0]  ;;  %v3700_v16 = vor.u32 %v5434_v8, %v3699_v7 }
  0x3b   :  { %v3707_v12 = vld [vmem:[#allocation5 + $0x50] sm:$0xf]  ;;  %v5431_v14 = vld [vmem:[#allocation5 + $0x54] sm:$0xf]  ;;  %v3709_v15 = vld [vmem:[#allocation5 + $0x74] sm:$0xf0]  ;;  %v3704_v19 = vor.u32 %v5430_v9, %v3701_v11 }
  0x3c   :  { %638 = vmatpush.bf16.msra.mxu0 %v3772_v56  ;;  %v3663_v17 = vld [vmem:[#allocation5] sm:$0xf]  ;;  %v5425_v18 = vld [vmem:[#allocation5 + $0x20] sm:$0xf0]  ;;  %v3708_v20 = vor.u32 %v5435_v13, %v3707_v12  ;;  %v3665_v22 = vld [vmem:[#allocation5 + $0x24] sm:$0xf0]  ;;  %v3712_v24 = vor.u32 %v5431_v14, %v3709_v15 }
  0x3d   :  { %651 = vmatpush.bf16.msra.mxu1 %v3776_v57  ;;  %v5421_v21 = vld [vmem:[#allocation5 + $0x4] sm:$0xf]  ;;  %v3671_v23 = vld [vmem:[#allocation5 + $0x8] sm:$0xf]  ;;  %v5426_v25 = vld [vmem:[#allocation5 + $0x28] sm:$0xf0]  ;;  %v3664_v31 = vor.u32 %v5425_v18, %v3663_v17 }
  0x3e   :  { %664 = vmatpush.bf16.msra.mxu2 %v3780_v58  ;;  %677 = vmatpush.bf16.msra.mxu3 %v3784_v62  ;;  %v5422_v26 = vld [vmem:[#allocation5 + $0xc] sm:$0xf]  ;;  %v3673_v27 = vld [vmem:[#allocation5 + $0x2c] sm:$0xf0]  ;;  %v3931_v28 = vld [vmem:[#allocation5 + $0x208] sm:$0xf]  ;;  %v3668_v35 = vor.u32 %v5421_v21, %v3665_v22  ;;  %v3672_v36 = vor.u32 %v5426_v25, %v3671_v23 }
  0x3f   :  { %v5490_v29 = vld [vmem:[#allocation5 + $0x228] sm:$0xf0]  ;;  %v3933_v32 = vld [vmem:[#allocation5 + $0x22c] sm:$0xf0]  ;;  %v5491_v34 = vld [vmem:[#allocation5 + $0x230] sm:$0xf0]  ;;  %v3676_v39 = vor.u32 %v5422_v26, %v3673_v27 }
  0x40   :  { %639 = vmatpush.bf16.msra.mxu0 %v3736_v4  ;;  %v5486_v30 = vld [vmem:[#allocation5 + $0x20c] sm:$0xf]  ;;  %v3939_v33 = vld [vmem:[#allocation5 + $0x210] sm:$0xf]  ;;  %v5487_v37 = vld [vmem:[#allocation5 + $0x214] sm:$0xf]  ;;  %v3932_v40 = vor.u32 %v5490_v29, %v3931_v28 }
  0x41   :  { %652 = vmatpush.bf16.msra.mxu1 %v3740_v5  ;;  %v3941_v38 = vld [vmem:[#allocation5 + $0x234] sm:$0xf0]  ;;  %v3936_v41 = vor.u32 %v5486_v30, %v3933_v32  ;;  %v3940_v42 = vor.u32 %v5491_v34, %v3939_v33  ;;  %v3895_v43 = vld [vmem:[#allocation5 + $0x1c0] sm:$0xf]  ;;  %v5481_v44 = vld [vmem:[#allocation5 + $0x1e0] sm:$0xf0] }
  0x42   :  { %665 = vmatpush.bf16.msra.mxu2 %v3744_v6  ;;  %678 = vmatpush.bf16.msra.mxu3 %v3748_v10  ;;  %v5477_v45 = vld [vmem:[#allocation5 + $0x1c4] sm:$0xf]  ;;  %v3944_v46 = vor.u32 %v5487_v37, %v3941_v38  ;;  %v3897_v47 = vld [vmem:[#allocation5 + $0x1e4] sm:$0xf0]  ;;  %v5482_v49 = vld [vmem:[#allocation5 + $0x1e8] sm:$0xf0]  ;;  %v3896_v53 = vor.u32 %v5481_v44, %v3895_v43 }
  0x43   :  { %v3903_v48 = vld [vmem:[#allocation5 + $0x1c8] sm:$0xf]  ;;  %v6229_v50 = vld [vmem:[#allocation2] sm:$0xf]  ;;  %v5478_v51 = vld [vmem:[#allocation5 + $0x1cc] sm:$0xf]  ;;  %v3900_v54 = vor.u32 %v5477_v45, %v3897_v47 }
  0x44   :  { %640 = vmatpush.bf16.msra.mxu0 %v3700_v16  ;;  %v3905_v52 = vld [vmem:[#allocation5 + $0x1ec] sm:$0xf0]  ;;  %v3904_v55 = vor.u32 %v5482_v49, %v3903_v48  ;;  %v3859_v56 = vld [vmem:[#allocation5 + $0x178] sm:$0xf]  ;;  %v5472_v57 = vld [vmem:[#allocation5 + $0x198] sm:$0xf0] }
  0x45   :  { %653 = vmatpush.bf16.msra.mxu1 %v3704_v19  ;;  %v5468_v58 = vld [vmem:[#allocation5 + $0x17c] sm:$0xf]  ;;  %v3908_v59 = vor.u32 %v5478_v51, %v3905_v52  ;;  %v3861_v60 = vld [vmem:[#allocation5 + $0x19c] sm:$0xf0]  ;;  %v5473_v62 = vld [vmem:[#allocation5 + $0x1a0] sm:$0xf0]  ;;  %v3860_v1 = vor.u32 %v5472_v57, %v3859_v56 }
  0x46   :  { %666 = vmatpush.bf16.msra.mxu2 %v3708_v20  ;;  %679 = vmatpush.bf16.msra.mxu3 %v3712_v24  ;;  %v3867_v61 = vld [vmem:[#allocation5 + $0x180] sm:$0xf]  ;;  %v5469_v63 = vld [vmem:[#allocation5 + $0x184] sm:$0xf]  ;;  %v3869_v0 = vld [vmem:[#allocation5 + $0x1a4] sm:$0xf0]  ;;  %v3864_v2 = vor.u32 %v5468_v58, %v3861_v60 }
  0x47   :  { %v3868_v3 = vor.u32 %v5473_v62, %v3867_v61  ;;  %v3823_v4 = vld [vmem:[#allocation5 + $0x130] sm:$0xf]  ;;  %v5463_v5 = vld [vmem:[#allocation5 + $0x150] sm:$0xf0]  ;;  %v3872_v7 = vor.u32 %v5469_v63, %v3869_v0  ;;  %v3825_v8 = vld [vmem:[#allocation5 + $0x154] sm:$0xf0] }
  0x48   :  { %641 = vmatpush.bf16.msra.mxu0 %v3664_v31  ;;  %v5459_v6 = vld [vmem:[#allocation5 + $0x134] sm:$0xf]  ;;  %v3831_v9 = vld [vmem:[#allocation5 + $0x138] sm:$0xf]  ;;  %v5464_v10 = vld [vmem:[#allocation5 + $0x158] sm:$0xf0]  ;;  %v3824_v13 = vor.u32 %v5463_v5, %v3823_v4 }
  0x49   :  { %654 = vmatpush.bf16.msra.mxu1 %v3668_v35  ;;  %v5460_v11 = vld [vmem:[#allocation5 + $0x13c] sm:$0xf]  ;;  %v3833_v12 = vld [vmem:[#allocation5 + $0x15c] sm:$0xf0]  ;;  %v3828_v14 = vor.u32 %v5459_v6, %v3825_v8  ;;  %v3832_v15 = vor.u32 %v5464_v10, %v3831_v9  ;;  %v3787_v16 = vld [vmem:[#allocation5 + $0xe8] sm:$0xf] }
  0x4a   :  { %667 = vmatpush.bf16.msra.mxu2 %v3672_v36  ;;  %680 = vmatpush.bf16.msra.mxu3 %v3676_v39  ;;  %v5454_v17 = vld [vmem:[#allocation5 + $0x108] sm:$0xf0]  ;;  %v3836_v19 = vor.u32 %v5460_v11, %v3833_v12  ;;  %v3789_v20 = vld [vmem:[#allocation5 + $0x10c] sm:$0xf0]  ;;  %v5455_v22 = vld [vmem:[#allocation5 + $0x110] sm:$0xf0] }
  0x4b   :  { %642 = vmatmul.bf16.vlgmr.msra.gmra.mxu0 %v6229_v50  ;;  %v5450_v18 = vld [vmem:[#allocation5 + $0xec] sm:$0xf]  ;;  %v3795_v21 = vld [vmem:[#allocation5 + $0xf0] sm:$0xf]  ;;  %v5451_v23 = vld [vmem:[#allocation5 + $0xf4] sm:$0xf]  ;;  %v3788_v25 = vor.u32 %v5454_v17, %v3787_v16 }
  0x4c   :  { %686 = vmatpush.bf16.msrb.mxu0 %v3932_v40  ;;  %655 = vmatmul.bf16.vlgmr.msra.gmra.mxu1 %v6229_v50  ;;  %v3797_v24 = vld [vmem:[#allocation5 + $0x114] sm:$0xf0]  ;;  %v3751_v26 = vld [vmem:[#allocation5 + $0xa0] sm:$0xf]  ;;  %v5445_v27 = vld [vmem:[#allocation5 + $0xc0] sm:$0xf0]  ;;  %v3792_v28 = vor.u32 %v5450_v18, %v3789_v20  ;;  %v3796_v29 = vor.u32 %v5455_v22, %v3795_v21 }
  0x4d   :  { %699 = vmatpush.bf16.msrb.mxu1 %v3936_v41  ;;  %668 = vmatmul.bf16.vlgmr.msra.gmra.mxu2 %v6229_v50  ;;  %v5441_v30 = vld [vmem:[#allocation5 + $0xa4] sm:$0xf]  ;;  %v3800_v31 = vor.u32 %v5451_v23, %v3797_v24  ;;  %v3753_v32 = vld [vmem:[#allocation5 + $0xc4] sm:$0xf0]  ;;  %v5446_v34 = vld [vmem:[#allocation5 + $0xc8] sm:$0xf0]  ;;  %v3752_v37 = vor.u32 %v5445_v27, %v3751_v26 }
  0x4e   :  { %712 = vmatpush.bf16.msrb.mxu2 %v3940_v42  ;;  %725 = vmatpush.bf16.msrb.mxu3 %v3944_v46  ;;  %v3759_v33 = vld [vmem:[#allocation5 + $0xa8] sm:$0xf]  ;;  %v5442_v35 = vld [vmem:[#allocation5 + $0xac] sm:$0xf]  ;;  %v3761_v36 = vld [vmem:[#allocation5 + $0xcc] sm:$0xf0]  ;;  %v3756_v38 = vor.u32 %v5441_v30, %v3753_v32 }
  0x4f   :  { %681 = vmatmul.bf16.vlgmr.msra.gmra.mxu3 %v6229_v50  ;;  %v3760_v39 = vor.u32 %v5446_v34, %v3759_v33  ;;  %v3715_v40 = vld [vmem:[#allocation5 + $0x58] sm:$0xf]  ;;  %v5436_v41 = vld [vmem:[#allocation5 + $0x78] sm:$0xf0]  ;;  %v3764_v43 = vor.u32 %v5442_v35, %v3761_v36  ;;  %v3717_v44 = vld [vmem:[#allocation5 + $0x7c] sm:$0xf0] }
  0x50   :  { %687 = vmatpush.bf16.msrb.mxu0 %v3896_v53  ;;  %v5432_v42 = vld [vmem:[#allocation5 + $0x5c] sm:$0xf]  ;;  %v3723_v45 = vld [vmem:[#allocation5 + $0x60] sm:$0xf]  ;;  %v5437_v46 = vld [vmem:[#allocation5 + $0x80] sm:$0xf0]  ;;  %v3716_v49 = vor.u32 %v5436_v41, %v3715_v40 }
  0x51   :  { %700 = vmatpush.bf16.msrb.mxu1 %v3900_v54  ;;  %v5433_v47 = vld [vmem:[#allocation5 + $0x64] sm:$0xf]  ;;  %v3725_v48 = vld [vmem:[#allocation5 + $0x84] sm:$0xf0]  ;;  %v3679_v51 = vld [vmem:[#allocation5 + $0x10] sm:$0xf]  ;;  %v3720_v52 = vor.u32 %v5432_v42, %v3717_v44  ;;  %v3724_v53 = vor.u32 %v5437_v46, %v3723_v45 }
  0x52   :  { %713 = vmatpush.bf16.msrb.mxu2 %v3904_v55  ;;  %726 = vmatpush.bf16.msrb.mxu3 %v3908_v59  ;;  %v5427_v54 = vld [vmem:[#allocation5 + $0x30] sm:$0xf0]  ;;  %v3681_v56 = vld [vmem:[#allocation5 + $0x34] sm:$0xf0]  ;;  %v3728_v57 = vor.u32 %v5433_v47, %v3725_v48  ;;  %v5428_v59 = vld [vmem:[#allocation5 + $0x38] sm:$0xf0] }
  0x53   :  { %v5423_v55 = vld [vmem:[#allocation5 + $0x14] sm:$0xf]  ;;  %v3687_v58 = vld [vmem:[#allocation5 + $0x18] sm:$0xf]  ;;  %v5424_v60 = vld [vmem:[#allocation5 + $0x1c] sm:$0xf]  ;;  %v3680_v0 = vor.u32 %v5427_v54, %v3679_v51 }
  0x54   :  { %688 = vmatpush.bf16.msrb.mxu0 %v3860_v1  ;;  %v3689_v61 = vld [vmem:[#allocation5 + $0x3c] sm:$0xf0]  ;;  %v3947_v62 = vld [vmem:[#allocation5 + $0x218] sm:$0xf]  ;;  %v5492_v63 = vld [vmem:[#allocation5 + $0x238] sm:$0xf0]  ;;  %v3684_v1 = vor.u32 %v5423_v55, %v3681_v56 }
  0x55   :  { %701 = vmatpush.bf16.msrb.mxu1 %v3864_v2  ;;  %v3688_v2 = vor.u32 %v5428_v59, %v3687_v58  ;;  %v3948_v4 = vor.u32 %v5492_v63, %v3947_v62  ;;  %v3911_v5 = vld [vmem:[#allocation5 + $0x1d0] sm:$0xf]  ;;  %v5483_v6 = vld [vmem:[#allocation5 + $0x1f0] sm:$0xf0]  ;;  %v5474_v8 = vld [vmem:[#allocation5 + $0x1a8] sm:$0xf0] }
  0x56   :  { %714 = vmatpush.bf16.msrb.mxu2 %v3868_v3  ;;  %727 = vmatpush.bf16.msrb.mxu3 %v3872_v7  ;;  %v3692_v3 = vor.u32 %v5424_v60, %v3689_v61  ;;  %v3875_v7 = vld [vmem:[#allocation5 + $0x188] sm:$0xf]  ;;  %v5523_v10 = vld [vmem:[#allocation8 + $0xec] sm:$0xf0]  ;;  %v3912_v12 = vor.u32 %v5483_v6, %v3911_v5  ;;  %v3839_v22 = vld [vmem:[#allocation5 + $0x140] sm:$0xf] }
  0x57   :  { %v4063_v9 = vld [vmem:[#allocation8 + $0xe0] sm:$0xf]  ;;  %v5519_v16 = vld [vmem:[#allocation8 + $0xcc] sm:$0xf0]  ;;  %v3876_v26 = vor.u32 %v5474_v8, %v3875_v7  ;;  %v5447_v56 = vld [vmem:[#allocation5 + $0xd0] sm:$0xf0] }
  0x58   :  { %689 = vmatpush.bf16.msrb.mxu0 %v3824_v13  ;;  %v4191_v11 = vld [vmem:[#allocation8 + $0x1e0] sm:$0xf]  ;;  %v4064_v13 = vor.u32 %v5523_v10, %v4063_v9  ;;  %v5587_v21 = vld [vmem:[#allocation8 + $0x2ec] sm:$0xf0]  ;;  %v3695_v10 = vld [vmem:[#allocation5 + $0x20] sm:$0xf] }
  0x59   :  { %702 = vmatpush.bf16.msrb.mxu1 %v3828_v14  ;;  %v5555_v14 = vld [vmem:[#allocation8 + $0x1ec] sm:$0xf0]  ;;  %v4175_v18 = vld [vmem:[#allocation8 + $0x1c0] sm:$0xf]  ;;  %s6151_s6 = smov [#allocation17]   ;;  %s3647_s13 = sshll.u32 %s6374_s9, 4  ;;  %s3648_s13 = int_to_ptr.hbm [resolvable:$true] %s3647_s13 }
  0x5a   :  { %715 = vmatpush.bf16.msrb.mxu2 %v3832_v15  ;;  %728 = vmatpush.bf16.msrb.mxu3 %v3836_v19  ;;  %v4047_v15 = vld [vmem:[#allocation8 + $0xc0] sm:$0xf]  ;;  %v4192_v17 = vor.u32 %v5555_v14, %v4191_v11  ;;  %v5551_v19 = vld [vmem:[#allocation8 + $0x1cc] sm:$0xf0]  ;;  %s3645_s8 = sshll.u32 %s6151_s6, 4  ;;  %s3646_s8 = int_to_ptr.vmem [resolvable:$true] %s3645_s8 }
  0x5b   :  { %v4319_v20 = vld [vmem:[#allocation8 + $0x2e0] sm:$0xf]  ;;  %v4048_v23 = vor.u32 %v5519_v16, %v4047_v15  ;;  %v4176_v27 = vor.u32 %v5551_v19, %v4175_v18  ;;  %v5583_v30 = vld [vmem:[#allocation8 + $0x2cc] sm:$0xf0] }
  0x5c   :  { %690 = vmatpush.bf16.msrb.mxu0 %v3788_v25  ;;  %v4320_v24 = vor.u32 %v5587_v21, %v4319_v20  ;;  %v4031_v25 = vld [vmem:[#allocation8 + $0xa0] sm:$0xf]  ;;  %v5547_v33 = vld [vmem:[#allocation8 + $0x1ac] sm:$0xf0] }
  0x5d   :  { %703 = vmatpush.bf16.msrb.mxu1 %v3792_v28  ;;  %v5515_v28 = vld [vmem:[#allocation8 + $0xac] sm:$0xf0]  ;;  %v4159_v32 = vld [vmem:[#allocation8 + $0x1a0] sm:$0xf] }
  0x5e   :  { %716 = vmatpush.bf16.msrb.mxu2 %v3796_v29  ;;  %729 = vmatpush.bf16.msrb.mxu3 %v3800_v31  ;;  %v4303_v29 = vld [vmem:[#allocation8 + $0x2c0] sm:$0xf]  ;;  %v5465_v31 = vld [vmem:[#allocation5 + $0x160] sm:$0xf0]  ;;  %v4032_v35 = vor.u32 %v5515_v28, %v4031_v25  ;;  %v4160_v40 = vor.u32 %v5547_v33, %v4159_v32  ;;  %v5511_v42 = vld [vmem:[#allocation8 + $0x8c] sm:$0xf0] }
  0x5f   :  { %v4304_v34 = vor.u32 %v5583_v30, %v4303_v29  ;;  %v4287_v36 = vld [vmem:[#allocation8 + $0x2a0] sm:$0xf]  ;;  %v5543_v45 = vld [vmem:[#allocation8 + $0x18c] sm:$0xf0] }
  0x60   :  { %691 = vmatpush.bf16.msrb.mxu0 %v3752_v37  ;;  %v5579_v37 = vld [vmem:[#allocation8 + $0x2ac] sm:$0xf0]  ;;  %v4015_v41 = vld [vmem:[#allocation8 + $0x80] sm:$0xf] }
  0x61   :  { %704 = vmatpush.bf16.msrb.mxu1 %v3756_v38  ;;  %v3840_v38 = vor.u32 %v5465_v31, %v3839_v22  ;;  %v4143_v44 = vld [vmem:[#allocation8 + $0x180] sm:$0xf]  ;;  %v4288_v46 = vor.u32 %v5579_v37, %v4287_v36  ;;  %v5575_v48 = vld [vmem:[#allocation8 + $0x28c] sm:$0xf0] }
  0x62   :  { %717 = vmatpush.bf16.msrb.mxu2 %v3760_v39  ;;  %730 = vmatpush.bf16.msrb.mxu3 %v3764_v43  ;;  %v3803_v39 = vld [vmem:[#allocation5 + $0xf8] sm:$0xf]  ;;  %v5456_v43 = vld [vmem:[#allocation5 + $0x118] sm:$0xf0]  ;;  %v4271_v47 = vld [vmem:[#allocation8 + $0x280] sm:$0xf] }
  0x63   :  { %v3804_v51 = vor.u32 %v5456_v43, %v3803_v39  ;;  %v3999_v54 = vld [vmem:[#allocation8 + $0x60] sm:$0xf]  ;;  %v5507_v55 = vld [vmem:[#allocation8 + $0x6c] sm:$0xf0]  ;;  %v4272_v59 = vor.u32 %v5575_v48, %v4271_v47 }
  0x64   :  { %692 = vmatpush.bf16.msrb.mxu0 %v3716_v49  ;;  %v4016_v49 = vor.u32 %v5511_v42, %v4015_v41  ;;  %v5539_v58 = vld [vmem:[#allocation8 + $0x16c] sm:$0xf0]  ;;  %v4255_v60 = vld [vmem:[#allocation8 + $0x260] sm:$0xf]  ;;  %v4000_v62 = vor.u32 %v5507_v55, %v3999_v54 }
  0x65   :  { %705 = vmatpush.bf16.msrb.mxu1 %v3720_v52  ;;  %v3767_v52 = vld [vmem:[#allocation5 + $0xb0] sm:$0xf]  ;;  %v5571_v61 = vld [vmem:[#allocation8 + $0x26c] sm:$0xf0]  ;;  %v4111_v5 = vld [vmem:[#allocation8 + $0x140] sm:$0xf] }
  0x66   :  { %718 = vmatpush.bf16.msrb.mxu2 %v3724_v53  ;;  %731 = vmatpush.bf16.msrb.mxu3 %v3728_v57  ;;  %v4144_v53 = vor.u32 %v5543_v45, %v4143_v44  ;;  %v4127_v57 = vld [vmem:[#allocation8 + $0x160] sm:$0xf]  ;;  %v3768_v63 = vor.u32 %v5447_v56, %v3767_v52  ;;  %v5535_v6 = vld [vmem:[#allocation8 + $0x14c] sm:$0xf0]  ;;  %v4256_v7 = vor.u32 %v5571_v61, %v4255_v60 }
  0x67   :  { %v4239_v8 = vld [vmem:[#allocation8 + $0x240] sm:$0xf]  ;;  %v5567_v9 = vld [vmem:[#allocation8 + $0x24c] sm:$0xf0]  ;;  %v4112_v14 = vor.u32 %v5535_v6, %v4111_v5 }
  0x68   :  { %693 = vmatpush.bf16.msrb.mxu0 %v3680_v0  ;;  %v3731_v0 = vld [vmem:[#allocation5 + $0x68] sm:$0xf]  ;;  %v5499_v16 = vld [vmem:[#allocation8 + $0x2c] sm:$0xf0]  ;;  %v4240_v20 = vor.u32 %v5567_v9, %v4239_v8 }
  0x69   :  { %706 = vmatpush.bf16.msrb.mxu1 %v3684_v1  ;;  %v4128_v1 = vor.u32 %v5539_v58, %v4127_v57  ;;  %v3967_v15 = vld [vmem:[#allocation8 + $0x20] sm:$0xf]  ;;  %v5531_v19 = vld [vmem:[#allocation8 + $0x12c] sm:$0xf0] }
  0x6a   :  { %719 = vmatpush.bf16.msrb.mxu2 %v3688_v2  ;;  %732 = vmatpush.bf16.msrb.mxu3 %v3692_v3  ;;  %v3983_v2 = vld [vmem:[#allocation8 + $0x40] sm:$0xf]  ;;  %v5503_v3 = vld [vmem:[#allocation8 + $0x4c] sm:$0xf0] }
  0x6b   :  { %694 = vmatmul.bf16.vlgmr.msrb.gmra.mxu0 %v6229_v50  ;;  %v3984_v11 = vor.u32 %v5503_v3, %v3983_v2  ;;  %v4095_v18 = vld [vmem:[#allocation8 + $0x120] sm:$0xf]  ;;  %v5619_v21 = vld [vmem:[#allocation8 + $0x3ec] sm:$0xf0] }
  0x6c   :  { %738 = vmatpush.bf16.msra.mxu0 %v3948_v4  ;;  %707 = vmatmul.bf16.vlgmr.msrb.gmra.mxu1 %v6229_v50  ;;  %v5438_v4 = vld [vmem:[#allocation5 + $0x88] sm:$0xf0]  ;;  %v5495_v29 = vld [vmem:[#allocation8 + $0xc] sm:$0xf0] }
  0x6d   :  { %720 = vmatmul.bf16.vlgmr.msrb.gmra.mxu2 %v6229_v50  ;;  %733 = vmatmul.bf16.vlgmr.msrb.gmra.mxu3 %v6229_v50  ;;  %v4223_v22 = vld [vmem:[#allocation8 + $0x220] sm:$0xf]  ;;  %v5527_v32 = vld [vmem:[#allocation8 + $0x10c] sm:$0xf0] }
  0x6e   :  { %2507 = vmatpush.bf16.msra.mxu1 %v4064_v13  ;;  %2520 = vmatpush.bf16.msra.mxu2 %v4192_v17  ;;  %v5429_v13 = vld [vmem:[#allocation5 + $0x40] sm:$0xf0]  ;;  %v4447_v17 = vld [vmem:[#allocation8 + $0x3e0] sm:$0xf]  ;;  %v5615_v36 = vld [vmem:[#allocation8 + $0x3cc] sm:$0xf0] }
  0x6f   :  { %2533 = vmatpush.bf16.msra.mxu3 %v4320_v24  ;;  %v3968_v24 = vor.u32 %v5499_v16, %v3967_v15  ;;  %v3696_v25 = vor.u32 %v5429_v13, %v3695_v10  ;;  %v3951_v28 = vld [vmem:[#allocation8] sm:$0xf]  ;;  %v4448_v31 = vor.u32 %v5619_v21, %v4447_v17  ;;  %v5559_v41 = vld [vmem:[#allocation8 + $0x20c] sm:$0xf0] }
  0x70   :  { %739 = vmatpush.bf16.msra.mxu0 %v3912_v12  ;;  %v3732_v12 = vor.u32 %v5438_v4, %v3731_v0  ;;  %v4079_v30 = vld [vmem:[#allocation8 + $0x100] sm:$0xf]  ;;  %v3952_v39 = vor.u32 %v5495_v29, %v3951_v28  ;;  %v5715_v45 = vld [vmem:[#allocation8 + $0x6ec] sm:$0xf0] }
  0x71   :  { %v4575_v33 = vld [vmem:[#allocation8 + $0x4e0] sm:$0xf]  ;;  %v4080_v42 = vor.u32 %v5527_v32, %v4079_v30  ;;  %v5611_v52 = vld [vmem:[#allocation8 + $0x3ac] sm:$0xf0] }
  0x72   :  { %2508 = vmatpush.bf16.msra.mxu1 %v4048_v23  ;;  %2521 = vmatpush.bf16.msra.mxu2 %v4176_v27  ;;  %v5563_v23 = vld [vmem:[#allocation8 + $0x22c] sm:$0xf0]  ;;  %v4096_v27 = vor.u32 %v5531_v19, %v4095_v18  ;;  %v4703_v37 = vld [vmem:[#allocation8 + $0x5e0] sm:$0xf] }
  0x73   :  { %2534 = vmatpush.bf16.msra.mxu3 %v4304_v34  ;;  %v5651_v34 = vld [vmem:[#allocation8 + $0x4ec] sm:$0xf0]  ;;  %v4831_v44 = vld [vmem:[#allocation8 + $0x6e0] sm:$0xf] }
  0x74   :  { %740 = vmatpush.bf16.msra.mxu0 %v3876_v26  ;;  %v4431_v26 = vld [vmem:[#allocation8 + $0x3c0] sm:$0xf]  ;;  %v4576_v43 = vor.u32 %v5651_v34, %v4575_v33  ;;  %v5679_v54 = vld [vmem:[#allocation8 + $0x5cc] sm:$0xf0]  ;;  %v4832_v56 = vor.u32 %v5715_v45, %v4831_v44 }
  0x75   :  { %v4415_v47 = vld [vmem:[#allocation8 + $0x3a0] sm:$0xf]  ;;  %v5643_v0 = vld [vmem:[#allocation8 + $0x4ac] sm:$0xf0] }
  0x76   :  { %2509 = vmatpush.bf16.msra.mxu1 %v4032_v35  ;;  %2522 = vmatpush.bf16.msra.mxu2 %v4160_v40  ;;  %v4224_v35 = vor.u32 %v5563_v23, %v4223_v22  ;;  %v4207_v40 = vld [vmem:[#allocation8 + $0x200] sm:$0xf]  ;;  %v4416_v60 = vor.u32 %v5611_v52, %v4415_v47  ;;  %v5675_v3 = vld [vmem:[#allocation8 + $0x5ac] sm:$0xf0] }
  0x77   :  { %2535 = vmatpush.bf16.msra.mxu3 %v4288_v46  ;;  %v4432_v46 = vor.u32 %v5615_v36, %v4431_v26  ;;  %v4208_v55 = vor.u32 %v5559_v41, %v4207_v40  ;;  %v4815_v58 = vld [vmem:[#allocation8 + $0x6c0] sm:$0xf]  ;;  %v5707_v6 = vld [vmem:[#allocation8 + $0x6ac] sm:$0xf0] }
  0x78   :  { %741 = vmatpush.bf16.msra.mxu0 %v3840_v38  ;;  %v5683_v38 = vld [vmem:[#allocation8 + $0x5ec] sm:$0xf0]  ;;  %v4399_v61 = vld [vmem:[#allocation8 + $0x380] sm:$0xf] }
  0x79   :  { %v4704_v48 = vor.u32 %v5683_v38, %v4703_v37  ;;  %v4671_v2 = vld [vmem:[#allocation8 + $0x5a0] sm:$0xf]  ;;  %v5703_v18 = vld [vmem:[#allocation8 + $0x68c] sm:$0xf0] }
  0x7a   :  { %2510 = vmatpush.bf16.msra.mxu1 %v4016_v49  ;;  %2523 = vmatpush.bf16.msra.mxu2 %v4144_v53  ;;  %v4559_v49 = vld [vmem:[#allocation8 + $0x4c0] sm:$0xf]  ;;  %v4672_v9 = vor.u32 %v5675_v3, %v4671_v2  ;;  %v5635_v23 = vld [vmem:[#allocation8 + $0x46c] sm:$0xf0] }
  0x7b   :  { %2536 = vmatpush.bf16.msra.mxu3 %v4272_v59  ;;  %v4687_v53 = vld [vmem:[#allocation8 + $0x5c0] sm:$0xf]  ;;  %v5711_v59 = vld [vmem:[#allocation8 + $0x6cc] sm:$0xf0] }
  0x7c   :  { %742 = vmatpush.bf16.msra.mxu0 %v3804_v51  ;;  %v5647_v51 = vld [vmem:[#allocation8 + $0x4cc] sm:$0xf0]  ;;  %v4799_v5 = vld [vmem:[#allocation8 + $0x6a0] sm:$0xf] }
  0x7d   :  { %v4560_v57 = vor.u32 %v5647_v51, %v4559_v49  ;;  %v4383_v8 = vld [vmem:[#allocation8 + $0x360] sm:$0xf]  ;;  %v4800_v15 = vor.u32 %v5707_v6, %v4799_v5  ;;  %v5667_v26 = vld [vmem:[#allocation8 + $0x56c] sm:$0xf0] }
  0x7e   :  { %2511 = vmatpush.bf16.msra.mxu1 %v4000_v62  ;;  %2524 = vmatpush.bf16.msra.mxu2 %v4128_v1  ;;  %v4688_v62 = vor.u32 %v5679_v54, %v4687_v53  ;;  %v5607_v1 = vld [vmem:[#allocation8 + $0x38c] sm:$0xf0]  ;;  %v4527_v10 = vld [vmem:[#allocation8 + $0x480] sm:$0xf] }
  0x7f   :  { %2537 = vmatpush.bf16.msra.mxu3 %v4256_v7  ;;  %v4400_v7 = vor.u32 %v5607_v1, %v4399_v61  ;;  %v4655_v13 = vld [vmem:[#allocation8 + $0x580] sm:$0xf]  ;;  %v5631_v33 = vld [vmem:[#allocation8 + $0x44c] sm:$0xf0] }
  0x80   :  { %743 = vmatpush.bf16.msra.mxu0 %v3768_v63  ;;  %v4543_v63 = vld [vmem:[#allocation8 + $0x4a0] sm:$0xf]  ;;  %v5595_v34 = vld [vmem:[#allocation8 + $0x32c] sm:$0xf0] }
  0x81   :  { %v4544_v4 = vor.u32 %v5643_v0, %v4543_v63  ;;  %v4783_v17 = vld [vmem:[#allocation8 + $0x680] sm:$0xf]  ;;  %v5663_v36 = vld [vmem:[#allocation8 + $0x54c] sm:$0xf0] }
  0x82   :  { %2512 = vmatpush.bf16.msra.mxu1 %v3984_v11  ;;  %2525 = vmatpush.bf16.msra.mxu2 %v4112_v14  ;;  %v5639_v11 = vld [vmem:[#allocation8 + $0x48c] sm:$0xf0]  ;;  %v4511_v22 = vld [vmem:[#allocation8 + $0x460] sm:$0xf] }
  0x83   :  { %2538 = vmatpush.bf16.msra.mxu3 %v4240_v20  ;;  %v5671_v14 = vld [vmem:[#allocation8 + $0x58c] sm:$0xf0]  ;;  %v4528_v16 = vor.u32 %v5639_v11, %v4527_v10  ;;  %v4367_v20 = vld [vmem:[#allocation8 + $0x340] sm:$0xf]  ;;  %v4512_v28 = vor.u32 %v5635_v23, %v4511_v22 }
  0x84   :  { %744 = vmatpush.bf16.msra.mxu0 %v3732_v12  ;;  %v5603_v12 = vld [vmem:[#allocation8 + $0x36c] sm:$0xf0]  ;;  %v4656_v21 = vor.u32 %v5671_v14, %v4655_v13  ;;  %v4351_v30 = vld [vmem:[#allocation8 + $0x320] sm:$0xf] }
  0x85   :  { %v4384_v19 = vor.u32 %v5603_v12, %v4383_v8  ;;  %v4495_v32 = vld [vmem:[#allocation8 + $0x440] sm:$0xf]  ;;  %v4352_v38 = vor.u32 %v5595_v34, %v4351_v30  ;;  %v5591_v41 = vld [vmem:[#allocation8 + $0x30c] sm:$0xf0] }
  0x86   :  { %2513 = vmatpush.bf16.msra.mxu1 %v3968_v24  ;;  %2526 = vmatpush.bf16.msra.mxu2 %v4096_v27  ;;  %v5599_v24 = vld [vmem:[#allocation8 + $0x34c] sm:$0xf0]  ;;  %v4784_v27 = vor.u32 %v5703_v18, %v4783_v17  ;;  %v4496_v37 = vor.u32 %v5631_v33, %v4495_v32  ;;  %v4335_v40 = vld [vmem:[#allocation8 + $0x300] sm:$0xf] }
  0x87   :  { %2539 = vmatpush.bf16.msra.mxu3 %v4224_v35  ;;  %v4368_v29 = vor.u32 %v5599_v24, %v4367_v20  ;;  %v4623_v35 = vld [vmem:[#allocation8 + $0x540] sm:$0xf]  ;;  %v4336_v44 = vor.u32 %v5591_v41, %v4335_v40  ;;  %v5743_v47 = vld [vmem:[#allocation8 + $0x7cc] sm:$0xf0] }
  0x88   :  { %745 = vmatpush.bf16.msra.mxu0 %v3696_v25  ;;  %v4639_v25 = vld [vmem:[#allocation8 + $0x560] sm:$0xf]  ;;  %v5739_v51 = vld [vmem:[#allocation8 + $0x7ac] sm:$0xf0] }
  0x89   :  { %v4927_v49 = vld [vmem:[#allocation8 + $0x7a0] sm:$0xf]  ;;  %v5735_v54 = vld [vmem:[#allocation8 + $0x78c] sm:$0xf0] }
  0x8a   :  { %2514 = vmatpush.bf16.msra.mxu1 %v3952_v39  ;;  %2527 = vmatpush.bf16.msra.mxu2 %v4080_v42  ;;  %v4624_v39 = vor.u32 %v5663_v36, %v4623_v35  ;;  %v4959_v42 = vld [vmem:[#allocation8 + $0x7e0] sm:$0xf]  ;;  %v4928_v52 = vor.u32 %v5739_v51, %v4927_v49  ;;  %v5627_v61 = vld [vmem:[#allocation8 + $0x42c] sm:$0xf0]  ;;  %v5521_v36 = vld [vmem:[#allocation8 + $0xe4] sm:$0xf] }
  0x8b   :  { %746 = vmatmul.bf16.vlgmr.msra.gmra.mxu0 %v6229_v50  ;;  %2540 = vmatpush.bf16.msra.mxu3 %v4208_v55  ;;  %v4816_v50 = vor.u32 %v5711_v59, %v4815_v58  ;;  %v4911_v53 = vld [vmem:[#allocation8 + $0x780] sm:$0xf]  ;;  %v5659_v1 = vld [vmem:[#allocation8 + $0x52c] sm:$0xf0]  ;;  %v4049_v49 = vld [vmem:[#allocation8 + $0xd0] sm:$0xf0] }
  0x8c   :  { %2546 = vmatpush.bf16.msrb.mxu0 %v4448_v31  ;;  %v4640_v31 = vor.u32 %v5667_v26, %v4639_v25  ;;  %v4767_v55 = vld [vmem:[#allocation8 + $0x660] sm:$0xf]  ;;  %v4912_v58 = vor.u32 %v5735_v54, %v4911_v53  ;;  %v5727_v10 = vld [vmem:[#allocation8 + $0x74c] sm:$0xf0] }
  0x8d   :  { %v4895_v59 = vld [vmem:[#allocation8 + $0x760] sm:$0xf]  ;;  %v5655_v12 = vld [vmem:[#allocation8 + $0x50c] sm:$0xf0] }
  0x8e   :  { %2559 = vmatpush.bf16.msrb.mxu1 %v4576_v43  ;;  %2572 = vmatpush.bf16.msrb.mxu2 %v4704_v48  ;;  %v5747_v43 = vld [vmem:[#allocation8 + $0x7ec] sm:$0xf0]  ;;  %v4607_v0 = vld [vmem:[#allocation8 + $0x520] sm:$0xf] }
  0x8f   :  { %2585 = vmatpush.bf16.msrb.mxu3 %v4832_v56  ;;  %v4960_v45 = vor.u32 %v5747_v43, %v4959_v42  ;;  %v5699_v56 = vld [vmem:[#allocation8 + $0x66c] sm:$0xf0]  ;;  %v4608_v2 = vor.u32 %v5659_v1, %v4607_v0  ;;  %v4751_v3 = vld [vmem:[#allocation8 + $0x640] sm:$0xf] }
  0x90   :  { %2547 = vmatpush.bf16.msrb.mxu0 %v4432_v46  ;;  %v4943_v46 = vld [vmem:[#allocation8 + $0x7c0] sm:$0xf]  ;;  %v5719_v25 = vld [vmem:[#allocation8 + $0x70c] sm:$0xf0] }
  0x91   :  { %v4944_v48 = vor.u32 %v5743_v47, %v4943_v46  ;;  %v4463_v6 = vld [vmem:[#allocation8 + $0x400] sm:$0xf]  ;;  %v5779_v34 = vld [vmem:[#allocation8 + $0x8ec] sm:$0xf0] }
  0x92   :  { %2560 = vmatpush.bf16.msrb.mxu1 %v4560_v57  ;;  %2573 = vmatpush.bf16.msrb.mxu2 %v4688_v62  ;;  %v4768_v57 = vor.u32 %v5699_v56, %v4767_v55  ;;  %v5731_v62 = vld [vmem:[#allocation8 + $0x76c] sm:$0xf0]  ;;  %v4591_v8 = vld [vmem:[#allocation8 + $0x500] sm:$0xf]  ;;  %v5553_v56 = vld [vmem:[#allocation8 + $0x1e4] sm:$0xf] }
  0x93   :  { %2586 = vmatpush.bf16.msrb.mxu3 %v4816_v50  ;;  %v5695_v50 = vld [vmem:[#allocation8 + $0x64c] sm:$0xf0]  ;;  %v4896_v5 = vor.u32 %v5731_v62, %v4895_v59  ;;  %v4592_v13 = vor.u32 %v5655_v12, %v4591_v8  ;;  %v4735_v14 = vld [vmem:[#allocation8 + $0x620] sm:$0xf]  ;;  %v4321_v62 = vld [vmem:[#allocation8 + $0x2f0] sm:$0xf0] }
  0x94   :  { %2548 = vmatpush.bf16.msrb.mxu0 %v4416_v60  ;;  %v4479_v60 = vld [vmem:[#allocation8 + $0x420] sm:$0xf]  ;;  %v5775_v46 = vld [vmem:[#allocation8 + $0x8cc] sm:$0xf0]  ;;  %v5549_v8 = vld [vmem:[#allocation8 + $0x1c4] sm:$0xf] }
  0x95   :  { %v4480_v63 = vor.u32 %v5627_v61, %v4479_v60  ;;  %v4863_v18 = vld [vmem:[#allocation8 + $0x720] sm:$0xf]  ;;  %v5771_v0 = vld [vmem:[#allocation8 + $0x8ac] sm:$0xf0] }
  0x96   :  { %2561 = vmatpush.bf16.msrb.mxu1 %v4544_v4  ;;  %2574 = vmatpush.bf16.msrb.mxu2 %v4672_v9  ;;  %v4752_v4 = vor.u32 %v5695_v50, %v4751_v3  ;;  %v4879_v9 = vld [vmem:[#allocation8 + $0x740] sm:$0xf]  ;;  %v4033_v3 = vld [vmem:[#allocation8 + $0xb0] sm:$0xf0] }
  0x97   :  { %2587 = vmatpush.bf16.msrb.mxu3 %v4800_v15  ;;  %v5691_v15 = vld [vmem:[#allocation8 + $0x62c] sm:$0xf0]  ;;  %v4719_v20 = vld [vmem:[#allocation8 + $0x600] sm:$0xf] }
  0x98   :  { %2549 = vmatpush.bf16.msrb.mxu0 %v4400_v7  ;;  %v5623_v7 = vld [vmem:[#allocation8 + $0x40c] sm:$0xf0]  ;;  %v4736_v17 = vor.u32 %v5691_v15, %v4735_v14  ;;  %v4847_v24 = vld [vmem:[#allocation8 + $0x700] sm:$0xf] }
  0x99   :  { %v4464_v11 = vor.u32 %v5623_v7, %v4463_v6  ;;  %v4848_v26 = vor.u32 %v5719_v25, %v4847_v24  ;;  %v5087_v33 = vld [vmem:[#allocation8 + $0x8e0] sm:$0xf]  ;;  %v5767_v15 = vld [vmem:[#allocation8 + $0x88c] sm:$0xf0]  ;;  %v4161_v24 = vld [vmem:[#allocation8 + $0x1b0] sm:$0xf0] }
  0x9a   :  { %2562 = vmatpush.bf16.msrb.mxu1 %v4528_v16  ;;  %2575 = vmatpush.bf16.msrb.mxu2 %v4656_v21  ;;  %v4880_v16 = vor.u32 %v5727_v10, %v4879_v9  ;;  %v5687_v21 = vld [vmem:[#allocation8 + $0x60c] sm:$0xf0]  ;;  %v5088_v41 = vor.u32 %v5779_v34, %v5087_v33  ;;  %v4177_v9 = vld [vmem:[#allocation8 + $0x1d0] sm:$0xf0]  ;;  %v5581_v10 = vld [vmem:[#allocation8 + $0x2c4] sm:$0xf] }
  0x9b   :  { %2588 = vmatpush.bf16.msrb.mxu3 %v4784_v27  ;;  %v4720_v22 = vor.u32 %v5687_v21, %v4719_v20  ;;  %v6240_v27 = vld [vmem:[#allocation7] sm:$0xff]  ;;  %v5039_v14 = vld [vmem:[#allocation8 + $0x880] sm:$0xf]  ;;  %v5577_v25 = vld [vmem:[#allocation8 + $0x2a4] sm:$0xf] }
  0x9c   :  { %2550 = vmatpush.bf16.msrb.mxu0 %v4384_v19  ;;  %v5723_v19 = vld [vmem:[#allocation8 + $0x72c] sm:$0xf0]  ;;  %v250_v40 = vperm.slane %v6240_v27, 2  ;;  %v251_v43 = vperm.slane %v6240_v27, 3 }
  0x9d   :  { %v4864_v23 = vor.u32 %v5723_v19, %v4863_v18  ;;  %v4180_v19 = vor.u32 %v5549_v8, %v4177_v9  ;;  %v5751_v8 = vld [vmem:[#allocation8 + $0x80c] sm:$0xf0] }
  0x9e   :  { %2563 = vmatpush.bf16.msrb.mxu1 %v4512_v28  ;;  %2576 = vmatpush.bf16.msrb.mxu2 %v4640_v31  ;;  %v248_v28 = vperm.slane %v6240_v27, 0 }
  0x9f   :  { %2589 = vmatpush.bf16.msrb.mxu3 %v4768_v57  ;;  %v4193_v57 = vld [vmem:[#allocation8 + $0x1f0] sm:$0xf0] }
  0xa0   :  { %2551 = vmatpush.bf16.msrb.mxu0 %v4368_v29  ;;  %v249_v29 = vperm.slane %v6240_v27, 1 }
  0xa2   :  { %2564 = vmatpush.bf16.msrb.mxu1 %v4496_v37  ;;  %2577 = vmatpush.bf16.msrb.mxu2 %v4624_v39  ;;  %v4065_v37 = vld [vmem:[#allocation8 + $0xf0] sm:$0xf0] }
  0xa3   :  { %2590 = vmatpush.bf16.msrb.mxu3 %v4752_v4  ;;  %v4196_v4 = vor.u32 %v5553_v56, %v4193_v57  ;;  %v4991_v56 = vld [vmem:[#allocation8 + $0x820] sm:$0xf]  ;;  %v5755_v57 = vld [vmem:[#allocation8 + $0x82c] sm:$0xf0] }
  0xa4   :  { %2552 = vmatpush.bf16.msrb.mxu0 %v4352_v38 }
  0xa6   :  { %2565 = vmatpush.bf16.msrb.mxu1 %v4480_v63  ;;  %2578 = vmatpush.bf16.msrb.mxu2 %v4608_v2  ;;  %v5055_v63 = vld [vmem:[#allocation8 + $0x8a0] sm:$0xf]  ;;  %v5513_v2 = vld [vmem:[#allocation8 + $0xa4] sm:$0xf] }
  0xa7   :  { %2591 = vmatpush.bf16.msrb.mxu3 %v4736_v17  ;;  %v5056_v7 = vor.u32 %v5771_v0, %v5055_v63  ;;  %v4036_v12 = vor.u32 %v5513_v2, %v4033_v3  ;;  %v4017_v17 = vld [vmem:[#allocation8 + $0x90] sm:$0xf0]  ;;  %v4992_v0 = vor.u32 %v5755_v57, %v4991_v56  ;;  %v5565_v3 = vld [vmem:[#allocation8 + $0x244] sm:$0xf] }
  0xa8   :  { %2553 = vmatpush.bf16.msrb.mxu0 %v4336_v44  ;;  %v4068_v44 = vor.u32 %v5521_v36, %v4065_v37  ;;  %v5541_v36 = vld [vmem:[#allocation8 + $0x184] sm:$0xf]  ;;  %v4145_v37 = vld [vmem:[#allocation8 + $0x190] sm:$0xf0] }
  0xa9   :  { %v4113_v2 = vld [vmem:[#allocation8 + $0x150] sm:$0xf0]  ;;  %v5713_v57 = vld [vmem:[#allocation8 + $0x6e4] sm:$0xf] }
  0xaa   :  { %2566 = vmatpush.bf16.msrb.mxu1 %v4464_v11  ;;  %2579 = vmatpush.bf16.msrb.mxu2 %v4592_v13  ;;  %v4305_v13 = vld [vmem:[#allocation8 + $0x2d0] sm:$0xf0] }
  0xab   :  { %2592 = vmatpush.bf16.msrb.mxu3 %v4720_v22  ;;  %v4308_v21 = vor.u32 %v5581_v10, %v4305_v13  ;;  %v5040_v22 = vor.u32 %v5767_v15, %v5039_v14  ;;  %v3953_v13 = vld [vmem:[#allocation8 + $0x10] sm:$0xf0]  ;;  %v5617_v14 = vld [vmem:[#allocation8 + $0x3e4] sm:$0xf] }
  0xac   :  { %2598 = vmatpush.bf16.msra.mxu0 %v4960_v45  ;;  %v5071_v45 = vld [vmem:[#allocation8 + $0x8c0] sm:$0xf]  ;;  %v4705_v56 = vld [vmem:[#allocation8 + $0x5f0] sm:$0xf0] }
  0xad   :  { %v5072_v55 = vor.u32 %v5775_v46, %v5071_v45  ;;  %v3985_v45 = vld [vmem:[#allocation8 + $0x50] sm:$0xf0]  ;;  %v4148_v46 = vor.u32 %v5541_v36, %v4145_v37  ;;  %v5613_v37 = vld [vmem:[#allocation8 + $0x3c4] sm:$0xf] }
  0xb0   :  { %2599 = vmatpush.bf16.msra.mxu0 %v4944_v48  ;;  %v5517_v48 = vld [vmem:[#allocation8 + $0xc4] sm:$0xf] }
  0xb1   :  { %v4052_v61 = vor.u32 %v5517_v48, %v4049_v49 }
  0xb4   :  { %2600 = vmatpush.bf16.msra.mxu0 %v4928_v52 }
  0xb8   :  { %2601 = vmatpush.bf16.msra.mxu0 %v4912_v58  ;;  %v5585_v58 = vld [vmem:[#allocation8 + $0x2e4] sm:$0xf] }
  0xb9   :  { %v4324_v6 = vor.u32 %v5585_v58, %v4321_v62  ;;  %v252_v58 = vperm.slane %v6240_v27, 4 }
  0xbc   :  { %2602 = vmatpush.bf16.msra.mxu0 %v4896_v5 }
  0xc0   :  { %2603 = vmatpush.bf16.msra.mxu0 %v4880_v16  ;;  %v5509_v16 = vld [vmem:[#allocation8 + $0x84] sm:$0xf] }
  0xc4   :  { %2604 = vmatpush.bf16.msra.mxu0 %v4864_v23  ;;  %v5545_v23 = vld [vmem:[#allocation8 + $0x1a4] sm:$0xf] }
  0xc5   :  { %v4164_v33 = vor.u32 %v5545_v23, %v4161_v24  ;;  %v5529_v23 = vld [vmem:[#allocation8 + $0x124] sm:$0xf]  ;;  %v4097_v24 = vld [vmem:[#allocation8 + $0x130] sm:$0xf0] }
  0xc6   :  { %v4100_v36 = vor.u32 %v5529_v23, %v4097_v24  ;;  %v5673_v24 = vld [vmem:[#allocation8 + $0x5a4] sm:$0xf] }
  0xc8   :  { %2605 = vmatpush.bf16.msra.mxu0 %v4848_v26  ;;  %v643_v30 = vpop.f32.mrf.mxu0  ;;  %v4020_v26 = vor.u32 %v5509_v16, %v4017_v17  ;;  %v4449_v17 = vld [vmem:[#allocation8 + $0x3f0] sm:$0xf0] }
  0xc9   :  { %v644_v31 = vadd.f32 %v643_v30, %v248_v28  ;;  %v656_v32 = vpop.f32.mrf.mxu1  ;;  %v4289_v28 = vld [vmem:[#allocation8 + $0x2b0] sm:$0xf0]  ;;  %v5763_v30 = vld [vmem:[#allocation8 + $0x86c] sm:$0xf0] }
  0xca   :  { %v657_v35 = vadd.f32 %v656_v32, %v249_v29  ;;  %v5023_v29 = vld [vmem:[#allocation8 + $0x860] sm:$0xf]  ;;  %v4001_v32 = vld [vmem:[#allocation8 + $0x70] sm:$0xf0]  ;;  %v4292_v34 = vor.u32 %v5577_v25, %v4289_v28 }
  0xcb   :  { %v751_v38 = vmax.f32 %v644_v31, 0.0  ;;  %v5505_v31 = vld [vmem:[#allocation8 + $0x64] sm:$0xf] }
  0xcc   :  { %v752_v39 = vmax.f32 %v657_v35, 0.0  ;;  %v5024_v35 = vor.u32 %v5763_v30, %v5023_v29  ;;  %v5561_v29 = vld [vmem:[#allocation8 + $0x224] sm:$0xf]  ;;  %v4225_v30 = vld [vmem:[#allocation8 + $0x230] sm:$0xf0] }
  0xcd   :  { %v6245_v42 = vpack.c.bf16 %v751_v38, %v751_v38  ;;  %v5573_v38 = vld [vmem:[#allocation8 + $0x284] sm:$0xf] }
  0xce   :  { %v6248_v47 = vpack.c.bf16 %v752_v39, %v752_v39  ;;  %v4004_v39 = vor.u32 %v5505_v31, %v4001_v32  ;;  %v255_v32 = vperm.slane %v6240_v27, 7 }
  0xcf   :  { %2515 = vmatmul.bf16.vlgmr.msra.gmra.mxu1 %v6245_v42 }
  0xd0   :  { %v669_v51 = vpop.f32.mrf.mxu2  ;;  %2528 = vmatmul.bf16.vlgmr.msra.gmra.mxu2 %v6248_v47  ;;  %2611 = vmatpush.bf16.msra.mxu1 %v5088_v41  ;;  %v645_v54 = vpop.f32.mrf.mxu0  ;;  %v5007_v41 = vld [vmem:[#allocation8 + $0x840] sm:$0xf] }
  0xd1   :  { %v670_v52 = vadd.f32 %v669_v51, %v250_v40  ;;  %2624 = vmatpush.bf16.msra.mxu2 %v4068_v44  ;;  %v658_v60 = vpop.f32.mrf.mxu1  ;;  %v4273_v40 = vld [vmem:[#allocation8 + $0x290] sm:$0xf0]  ;;  %v5501_v44 = vld [vmem:[#allocation8 + $0x44] sm:$0xf] }
  0xd2   :  { %v682_v53 = vpop.f32.mrf.mxu3  ;;  %v4276_v48 = vor.u32 %v5573_v38, %v4273_v40  ;;  %v5537_v51 = vld [vmem:[#allocation8 + $0x164] sm:$0xf]  ;;  %v3988_v54 = vor.u32 %v5501_v44, %v3985_v45  ;;  %v3969_v60 = vld [vmem:[#allocation8 + $0x30] sm:$0xf0] }
  0xd3   :  { %v683_v59 = vadd.f32 %v682_v53, %v251_v43  ;;  %v753_v1 = vmax.f32 %v670_v52, 0.0  ;;  %v5759_v43 = vld [vmem:[#allocation8 + $0x84c] sm:$0xf0]  ;;  %v4129_v52 = vld [vmem:[#allocation8 + $0x170] sm:$0xf0] }
  0xd4   :  { %2612 = vmatpush.bf16.msra.mxu1 %v5072_v55  ;;  %v5008_v49 = vor.u32 %v5759_v43, %v5007_v41  ;;  %v5569_v53 = vld [vmem:[#allocation8 + $0x264] sm:$0xf]  ;;  %v4257_v55 = vld [vmem:[#allocation8 + $0x270] sm:$0xf0]  ;;  %v4132_v62 = vor.u32 %v5537_v51, %v4129_v52  ;;  %v4228_v41 = vor.u32 %v5561_v29, %v4225_v30 }
  0xd5   :  { %v754_v50 = vmax.f32 %v683_v59, 0.0  ;;  %v6252_v5 = vpack.c.bf16 %v753_v1, %v753_v1  ;;  %2625 = vmatpush.bf16.msra.mxu2 %v4052_v61  ;;  %v5497_v59 = vld [vmem:[#allocation8 + $0x24] sm:$0xf]  ;;  %v253_v61 = vperm.slane %v6240_v27, 5  ;;  %v4260_v63 = vor.u32 %v5569_v53, %v4257_v55  ;;  %v4433_v38 = vld [vmem:[#allocation8 + $0x3d0] sm:$0xf0] }
  0xd6   :  { %v5533_v1 = vld [vmem:[#allocation8 + $0x144] sm:$0xf]  ;;  %v4561_v43 = vld [vmem:[#allocation8 + $0x4d0] sm:$0xf0]  ;;  %v4436_v55 = vor.u32 %v5613_v37, %v4433_v38 }
  0xd7   :  { %v6254_v11 = vpack.c.bf16 %v754_v50, %v754_v50  ;;  %2541 = vmatmul.bf16.vlgmr.msra.gmra.mxu3 %v6252_v5  ;;  %v4116_v16 = vor.u32 %v5533_v1, %v4113_v2  ;;  %v5525_v44 = vld [vmem:[#allocation8 + $0x104] sm:$0xf]  ;;  %v4081_v45 = vld [vmem:[#allocation8 + $0x110] sm:$0xf0] }
  0xd8   :  { %2637 = vmatpush.bf16.msra.mxu3 %v4196_v4  ;;  %v671_v18 = vpop.f32.mrf.mxu2  ;;  %2613 = vmatpush.bf16.msra.mxu1 %v5056_v7  ;;  %v3972_v4 = vor.u32 %v5497_v59, %v3969_v60  ;;  %v4975_v7 = vld [vmem:[#allocation8 + $0x800] sm:$0xf]  ;;  %v4209_v51 = vld [vmem:[#allocation8 + $0x210] sm:$0xf0]  ;;  %v5681_v52 = vld [vmem:[#allocation8 + $0x5e4] sm:$0xf] }
  0xd9   :  { %2554 = vmatmul.bf16.vlgmr.msrb.gmra.mxu0 %v6254_v11  ;;  %2626 = vmatpush.bf16.msra.mxu2 %v4036_v12  ;;  %v5493_v12 = vld [vmem:[#allocation8 + $0x4] sm:$0xf]  ;;  %v4801_v29 = vld [vmem:[#allocation8 + $0x6b0] sm:$0xf0] }
  0xda   :  { %2650 = vmatpush.bf16.msrb.mxu0 %v4324_v6  ;;  %v684_v20 = vpop.f32.mrf.mxu3  ;;  %v4241_v6 = vld [vmem:[#allocation8 + $0x250] sm:$0xf0]  ;;  %v5649_v18 = vld [vmem:[#allocation8 + $0x4e4] sm:$0xf]  ;;  %v3956_v28 = vor.u32 %v5493_v12, %v3953_v13 }
  0xdb   :  { %v5641_v2 = vld [vmem:[#allocation8 + $0x4a4] sm:$0xf] }
  0xdc   :  { %2638 = vmatpush.bf16.msra.mxu3 %v4180_v19  ;;  %2614 = vmatpush.bf16.msra.mxu1 %v5040_v22  ;;  %v4577_v19 = vld [vmem:[#allocation8 + $0x4f0] sm:$0xf0]  ;;  %v4976_v22 = vor.u32 %v5751_v8, %v4975_v7  ;;  %v5709_v12 = vld [vmem:[#allocation8 + $0x6c4] sm:$0xf] }
  0xdd   :  { %2627 = vmatpush.bf16.msra.mxu2 %v4020_v26  ;;  %v254_v26 = vperm.slane %v6240_v27, 6  ;;  %v5601_v30 = vld [vmem:[#allocation8 + $0x364] sm:$0xf] }
  0xde   :  { %2651 = vmatpush.bf16.msrb.mxu0 %v4308_v21  ;;  %v4244_v21 = vor.u32 %v5565_v3, %v4241_v6  ;;  %v4545_v3 = vld [vmem:[#allocation8 + $0x4b0] sm:$0xf0]  ;;  %v5669_v38 = vld [vmem:[#allocation8 + $0x584] sm:$0xf] }
  0xdf   :  { %v4548_v13 = vor.u32 %v5641_v2, %v4545_v3  ;;  %v4625_v2 = vld [vmem:[#allocation8 + $0x550] sm:$0xf0]  ;;  %v5693_v3 = vld [vmem:[#allocation8 + $0x644] sm:$0xf] }
  0xe0   :  { %2639 = vmatpush.bf16.msra.mxu3 %v4164_v33  ;;  %2615 = vmatpush.bf16.msra.mxu1 %v5024_v35  ;;  %v4452_v33 = vor.u32 %v5617_v14, %v4449_v17  ;;  %v4580_v35 = vor.u32 %v5649_v18, %v4577_v19  ;;  %v4817_v14 = vld [vmem:[#allocation8 + $0x6d0] sm:$0xf0]  ;;  %v5637_v18 = vld [vmem:[#allocation8 + $0x484] sm:$0xf] }
  0xe1   :  { %2628 = vmatpush.bf16.msra.mxu2 %v4004_v39  ;;  %v5645_v39 = vld [vmem:[#allocation8 + $0x4c4] sm:$0xf]  ;;  %v4529_v19 = vld [vmem:[#allocation8 + $0x490] sm:$0xf0] }
  0xe2   :  { %2652 = vmatpush.bf16.msrb.mxu0 %v4292_v34  ;;  %v4564_v60 = vor.u32 %v5645_v39, %v4561_v43  ;;  %v4657_v39 = vld [vmem:[#allocation8 + $0x590] sm:$0xf0]  ;;  %v5701_v43 = vld [vmem:[#allocation8 + $0x684] sm:$0xf] }
  0xe4   :  { %2640 = vmatpush.bf16.msra.mxu3 %v4148_v46  ;;  %2616 = vmatpush.bf16.msra.mxu1 %v5008_v49  ;;  %v5557_v49 = vld [vmem:[#allocation8 + $0x204] sm:$0xf] }
  0xe5   :  { %2629 = vmatpush.bf16.msra.mxu2 %v3988_v54  ;;  %v4212_v1 = vor.u32 %v5557_v49, %v4209_v51  ;;  %v4660_v49 = vor.u32 %v5669_v38, %v4657_v39  ;;  %v5773_v38 = vld [vmem:[#allocation8 + $0x8c4] sm:$0xf]  ;;  %v5073_v39 = vld [vmem:[#allocation8 + $0x8d0] sm:$0xf0] }
  0xe6   :  { %2653 = vmatpush.bf16.msrb.mxu0 %v4276_v48 }
  0xe8   :  { %v695_v50 = vpop.f32.mrf.mxu0  ;;  %2641 = vmatpush.bf16.msra.mxu3 %v4132_v62  ;;  %2617 = vmatpush.bf16.msra.mxu1 %v4992_v0  ;;  %v5609_v62 = vld [vmem:[#allocation8 + $0x3a4] sm:$0xf] }
  0xe9   :  { %v696_v9 = vadd.f32 %v695_v50, %v252_v58  ;;  %v708_v10 = vpop.f32.mrf.mxu1  ;;  %2630 = vmatpush.bf16.msra.mxu2 %v3972_v4  ;;  %v4833_v58 = vld [vmem:[#allocation8 + $0x6f0] sm:$0xf0]  ;;  %v4708_v4 = vor.u32 %v5681_v52, %v4705_v56  ;;  %v5879_v52 = vld [vmem:[#allocation7 + $0x8] ss:$0 sm:$0xff] }
  0xea   :  { %v709_v15 = vadd.f32 %v708_v10, %v253_v61  ;;  %2654 = vmatpush.bf16.msrb.mxu0 %v4260_v63  ;;  %v4084_v61 = vor.u32 %v5525_v44, %v4081_v45  ;;  %v4417_v63 = vld [vmem:[#allocation8 + $0x3b0] sm:$0xf0]  ;;  %v4836_v7 = vor.u32 %v5713_v57, %v4833_v58  ;;  %v5597_v45 = vld [vmem:[#allocation8 + $0x344] sm:$0xf] }
  0xeb   :  { %v755_v20 = vmax.f32 %v696_v9, 0.0  ;;  %v4420_v8 = vor.u32 %v5609_v62, %v4417_v63  ;;  %v5677_v9 = vld [vmem:[#allocation8 + $0x5c4] sm:$0xf]  ;;  %v4689_v10 = vld [vmem:[#allocation8 + $0x5d0] sm:$0xf0] }
  0xec   :  { %v756_v25 = vmax.f32 %v709_v15, 0.0  ;;  %2642 = vmatpush.bf16.msra.mxu3 %v4116_v16  ;;  %2618 = vmatpush.bf16.msra.mxu1 %v4976_v22  ;;  %v5605_v15 = vld [vmem:[#allocation8 + $0x384] sm:$0xf]  ;;  %v4401_v16 = vld [vmem:[#allocation8 + $0x390] sm:$0xf0]  ;;  %v4820_v22 = vor.u32 %v5709_v12, %v4817_v14 }
  0xed   :  { %v6261_v31 = vpack.c.bf16 %v755_v20, %v755_v20  ;;  %2631 = vmatpush.bf16.msra.mxu2 %v3956_v28  ;;  %v4404_v23 = vor.u32 %v5605_v15, %v4401_v16  ;;  %v5705_v28 = vld [vmem:[#allocation8 + $0x6a4] sm:$0xf]  ;;  %v4785_v44 = vld [vmem:[#allocation8 + $0x690] sm:$0xf0] }
  0xee   :  { %v6264_v34 = vpack.c.bf16 %v756_v25, %v756_v25  ;;  %2655 = vmatpush.bf16.msrb.mxu0 %v4244_v21  ;;  %v4692_v21 = vor.u32 %v5677_v9, %v4689_v10  ;;  %v4673_v25 = vld [vmem:[#allocation8 + $0x5b0] sm:$0xf0]  ;;  %v4804_v37 = vor.u32 %v5705_v28, %v4801_v29  ;;  %v4788_v51 = vor.u32 %v5701_v43, %v4785_v44  ;;  %v5697_v57 = vld [vmem:[#allocation8 + $0x664] sm:$0xf] }
  0xef   :  { %2567 = vmatmul.bf16.vlgmr.msrb.gmra.mxu1 %v6261_v31  ;;  %v4769_v58 = vld [vmem:[#allocation8 + $0x670] sm:$0xf0]  ;;  %v5589_v10 = vld [vmem:[#allocation8 + $0x304] sm:$0xf] }
  0xf0   :  { %v721_v40 = vpop.f32.mrf.mxu2  ;;  %v734_v48 = vpop.f32.mrf.mxu3  ;;  %2580 = vmatmul.bf16.vlgmr.msrb.gmra.mxu2 %v6264_v34  ;;  %2663 = vmatpush.bf16.msrb.mxu1 %v4452_v33  ;;  %v5633_v33 = vld [vmem:[#allocation8 + $0x464] sm:$0xf]  ;;  %v4481_v62 = vld [vmem:[#allocation8 + $0x430] sm:$0xf0] }
  0xf1   :  { %v722_v46 = vadd.f32 %v721_v40, %v254_v26  ;;  %v697_v27 = vpop.f32.mrf.mxu0  ;;  %v735_v53 = vadd.f32 %v734_v48, %v255_v32  ;;  %v710_v54 = vpop.f32.mrf.mxu1  ;;  %2676 = vmatpush.bf16.msrb.mxu2 %v4580_v35  ;;  %2643 = vmatpush.bf16.msra.mxu3 %v4100_v36  ;;  %v4532_v26 = vor.u32 %v5637_v18, %v4529_v19  ;;  %v4385_v32 = vld [vmem:[#allocation8 + $0x370] sm:$0xf0]  ;;  %v5629_v48 = vld [vmem:[#allocation8 + $0x444] sm:$0xf] }
  0xf2   :  { %2656 = vmatpush.bf16.msrb.mxu0 %v4228_v41  ;;  %v4513_v35 = vld [vmem:[#allocation8 + $0x470] sm:$0xf0]  ;;  %v4676_v36 = vor.u32 %v5673_v24, %v4673_v25  ;;  %v4388_v40 = vor.u32 %v5601_v30, %v4385_v32  ;;  %v5621_v14 = vld [vmem:[#allocation8 + $0x404] sm:$0xf] }
  0xf3   :  { %v757_v59 = vmax.f32 %v722_v46, 0.0  ;;  %v758_v0 = vmax.f32 %v735_v53, 0.0  ;;  %v4516_v41 = vor.u32 %v5633_v33, %v4513_v35  ;;  %v4369_v46 = vld [vmem:[#allocation8 + $0x350] sm:$0xf0]  ;;  %v5665_v53 = vld [vmem:[#allocation8 + $0x564] sm:$0xf] }
  0xf4   :  { %2664 = vmatpush.bf16.msrb.mxu1 %v4436_v55  ;;  %v4497_v27 = vld [vmem:[#allocation8 + $0x450] sm:$0xf0]  ;;  %v4372_v55 = vor.u32 %v5597_v45, %v4369_v46  ;;  %v5745_v16 = vld [vmem:[#allocation8 + $0x7e4] sm:$0xf] }
  0xf5   :  { %v6268_v50 = vpack.c.bf16 %v757_v59, %v757_v59  ;;  %v6270_v6 = vpack.c.bf16 %v758_v0, %v758_v0  ;;  %2677 = vmatpush.bf16.msrb.mxu2 %v4564_v60  ;;  %2644 = vmatpush.bf16.msra.mxu3 %v4084_v61  ;;  %v4641_v54 = vld [vmem:[#allocation8 + $0x570] sm:$0xf0]  ;;  %v4500_v56 = vor.u32 %v5629_v48, %v4497_v27  ;;  %v5593_v59 = vld [vmem:[#allocation8 + $0x324] sm:$0xf]  ;;  %v4071_v48 = vld [vmem:[#allocation8 + $0xe8] sm:$0xf] }
  0xf6   :  { %2657 = vmatpush.bf16.msrb.mxu0 %v4212_v1  ;;  %v4353_v60 = vld [vmem:[#allocation8 + $0x330] sm:$0xf0]  ;;  %v5625_v61 = vld [vmem:[#allocation8 + $0x424] sm:$0xf]  ;;  %v4644_v63 = vor.u32 %v5665_v53, %v4641_v54  ;;  %v4772_v0 = vor.u32 %v5697_v57, %v4769_v58  ;;  %v5524_v27 = vld [vmem:[#allocation8 + $0xf4] sm:$0xf0] }
  0xf7   :  { %2593 = vmatmul.bf16.vlgmr.msrb.gmra.mxu3 %v6268_v50  ;;  %2606 = vmatmul.bf16.vlgmr.msra.gmra.mxu0 %v6270_v6  ;;  %v5661_v1 = vld [vmem:[#allocation8 + $0x544] sm:$0xf]  ;;  %v4753_v9 = vld [vmem:[#allocation8 + $0x650] sm:$0xf0]  ;;  %v5556_v53 = vld [vmem:[#allocation8 + $0x1f4] sm:$0xf0] }
  0xf8   :  { %v723_v17 = vpop.f32.mrf.mxu2  ;;  %v736_v20 = vpop.f32.mrf.mxu3  ;;  %2665 = vmatpush.bf16.msrb.mxu1 %v4420_v8  ;;  %v4484_v8 = vor.u32 %v5625_v61, %v4481_v62  ;;  %v4337_v12 = vld [vmem:[#allocation8 + $0x310] sm:$0xf0]  ;;  %v5777_v19 = vld [vmem:[#allocation8 + $0x8e4] sm:$0xf]  ;;  %v4055_v62 = vld [vmem:[#allocation8 + $0xc8] sm:$0xf] }
  0xf9   :  { %2689 = vmatpush.bf16.msrb.mxu3 %v4708_v4  ;;  %2678 = vmatpush.bf16.msrb.mxu2 %v4548_v13  ;;  %v4465_v15 = vld [vmem:[#allocation8 + $0x410] sm:$0xf0]  ;;  %v4628_v17 = vor.u32 %v5661_v1, %v4625_v2  ;;  %v4340_v25 = vor.u32 %v5589_v10, %v4337_v12  ;;  %v5689_v28 = vld [vmem:[#allocation8 + $0x624] sm:$0xf]  ;;  %v4183_v2 = vld [vmem:[#allocation8 + $0x1c8] sm:$0xf] }
  0xfa   :  { %2702 = vmatpush.bf16.msra.mxu0 %v4836_v7  ;;  %v4356_v7 = vor.u32 %v5593_v59, %v4353_v60  ;;  %v4961_v18 = vld [vmem:[#allocation8 + $0x7f0] sm:$0xf0]  ;;  %v5741_v35 = vld [vmem:[#allocation8 + $0x7c4] sm:$0xf]  ;;  %v4072_v60 = vor.u32 %v5524_v27, %v4071_v48  ;;  %v5540_v48 = vld [vmem:[#allocation8 + $0x174] sm:$0xf0] }
  0xfb   :  { %v5089_v20 = vld [vmem:[#allocation8 + $0x8f0] sm:$0xf0]  ;;  %v4964_v32 = vor.u32 %v5745_v16, %v4961_v18  ;;  %v5685_v44 = vld [vmem:[#allocation8 + $0x604] sm:$0xf]  ;;  %v5548_v18 = vld [vmem:[#allocation8 + $0x1b4] sm:$0xf0] }
  0xfc   :  { %2666 = vmatpush.bf16.msrb.mxu1 %v4404_v23  ;;  %v5657_v23 = vld [vmem:[#allocation8 + $0x524] sm:$0xf]  ;;  %v4609_v24 = vld [vmem:[#allocation8 + $0x530] sm:$0xf0]  ;;  %v5092_v33 = vor.u32 %v5777_v19, %v5089_v20 }
  0xfd   :  { %2690 = vmatpush.bf16.msrb.mxu3 %v4692_v21  ;;  %2679 = vmatpush.bf16.msrb.mxu2 %v4532_v26  ;;  %v4468_v26 = vor.u32 %v5621_v14, %v4465_v15  ;;  %v4737_v29 = vld [vmem:[#allocation8 + $0x630] sm:$0xf0]  ;;  %v5737_v54 = vld [vmem:[#allocation8 + $0x7a4] sm:$0xf]  ;;  %v5516_v14 = vld [vmem:[#allocation8 + $0xb4] sm:$0xf0] }
  0xfe   :  { %2703 = vmatpush.bf16.msra.mxu0 %v4820_v22  ;;  %v4756_v22 = vor.u32 %v5693_v3, %v4753_v9  ;;  %v4593_v43 = vld [vmem:[#allocation8 + $0x510] sm:$0xf0]  ;;  %v5769_v57 = vld [vmem:[#allocation8 + $0x8a4] sm:$0xf]  ;;  %v5552_v3 = vld [vmem:[#allocation8 + $0x1d4] sm:$0xf0] }
  0xff   :  { %v4721_v46 = vld [vmem:[#allocation8 + $0x610] sm:$0xf0]  ;;  %v4184_v12 = vor.u32 %v5552_v3, %v4183_v2  ;;  %v5729_v19 = vld [vmem:[#allocation8 + $0x764] sm:$0xf]  ;;  %v5588_v3 = vld [vmem:[#allocation8 + $0x2f4] sm:$0xf0] }
 0x100   :  { %2632 = vmatmul.bf16.vlgmr.msra.gmra.mxu2 %v6245_v42  ;;  %2667 = vmatpush.bf16.msrb.mxu1 %v4388_v40  ;;  %v4740_v40 = vor.u32 %v5689_v28, %v4737_v29  ;;  %v5057_v58 = vld [vmem:[#allocation8 + $0x8b0] sm:$0xf0]  ;;  %v4724_v59 = vor.u32 %v5685_v44, %v4721_v46  ;;  %v4135_v46 = vld [vmem:[#allocation8 + $0x168] sm:$0xf]  ;;  %v5721_v27 = vld [vmem:[#allocation8 + $0x724] sm:$0xf] }
 0x101   :  { %2691 = vmatpush.bf16.msrb.mxu3 %v4676_v36  ;;  %2680 = vmatpush.bf16.msrb.mxu2 %v4516_v41  ;;  %v4612_v36 = vor.u32 %v5657_v23, %v4609_v24  ;;  %v5653_v41 = vld [vmem:[#allocation8 + $0x504] sm:$0xf]  ;;  %v5060_v1 = vor.u32 %v5769_v57, %v5057_v58  ;;  %v5041_v9 = vld [vmem:[#allocation8 + $0x890] sm:$0xf0]  ;;  %v4119_v57 = vld [vmem:[#allocation8 + $0x148] sm:$0xf] }
 0x102   :  { %2704 = vmatpush.bf16.msra.mxu0 %v4804_v37  ;;  %v4945_v37 = vld [vmem:[#allocation8 + $0x7d0] sm:$0xf0] }
 0x103   :  { %v4897_v20 = vld [vmem:[#allocation8 + $0x770] sm:$0xf0] }
 0x104   :  { %2668 = vmatpush.bf16.msrb.mxu1 %v4372_v55  ;;  %v4596_v55 = vor.u32 %v5653_v41, %v4593_v43  ;;  %v4900_v28 = vor.u32 %v5729_v19, %v4897_v20  ;;  %v4007_v41 = vld [vmem:[#allocation8 + $0x68] sm:$0xf]  ;;  %v5508_v43 = vld [vmem:[#allocation8 + $0x74] sm:$0xf0] }
 0x105   :  { %2692 = vmatpush.bf16.msrb.mxu3 %v4660_v49  ;;  %2681 = vmatpush.bf16.msrb.mxu2 %v4500_v56  ;;  %v4948_v49 = vor.u32 %v5741_v35, %v4945_v37  ;;  %v4929_v56 = vld [vmem:[#allocation8 + $0x7b0] sm:$0xf0]  ;;  %v5725_v35 = vld [vmem:[#allocation8 + $0x744] sm:$0xf]  ;;  %v5584_v20 = vld [vmem:[#allocation8 + $0x2d4] sm:$0xf0] }
 0x106   :  { %2705 = vmatpush.bf16.msra.mxu0 %v4788_v51  ;;  %v5076_v51 = vor.u32 %v5773_v38, %v5073_v39  ;;  %v5757_v37 = vld [vmem:[#allocation8 + $0x844] sm:$0xf]  ;;  %v5009_v38 = vld [vmem:[#allocation8 + $0x850] sm:$0xf0] }
 0x107   :  { %2645 = vmatmul.bf16.vlgmr.msra.gmra.mxu3 %v6248_v47  ;;  %2658 = vmatmul.bf16.vlgmr.msrb.gmra.mxu0 %v6252_v5 }
 0x108   :  { %v747_v4 = vpop.f32.mrf.mxu0  ;;  %2669 = vmatpush.bf16.msrb.mxu1 %v4356_v7  ;;  %v4913_v7 = vld [vmem:[#allocation8 + $0x790] sm:$0xf0] }
 0x109   :  { %v748_v13 = vadd.f32 %v5879_v52, %v747_v4  ;;  %2693 = vmatpush.bf16.msrb.mxu3 %v4644_v63  ;;  %2682 = vmatpush.bf16.msrb.mxu2 %v4484_v8  ;;  %v4199_v52 = vld [vmem:[#allocation8 + $0x1e8] sm:$0xf]  ;;  %v5520_v63 = vld [vmem:[#allocation8 + $0xd4] sm:$0xf0]  ;;  %v5733_v4 = vld [vmem:[#allocation8 + $0x784] sm:$0xf] }
 0x10a   :  { %2706 = vmatpush.bf16.msra.mxu0 %v4772_v0  ;;  %v4200_v61 = vor.u32 %v5556_v53, %v4199_v52  ;;  %v4932_v0 = vor.u32 %v5737_v54, %v4929_v56  ;;  %v5765_v8 = vld [vmem:[#allocation8 + $0x884] sm:$0xf]  ;;  %v4056_v10 = vor.u32 %v5520_v63, %v4055_v62  ;;  %v4916_v15 = vor.u32 %v5733_v4, %v4913_v7  ;;  %v4993_v52 = vld [vmem:[#allocation8 + $0x830] sm:$0xf0]  ;;  %v5504_v56 = vld [vmem:[#allocation8 + $0x54] sm:$0xf0] }
 0x10b   :  { %v759_v21 = vmax.f32 %v748_v13, 0.0  ;;  %v4039_v13 = vld [vmem:[#allocation8 + $0xa8] sm:$0xf]  ;;  %v5044_v16 = vor.u32 %v5765_v8, %v5041_v9  ;;  %v4008_v53 = vor.u32 %v5508_v43, %v4007_v41  ;;  %v4136_v54 = vor.u32 %v5540_v48, %v4135_v46  ;;  %v4849_v62 = vld [vmem:[#allocation8 + $0x710] sm:$0xf0] }
 0x10c   :  { %2670 = vmatpush.bf16.msrb.mxu1 %v4340_v25  ;;  %v4040_v23 = vor.u32 %v5516_v14, %v4039_v13  ;;  %v4023_v25 = vld [vmem:[#allocation8 + $0x88] sm:$0xf]  ;;  %v5749_v63 = vld [vmem:[#allocation8 + $0x804] sm:$0xf]  ;;  %v5620_v7 = vld [vmem:[#allocation8 + $0x3f4] sm:$0xf0] }
 0x10d   :  { %v6277_v30 = vpack.c.bf16 %v759_v21, %v759_v21  ;;  %2694 = vmatpush.bf16.msrb.mxu3 %v4628_v17  ;;  %2683 = vmatpush.bf16.msrb.mxu2 %v4468_v26  ;;  %v4167_v17 = vld [vmem:[#allocation8 + $0x1a8] sm:$0xf]  ;;  %v5761_v21 = vld [vmem:[#allocation8 + $0x864] sm:$0xf]  ;;  %v5512_v26 = vld [vmem:[#allocation8 + $0x94] sm:$0xf0] }
 0x10e   :  { %2707 = vmatpush.bf16.msra.mxu0 %v4756_v22  ;;  %v5025_v22 = vld [vmem:[#allocation8 + $0x870] sm:$0xf0]  ;;  %v4168_v24 = vor.u32 %v5548_v18, %v4167_v17  ;;  %v4024_v39 = vor.u32 %v5512_v26, %v4023_v25  ;;  %v4455_v4 = vld [vmem:[#allocation8 + $0x3e8] sm:$0xf]  ;;  %v5496_v25 = vld [vmem:[#allocation8 + $0x14] sm:$0xf0] }
 0x10f   :  { %2619 = vmatmul.bf16.vlgmr.msra.gmra.mxu1 %v6277_v30  ;;  %v5028_v29 = vor.u32 %v5761_v21, %v5025_v22  ;;  %v3975_v9 = vld [vmem:[#allocation8 + $0x28] sm:$0xf]  ;;  %v4456_v17 = vor.u32 %v5620_v7, %v4455_v4  ;;  %v5616_v22 = vld [vmem:[#allocation8 + $0x3d4] sm:$0xf0] }
 0x110   :  { %v749_v45 = vpop.f32.mrf.mxu0  ;;  %2715 = vmatpush.bf16.msra.mxu1 %v4964_v32  ;;  %2684 = vmatmul.bf16.vlgmr.msrb.gmra.mxu2 %v6261_v31  ;;  %v4151_v32 = vld [vmem:[#allocation8 + $0x188] sm:$0xf] }
 0x111   :  { %2728 = vmatpush.bf16.msra.mxu2 %v5092_v33  ;;  %2695 = vmatpush.bf16.msrb.mxu3 %v4612_v36  ;;  %v5544_v33 = vld [vmem:[#allocation8 + $0x194] sm:$0xf0]  ;;  %v4881_v36 = vld [vmem:[#allocation8 + $0x750] sm:$0xf0]  ;;  %v5012_v45 = vor.u32 %v5757_v37, %v5009_v38  ;;  %v4103_v14 = vld [vmem:[#allocation8 + $0x128] sm:$0xf] }
 0x112   :  { %2708 = vmatpush.bf16.msra.mxu0 %v4740_v40  ;;  %v4152_v40 = vor.u32 %v5544_v33, %v4151_v32  ;;  %v4884_v44 = vor.u32 %v5725_v35, %v4881_v36  ;;  %v4311_v18 = vld [vmem:[#allocation8 + $0x2c8] sm:$0xf]  ;;  %v5652_v32 = vld [vmem:[#allocation8 + $0x4f4] sm:$0xf0] }
 0x113   :  { %v4439_v21 = vld [vmem:[#allocation8 + $0x3c8] sm:$0xf]  ;;  %v4312_v33 = vor.u32 %v5584_v20, %v4311_v18  ;;  %v5684_v37 = vld [vmem:[#allocation8 + $0x5f4] sm:$0xf0] }
 0x114   :  { %2716 = vmatpush.bf16.msra.mxu1 %v4948_v49  ;;  %v4865_v49 = vld [vmem:[#allocation8 + $0x730] sm:$0xf0]  ;;  %v4087_v26 = vld [vmem:[#allocation8 + $0x108] sm:$0xf]  ;;  %v4440_v35 = vor.u32 %v5616_v22, %v4439_v21  ;;  %v5568_v18 = vld [vmem:[#allocation8 + $0x254] sm:$0xf0] }
 0x115   :  { %2729 = vmatpush.bf16.msra.mxu2 %v5076_v51  ;;  %2696 = vmatpush.bf16.msrb.mxu3 %v4596_v55  ;;  %v5753_v51 = vld [vmem:[#allocation8 + $0x824] sm:$0xf]  ;;  %v3991_v55 = vld [vmem:[#allocation8 + $0x48] sm:$0xf]  ;;  %v4868_v58 = vor.u32 %v5721_v27, %v4865_v49  ;;  %v5648_v27 = vld [vmem:[#allocation8 + $0x4d4] sm:$0xf0] }
 0x116   :  { %2709 = vmatpush.bf16.msra.mxu0 %v4724_v59  ;;  %v4996_v59 = vor.u32 %v5753_v51, %v4993_v52  ;;  %v3992_v2 = vor.u32 %v5504_v56, %v3991_v55  ;;  %v4711_v36 = vld [vmem:[#allocation8 + $0x5e8] sm:$0xf]  ;;  %v5680_v52 = vld [vmem:[#allocation8 + $0x5d4] sm:$0xf0] }
 0x117   :  { %v4712_v46 = vor.u32 %v5684_v37, %v4711_v36  ;;  %v4567_v48 = vld [vmem:[#allocation8 + $0x4c8] sm:$0xf]  ;;  %v5576_v55 = vld [vmem:[#allocation8 + $0x294] sm:$0xf0] }
 0x118   :  { %2717 = vmatpush.bf16.msra.mxu1 %v4932_v0  ;;  %2697 = vmatmul.bf16.vlgmr.msrb.gmra.mxu3 %v6264_v34  ;;  %v4977_v0 = vld [vmem:[#allocation8 + $0x810] sm:$0xf0]  ;;  %v4695_v51 = vld [vmem:[#allocation8 + $0x5c8] sm:$0xf]  ;;  %v4568_v56 = vor.u32 %v5648_v27, %v4567_v48  ;;  %v5600_v21 = vld [vmem:[#allocation8 + $0x354] sm:$0xf0] }
 0x119   :  { %2741 = vmatpush.bf16.msra.mxu3 %v4072_v60  ;;  %2730 = vmatpush.bf16.msra.mxu2 %v5060_v1  ;;  %v5536_v60 = vld [vmem:[#allocation8 + $0x154] sm:$0xf0]  ;;  %v4327_v1 = vld [vmem:[#allocation8 + $0x2e8] sm:$0xf]  ;;  %v4980_v13 = vor.u32 %v5749_v63, %v4977_v0 }
 0x11a   :  { %2754 = vmatpush.bf16.msrb.mxu0 %v4200_v61  ;;  %v5717_v61 = vld [vmem:[#allocation8 + $0x704] sm:$0xf]  ;;  %v4120_v8 = vor.u32 %v5536_v60, %v4119_v57  ;;  %v4407_v57 = vld [vmem:[#allocation8 + $0x388] sm:$0xf]  ;;  %v5676_v0 = vld [vmem:[#allocation8 + $0x5b4] sm:$0xf0] }
 0x11b   :  { %2710 = vmatmul.bf16.vlgmr.msra.gmra.mxu0 %v6268_v50  ;;  %v4551_v60 = vld [vmem:[#allocation8 + $0x4a8] sm:$0xf]  ;;  %v5596_v37 = vld [vmem:[#allocation8 + $0x334] sm:$0xf0] }
 0x11c   :  { %2718 = vmatpush.bf16.msra.mxu1 %v4916_v15  ;;  %v5532_v15 = vld [vmem:[#allocation8 + $0x134] sm:$0xf0]  ;;  %v4679_v63 = vld [vmem:[#allocation8 + $0x5a8] sm:$0xf] }
 0x11d   :  { %2742 = vmatpush.bf16.msra.mxu3 %v4056_v10  ;;  %2731 = vmatpush.bf16.msra.mxu2 %v5044_v16  ;;  %v5500_v10 = vld [vmem:[#allocation8 + $0x34] sm:$0xf0]  ;;  %v4328_v16 = vor.u32 %v5588_v3, %v4327_v1  ;;  %v4391_v7 = vld [vmem:[#allocation8 + $0x368] sm:$0xf] }
 0x11e   :  { %2755 = vmatpush.bf16.msrb.mxu0 %v4184_v12  ;;  %v4852_v12 = vor.u32 %v5717_v61, %v4849_v62  ;;  %v3976_v19 = vor.u32 %v5500_v10, %v3975_v9  ;;  %v5644_v61 = vld [vmem:[#allocation8 + $0x4b4] sm:$0xf0]  ;;  %v4680_v9 = vor.u32 %v5676_v0, %v4679_v63  ;;  %v4535_v10 = vld [vmem:[#allocation8 + $0x488] sm:$0xf] }
 0x11f   :  { %2671 = vmatmul.bf16.vlgmr.msrb.gmra.mxu1 %v6254_v11  ;;  %v5572_v3 = vld [vmem:[#allocation8 + $0x274] sm:$0xf0]  ;;  %v4552_v4 = vor.u32 %v5644_v61, %v4551_v60  ;;  %v4375_v20 = vld [vmem:[#allocation8 + $0x348] sm:$0xf] }
 0x120   :  { %2719 = vmatpush.bf16.msra.mxu1 %v4900_v28  ;;  %v5528_v28 = vld [vmem:[#allocation8 + $0x114] sm:$0xf0]  ;;  %v4359_v36 = vld [vmem:[#allocation8 + $0x328] sm:$0xf] }
 0x121   :  { %2743 = vmatpush.bf16.msra.mxu3 %v4040_v23  ;;  %2732 = vmatpush.bf16.msra.mxu2 %v5028_v29  ;;  %v4104_v23 = vor.u32 %v5532_v15, %v4103_v14  ;;  %v4583_v29 = vld [vmem:[#allocation8 + $0x4e8] sm:$0xf]  ;;  %v4088_v41 = vor.u32 %v5528_v28, %v4087_v26  ;;  %v5672_v15 = vld [vmem:[#allocation8 + $0x594] sm:$0xf0] }
 0x122   :  { %2756 = vmatpush.bf16.msrb.mxu0 %v4168_v24  ;;  %v3959_v24 = vld [vmem:[#allocation8 + $0x8] sm:$0xf]  ;;  %v4584_v43 = vor.u32 %v5652_v32, %v4583_v29  ;;  %v5668_v28 = vld [vmem:[#allocation8 + $0x574] sm:$0xf0]  ;;  %v4376_v29 = vor.u32 %v5600_v21, %v4375_v20 }
 0x123   :  { %v3960_v38 = vor.u32 %v5496_v25, %v3959_v24  ;;  %v4663_v14 = vld [vmem:[#allocation8 + $0x588] sm:$0xf]  ;;  %v5636_v24 = vld [vmem:[#allocation8 + $0x474] sm:$0xf0] }
 0x124   :  { %2720 = vmatpush.bf16.msra.mxu1 %v4884_v44  ;;  %v4423_v44 = vld [vmem:[#allocation8 + $0x3a8] sm:$0xf]  ;;  %v4664_v22 = vor.u32 %v5672_v15, %v4663_v14  ;;  %v5560_v48 = vld [vmem:[#allocation8 + $0x214] sm:$0xf0] }
 0x125   :  { %2744 = vmatpush.bf16.msra.mxu3 %v4024_v39  ;;  %2733 = vmatpush.bf16.msra.mxu2 %v5012_v45  ;;  %v4295_v39 = vld [vmem:[#allocation8 + $0x2a8] sm:$0xf]  ;;  %v5612_v45 = vld [vmem:[#allocation8 + $0x3b4] sm:$0xf0] }
 0x126   :  { %2757 = vmatpush.bf16.msrb.mxu0 %v4152_v40  ;;  %v5580_v40 = vld [vmem:[#allocation8 + $0x2b4] sm:$0xf0]  ;;  %v4647_v26 = vld [vmem:[#allocation8 + $0x568] sm:$0xf] }
 0x127   :  { %v4296_v49 = vor.u32 %v5580_v40, %v4295_v39  ;;  %v4231_v32 = vld [vmem:[#allocation8 + $0x228] sm:$0xf]  ;;  %v5632_v40 = vld [vmem:[#allocation8 + $0x454] sm:$0xf0] }
 0x128   :  { %2721 = vmatpush.bf16.msra.mxu1 %v4868_v58  ;;  %v5608_v58 = vld [vmem:[#allocation8 + $0x394] sm:$0xf0]  ;;  %v4503_v39 = vld [vmem:[#allocation8 + $0x448] sm:$0xf] }
 0x129   :  { %2745 = vmatpush.bf16.msra.mxu3 %v4008_v53  ;;  %2734 = vmatpush.bf16.msra.mxu2 %v4996_v59  ;;  %v4424_v53 = vor.u32 %v5612_v45, %v4423_v44  ;;  %v4696_v59 = vor.u32 %v5680_v52, %v4695_v51  ;;  %v4408_v1 = vor.u32 %v5608_v58, %v4407_v57  ;;  %v5664_v44 = vld [vmem:[#allocation8 + $0x554] sm:$0xf0]  ;;  %v4215_v45 = vld [vmem:[#allocation8 + $0x208] sm:$0xf] }
 0x12a   :  { %2758 = vmatpush.bf16.msrb.mxu0 %v4136_v54  ;;  %v4279_v54 = vld [vmem:[#allocation8 + $0x288] sm:$0xf]  ;;  %v4504_v51 = vor.u32 %v5632_v40, %v4503_v39  ;;  %v5628_v58 = vld [vmem:[#allocation8 + $0x434] sm:$0xf0] }
 0x12b   :  { %v4280_v62 = vor.u32 %v5576_v55, %v4279_v54  ;;  %v4343_v27 = vld [vmem:[#allocation8 + $0x308] sm:$0xf]  ;;  %v5660_v61 = vld [vmem:[#allocation8 + $0x534] sm:$0xf0] }
 0x12c   :  { %2722 = vmatpush.bf16.msra.mxu1 %v4852_v12  ;;  %v5640_v12 = vld [vmem:[#allocation8 + $0x494] sm:$0xf0]  ;;  %v4839_v52 = vld [vmem:[#allocation8 + $0x6e8] sm:$0xf] }
 0x12d   :  { %2746 = vmatpush.bf16.msra.mxu3 %v3992_v2  ;;  %2735 = vmatpush.bf16.msra.mxu2 %v4980_v13  ;;  %v4263_v2 = vld [vmem:[#allocation8 + $0x268] sm:$0xf]  ;;  %v5780_v15 = vld [vmem:[#allocation8 + $0x8f4] sm:$0xf0] }
 0x12e   :  { %2759 = vmatpush.bf16.msrb.mxu0 %v4120_v8  ;;  %v5604_v8 = vld [vmem:[#allocation8 + $0x374] sm:$0xf0]  ;;  %v4264_v13 = vor.u32 %v5572_v3, %v4263_v2  ;;  %v4967_v54 = vld [vmem:[#allocation8 + $0x7e8] sm:$0xf] }
 0x12f   :  { %2723 = vmatmul.bf16.vlgmr.msra.gmra.mxu1 %v6270_v6  ;;  %v4487_v57 = vld [vmem:[#allocation8 + $0x428] sm:$0xf]  ;;  %v5712_v3 = vld [vmem:[#allocation8 + $0x6d4] sm:$0xf0] }
 0x130   :  { %2767 = vmatpush.bf16.msrb.mxu1 %v4328_v16  ;;  %2736 = vmatmul.bf16.vlgmr.msra.gmra.mxu2 %v6277_v30  ;;  %v4392_v16 = vor.u32 %v5604_v8, %v4391_v7  ;;  %v4615_v60 = vld [vmem:[#allocation8 + $0x528] sm:$0xf]  ;;  %v4488_v2 = vor.u32 %v5628_v58, %v4487_v57  ;;  %v5744_v7 = vld [vmem:[#allocation8 + $0x7d4] sm:$0xf0] }
 0x131   :  { %2780 = vmatpush.bf16.msrb.mxu2 %v4456_v17  ;;  %2747 = vmatpush.bf16.msra.mxu3 %v3976_v19  ;;  %v4247_v17 = vld [vmem:[#allocation8 + $0x248] sm:$0xf]  ;;  %v4536_v19 = vor.u32 %v5640_v12, %v4535_v10  ;;  %v4616_v8 = vor.u32 %v5660_v61, %v4615_v60  ;;  %v5624_v10 = vld [vmem:[#allocation8 + $0x414] sm:$0xf0] }
 0x132   :  { %2760 = vmatpush.bf16.msrb.mxu0 %v4104_v23  ;;  %v4519_v23 = vld [vmem:[#allocation8 + $0x468] sm:$0xf]  ;;  %v4248_v25 = vor.u32 %v5568_v18, %v4247_v17  ;;  %v5522_v17 = vld [vmem:[#allocation8 + $0xec] sm:$0xf]  ;;  %v4073_v18 = vld [vmem:[#allocation8 + $0xf8] sm:$0xf0] }
 0x133   :  { %v4823_v0 = vld [vmem:[#allocation8 + $0x6c8] sm:$0xf]  ;;  %v5704_v40 = vld [vmem:[#allocation8 + $0x694] sm:$0xf0] }
 0x134   :  { %2768 = vmatpush.bf16.msrb.mxu1 %v4312_v33  ;;  %v5564_v33 = vld [vmem:[#allocation8 + $0x234] sm:$0xf0]  ;;  %v4599_v12 = vld [vmem:[#allocation8 + $0x508] sm:$0xf] }
 0x135   :  { %2781 = vmatpush.bf16.msrb.mxu2 %v4440_v35  ;;  %2748 = vmatpush.bf16.msra.mxu3 %v3960_v38  ;;  %v4520_v35 = vor.u32 %v5636_v24, %v4519_v23  ;;  %v4648_v38 = vor.u32 %v5668_v28, %v4647_v26  ;;  %v5095_v14 = vld [vmem:[#allocation8 + $0x8e8] sm:$0xf]  ;;  %v5740_v26 = vld [vmem:[#allocation8 + $0x7b4] sm:$0xf0]  ;;  %v4076_v28 = vor.u32 %v5522_v17, %v4073_v18 }
 0x136   :  { %2761 = vmatpush.bf16.msrb.mxu0 %v4088_v41  ;;  %v4232_v41 = vor.u32 %v5564_v33, %v4231_v32  ;;  %v4807_v21 = vld [vmem:[#allocation8 + $0x6a8] sm:$0xf]  ;;  %v5096_v24 = vor.u32 %v5780_v15, %v5095_v14  ;;  %v5776_v33 = vld [vmem:[#allocation8 + $0x8d4] sm:$0xf0] }
 0x137   :  { %v5079_v32 = vld [vmem:[#allocation8 + $0x8c8] sm:$0xf]  ;;  %v5732_v60 = vld [vmem:[#allocation8 + $0x774] sm:$0xf0] }
 0x138   :  { %2749 = vmatmul.bf16.vlgmr.msra.gmra.mxu3 %v6245_v42  ;;  %2769 = vmatpush.bf16.msrb.mxu1 %v4296_v49  ;;  %v5592_v49 = vld [vmem:[#allocation8 + $0x314] sm:$0xf0]  ;;  %v4791_v39 = vld [vmem:[#allocation8 + $0x688] sm:$0xf] }
 0x139   :  { %2793 = vmatpush.bf16.msrb.mxu3 %v4584_v43  ;;  %2762 = vmatmul.bf16.vlgmr.msrb.gmra.mxu0 %v6248_v47  ;;  %v4631_v43 = vld [vmem:[#allocation8 + $0x548] sm:$0xf]  ;;  %v5728_v15 = vld [vmem:[#allocation8 + $0x754] sm:$0xf0] }
 0x13a   :  { %2806 = vmatpush.bf16.msra.mxu0 %v4712_v46  ;;  %2782 = vmatpush.bf16.msrb.mxu2 %v4424_v53  ;;  %v4360_v46 = vor.u32 %v5596_v37, %v4359_v36  ;;  %v5716_v53 = vld [vmem:[#allocation8 + $0x6f4] sm:$0xf0]  ;;  %v4632_v55 = vor.u32 %v5664_v44, %v4631_v43  ;;  %v5518_v36 = vld [vmem:[#allocation8 + $0xcc] sm:$0xf]  ;;  %v4057_v37 = vld [vmem:[#allocation8 + $0xd8] sm:$0xf0]  ;;  %v5080_v44 = vor.u32 %v5776_v33, %v5079_v32 }
 0x13b   :  { %v4840_v63 = vor.u32 %v5716_v53, %v4839_v52  ;;  %v5514_v52 = vld [vmem:[#allocation8 + $0xac] sm:$0xf]  ;;  %v4041_v53 = vld [vmem:[#allocation8 + $0xb8] sm:$0xf0]  ;;  %v4887_v14 = vld [vmem:[#allocation8 + $0x748] sm:$0xf] }
 0x13c   :  { %2770 = vmatpush.bf16.msrb.mxu1 %v4280_v62  ;;  %v4344_v62 = vor.u32 %v5592_v49, %v4343_v27  ;;  %v5063_v27 = vld [vmem:[#allocation8 + $0x8a8] sm:$0xf]  ;;  %v5772_v49 = vld [vmem:[#allocation8 + $0x8b4] sm:$0xf0]  ;;  %v4044_v61 = vor.u32 %v5514_v52, %v4041_v53  ;;  %v4201_v52 = vld [vmem:[#allocation8 + $0x1f8] sm:$0xf0] }
 0x13d   :  { %2794 = vmatpush.bf16.msrb.mxu3 %v4568_v56  ;;  %v5748_v56 = vld [vmem:[#allocation8 + $0x7f4] sm:$0xf0]  ;;  %v5064_v58 = vor.u32 %v5772_v49, %v5063_v27  ;;  %v5031_v17 = vld [vmem:[#allocation8 + $0x868] sm:$0xf]  ;;  %v5586_v53 = vld [vmem:[#allocation8 + $0x2ec] sm:$0xf] }
 0x13e   :  { %2807 = vmatpush.bf16.msra.mxu0 %v4696_v59  ;;  %2783 = vmatpush.bf16.msrb.mxu2 %v4408_v1  ;;  %v4216_v59 = vor.u32 %v5560_v48, %v4215_v45  ;;  %v4968_v1 = vor.u32 %v5748_v56, %v4967_v54  ;;  %v4919_v45 = vld [vmem:[#allocation8 + $0x788] sm:$0xf]  ;;  %v4060_v48 = vor.u32 %v5518_v36, %v4057_v37  ;;  %v5700_v56 = vld [vmem:[#allocation8 + $0x674] sm:$0xf0] }
 0x13f   :  { %v5764_v18 = vld [vmem:[#allocation8 + $0x874] sm:$0xf0] }
 0x140   :  { %2771 = vmatpush.bf16.msrb.mxu1 %v4264_v13  ;;  %v5656_v13 = vld [vmem:[#allocation8 + $0x514] sm:$0xf0] }
 0x141   :  { %2795 = vmatpush.bf16.msrb.mxu3 %v4552_v4  ;;  %v4951_v4 = vld [vmem:[#allocation8 + $0x7c8] sm:$0xf]  ;;  %v4600_v23 = vor.u32 %v5656_v13, %v4599_v12  ;;  %v5760_v36 = vld [vmem:[#allocation8 + $0x854] sm:$0xf0] }
 0x142   :  { %2808 = vmatpush.bf16.msra.mxu0 %v4680_v9  ;;  %2784 = vmatpush.bf16.msrb.mxu2 %v4392_v16  ;;  %v4471_v9 = vld [vmem:[#allocation8 + $0x408] sm:$0xf]  ;;  %v4824_v16 = vor.u32 %v5712_v3, %v4823_v0 }
 0x143   :  { %v4472_v20 = vor.u32 %v5624_v10, %v4471_v9 }
 0x144   :  { %2772 = vmatpush.bf16.msrb.mxu1 %v4248_v25  ;;  %v4935_v25 = vld [vmem:[#allocation8 + $0x7a8] sm:$0xf] }
 0x145   :  { %2796 = vmatpush.bf16.msrb.mxu3 %v4536_v19  ;;  %v4952_v19 = vor.u32 %v5744_v7, %v4951_v4  ;;  %v4759_v7 = vld [vmem:[#allocation8 + $0x648] sm:$0xf] }
 0x146   :  { %2809 = vmatpush.bf16.msra.mxu0 %v4664_v22  ;;  %2785 = vmatpush.bf16.msrb.mxu2 %v4376_v29  ;;  %v5708_v22 = vld [vmem:[#allocation8 + $0x6b4] sm:$0xf0]  ;;  %v6290_v29 = vld [vmem:[#allocation10] sm:$0xf] }
 0x148   :  { %2773 = vmatpush.bf16.msrb.mxu1 %v4232_v41  ;;  %v1059_v41 = vperm.slane %v6290_v29, 0 }
 0x149   :  { %2797 = vmatpush.bf16.msrb.mxu3 %v4520_v35  ;;  %v4808_v35 = vor.u32 %v5708_v22, %v4807_v21  ;;  %v4009_v21 = vld [vmem:[#allocation8 + $0x78] sm:$0xf0]  ;;  %v4888_v22 = vor.u32 %v5728_v15, %v4887_v14  ;;  %v5618_v15 = vld [vmem:[#allocation8 + $0x3ec] sm:$0xf] }
 0x14a   :  { %2810 = vmatpush.bf16.msra.mxu0 %v4648_v38  ;;  %2786 = vmatpush.bf16.msrb.mxu2 %v4360_v46  ;;  %v4936_v38 = vor.u32 %v5740_v26, %v4935_v25  ;;  %v5736_v46 = vld [vmem:[#allocation8 + $0x794] sm:$0xf0]  ;;  %v5032_v25 = vor.u32 %v5764_v18, %v5031_v17  ;;  %v4871_v26 = vld [vmem:[#allocation8 + $0x728] sm:$0xf]  ;;  %v3961_v14 = vld [vmem:[#allocation8 + $0x18] sm:$0xf0] }
 0x14b   :  { %v4920_v54 = vor.u32 %v5736_v46, %v4919_v45  ;;  %v5688_v45 = vld [vmem:[#allocation8 + $0x614] sm:$0xf0]  ;;  %v4855_v46 = vld [vmem:[#allocation8 + $0x708] sm:$0xf]  ;;  %v5650_v18 = vld [vmem:[#allocation8 + $0x4ec] sm:$0xf] }
 0x14c   :  { %2774 = vmatpush.bf16.msrb.mxu1 %v4216_v59  ;;  %v2516_v43 = vpop.f32.mrf.mxu1  ;;  %v4903_v59 = vld [vmem:[#allocation8 + $0x768] sm:$0xf] }
 0x14d   :  { %2798 = vmatpush.bf16.msrb.mxu3 %v4504_v51  ;;  %v4792_v51 = vor.u32 %v5704_v40, %v4791_v39  ;;  %v2517_v57 = vadd.f32 %v2516_v43, %v1059_v41  ;;  %v4904_v4 = vor.u32 %v5732_v60, %v4903_v59  ;;  %v5502_v39 = vld [vmem:[#allocation8 + $0x4c] sm:$0xf]  ;;  %v3993_v40 = vld [vmem:[#allocation8 + $0x58] sm:$0xf0]  ;;  %v4727_v41 = vld [vmem:[#allocation8 + $0x608] sm:$0xf] }
 0x14e   :  { %2811 = vmatpush.bf16.msra.mxu0 %v4632_v55  ;;  %2787 = vmatpush.bf16.msrb.mxu2 %v4344_v62  ;;  %v4775_v55 = vld [vmem:[#allocation8 + $0x668] sm:$0xf]  ;;  %v4728_v59 = vor.u32 %v5688_v45, %v4727_v41  ;;  %v5498_v60 = vld [vmem:[#allocation8 + $0x2c] sm:$0xf]  ;;  %v4153_v41 = vld [vmem:[#allocation8 + $0x198] sm:$0xf0] }
 0x14f   :  { %2775 = vmatmul.bf16.vlgmr.msrb.gmra.mxu1 %v6252_v5  ;;  %v5047_v62 = vld [vmem:[#allocation8 + $0x888] sm:$0xf]  ;;  %v4776_v0 = vor.u32 %v5700_v56, %v4775_v55  ;;  %v3996_v55 = vor.u32 %v5502_v39, %v3993_v40  ;;  %v4329_v56 = vld [vmem:[#allocation8 + $0x2f8] sm:$0xf0]  ;;  %v5542_v40 = vld [vmem:[#allocation8 + $0x18c] sm:$0xf] }
 0x150   :  { %2819 = vmatpush.bf16.msra.mxu1 %v4840_v63  ;;  %v5768_v63 = vld [vmem:[#allocation8 + $0x894] sm:$0xf0]  ;;  %v4281_v45 = vld [vmem:[#allocation8 + $0x298] sm:$0xf0] }
 0x151   :  { %2799 = vmatpush.bf16.msrb.mxu3 %v4488_v2  ;;  %2788 = vmatmul.bf16.vlgmr.msrb.gmra.mxu2 %v6254_v11  ;;  %v4025_v2 = vld [vmem:[#allocation8 + $0x98] sm:$0xf0]  ;;  %v5048_v13 = vor.u32 %v5768_v63, %v5047_v62 }
 0x152   :  { %2832 = vmatpush.bf16.msra.mxu2 %v4968_v1  ;;  %2812 = vmatpush.bf16.msra.mxu0 %v4616_v8  ;;  %v5510_v1 = vld [vmem:[#allocation8 + $0x8c] sm:$0xf]  ;;  %v5696_v8 = vld [vmem:[#allocation8 + $0x654] sm:$0xf0] }
 0x153   :  { %v2529_v3 = vpop.f32.mrf.mxu2 }
 0x154   :  { %2820 = vmatpush.bf16.msra.mxu1 %v4824_v16  ;;  %v2530_v9 = vadd.f32 %v2529_v3, %v2517_v57  ;;  %v2518_v12 = vpop.f32.mrf.mxu1  ;;  %v4028_v16 = vor.u32 %v5510_v1, %v4025_v2  ;;  %v4999_v57 = vld [vmem:[#allocation8 + $0x828] sm:$0xf]  ;;  %v4332_v1 = vor.u32 %v5586_v53, %v4329_v56  ;;  %v4185_v3 = vld [vmem:[#allocation8 + $0x1d8] sm:$0xf0]  ;;  %v5642_v53 = vld [vmem:[#allocation8 + $0x4ac] sm:$0xf] }
 0x155   :  { %2800 = vmatpush.bf16.msrb.mxu3 %v4472_v20  ;;  %v5506_v20 = vld [vmem:[#allocation8 + $0x6c] sm:$0xf]  ;;  %v5752_v12 = vld [vmem:[#allocation8 + $0x814] sm:$0xf0] }
 0x156   :  { %2833 = vmatpush.bf16.msra.mxu2 %v4952_v19  ;;  %2813 = vmatpush.bf16.msra.mxu0 %v4600_v23  ;;  %v2555_v10 = vpop.f32.mrf.mxu0  ;;  %v4760_v19 = vor.u32 %v5696_v8, %v4759_v7  ;;  %v4743_v23 = vld [vmem:[#allocation8 + $0x628] sm:$0xf]  ;;  %v4012_v33 = vor.u32 %v5506_v20, %v4009_v21  ;;  %v4313_v7 = vld [vmem:[#allocation8 + $0x2d8] sm:$0xf0] }
 0x158   :  { %2801 = vmatmul.bf16.vlgmr.msrb.gmra.mxu3 %v6261_v31  ;;  %2821 = vmatpush.bf16.msra.mxu1 %v4808_v35  ;;  %v5015_v35 = vld [vmem:[#allocation8 + $0x848] sm:$0xf] }
 0x159   :  { %2845 = vmatpush.bf16.msra.mxu3 %v5096_v24  ;;  %2814 = vmatmul.bf16.vlgmr.msra.gmra.mxu0 %v6264_v34  ;;  %v5692_v24 = vld [vmem:[#allocation8 + $0x634] sm:$0xf0]  ;;  %v5016_v49 = vor.u32 %v5760_v36, %v5015_v35  ;;  %v4441_v35 = vld [vmem:[#allocation8 + $0x3d8] sm:$0xf0] }
 0x15a   :  { %2858 = vmatpush.bf16.msrb.mxu0 %v4076_v28  ;;  %2834 = vmatpush.bf16.msra.mxu2 %v4936_v38  ;;  %v5724_v28 = vld [vmem:[#allocation8 + $0x734] sm:$0xf0]  ;;  %v2542_v32 = vpop.f32.mrf.mxu3  ;;  %v4744_v38 = vor.u32 %v5692_v24, %v4743_v23  ;;  %v4169_v23 = vld [vmem:[#allocation8 + $0x1b8] sm:$0xf0] }
 0x15b   :  { %v2543_v37 = vadd.f32 %v2542_v32, %v2530_v9  ;;  %v2531_v43 = vpop.f32.mrf.mxu2 }
 0x15c   :  { %2822 = vmatpush.bf16.msra.mxu1 %v4792_v51  ;;  %v5554_v51 = vld [vmem:[#allocation8 + $0x1ec] sm:$0xf] }
 0x15d   :  { %2846 = vmatpush.bf16.msra.mxu3 %v5080_v44  ;;  %v4872_v44 = vor.u32 %v5724_v28, %v4871_v26  ;;  %v4204_v63 = vor.u32 %v5554_v51, %v4201_v52  ;;  %v5578_v26 = vld [vmem:[#allocation8 + $0x2ac] sm:$0xf]  ;;  %v4297_v28 = vld [vmem:[#allocation8 + $0x2b8] sm:$0xf0]  ;;  %v4156_v52 = vor.u32 %v5542_v40, %v4153_v41 }
 0x15e   :  { %2859 = vmatpush.bf16.msrb.mxu0 %v4060_v48  ;;  %2835 = vmatpush.bf16.msra.mxu2 %v4920_v54  ;;  %v5720_v48 = vld [vmem:[#allocation8 + $0x714] sm:$0xf0]  ;;  %v2557_v27 = vpop.f32.mrf.mxu0  ;;  %v6295_v54 = vadd.f32 %v2555_v10, %v2543_v37  ;;  %v4983_v10 = vld [vmem:[#allocation8 + $0x808] sm:$0xf]  ;;  %v5646_v37 = vld [vmem:[#allocation8 + $0x4cc] sm:$0xf]  ;;  %v4300_v39 = vor.u32 %v5578_v26, %v4297_v28 }
 0x15f   :  { %v4856_v62 = vor.u32 %v5720_v48, %v4855_v46  ;;  %v4984_v21 = vor.u32 %v5752_v12, %v4983_v10  ;;  %v5610_v27 = vld [vmem:[#allocation8 + $0x3ac] sm:$0xf]  ;;  %v4249_v10 = vld [vmem:[#allocation8 + $0x258] sm:$0xf0] }
 0x160   :  { %2823 = vmatpush.bf16.msra.mxu1 %v4776_v0  ;;  %v5550_v0 = vld [vmem:[#allocation8 + $0x1cc] sm:$0xf] }
 0x161   :  { %2847 = vmatpush.bf16.msra.mxu3 %v5064_v58  ;;  %v5756_v58 = vld [vmem:[#allocation8 + $0x834] sm:$0xf0]  ;;  %v4188_v17 = vor.u32 %v5550_v0, %v4185_v3  ;;  %v4409_v0 = vld [vmem:[#allocation8 + $0x398] sm:$0xf0] }
 0x162   :  { %2860 = vmatpush.bf16.msrb.mxu0 %v4044_v61  ;;  %2836 = vmatpush.bf16.msra.mxu2 %v4904_v4  ;;  %v3977_v61 = vld [vmem:[#allocation8 + $0x38] sm:$0xf0]  ;;  %v5000_v2 = vor.u32 %v5756_v58, %v4999_v57  ;;  %v5582_v4 = vld [vmem:[#allocation8 + $0x2cc] sm:$0xf]  ;;  %v2544_v8 = vpop.f32.mrf.mxu3 }
 0x163   :  { %v3980_v9 = vor.u32 %v5498_v60, %v3977_v61  ;;  %v4316_v20 = vor.u32 %v5582_v4, %v4313_v7  ;;  %v5538_v57 = vld [vmem:[#allocation8 + $0x16c] sm:$0xf]  ;;  %v4137_v58 = vld [vmem:[#allocation8 + $0x178] sm:$0xf0] }
 0x164   :  { %2824 = vmatpush.bf16.msra.mxu1 %v4760_v19  ;;  %v4585_v19 = vld [vmem:[#allocation8 + $0x4f8] sm:$0xf0]  ;;  %v5570_v60 = vld [vmem:[#allocation8 + $0x26c] sm:$0xf] }
 0x165   :  { %2848 = vmatpush.bf16.msra.mxu3 %v5048_v13  ;;  %v5494_v13 = vld [vmem:[#allocation8 + $0xc] sm:$0xf]  ;;  %v4588_v32 = vor.u32 %v5650_v18, %v4585_v19  ;;  %v4265_v61 = vld [vmem:[#allocation8 + $0x278] sm:$0xf0] }
 0x166   :  { %2861 = vmatpush.bf16.msrb.mxu0 %v4028_v16  ;;  %2837 = vmatpush.bf16.msra.mxu2 %v4888_v22  ;;  %v4457_v16 = vld [vmem:[#allocation8 + $0x3f8] sm:$0xf0]  ;;  %v5546_v22 = vld [vmem:[#allocation8 + $0x1ac] sm:$0xf]  ;;  %v3964_v24 = vor.u32 %v5494_v13, %v3961_v14  ;;  %v4268_v3 = vor.u32 %v5570_v60, %v4265_v61 }
 0x167   :  { %v4172_v36 = vor.u32 %v5546_v22, %v4169_v23  ;;  %v5534_v4 = vld [vmem:[#allocation8 + $0x14c] sm:$0xf]  ;;  %v4521_v19 = vld [vmem:[#allocation8 + $0x478] sm:$0xf0] }
 0x168   :  { %2825 = vmatpush.bf16.msra.mxu1 %v4744_v38  ;;  %v4569_v38 = vld [vmem:[#allocation8 + $0x4d8] sm:$0xf0]  ;;  %v5634_v18 = vld [vmem:[#allocation8 + $0x46c] sm:$0xf] }
 0x169   :  { %2849 = vmatpush.bf16.msra.mxu3 %v5032_v25  ;;  %v4460_v25 = vor.u32 %v5618_v15, %v4457_v16  ;;  %v4572_v48 = vor.u32 %v5646_v37, %v4569_v38  ;;  %v5602_v15 = vld [vmem:[#allocation8 + $0x36c] sm:$0xf]  ;;  %v4393_v16 = vld [vmem:[#allocation8 + $0x378] sm:$0xf0]  ;;  %v4524_v28 = vor.u32 %v5634_v18, %v4521_v19 }
 0x16a   :  { %2862 = vmatpush.bf16.msrb.mxu0 %v4012_v33  ;;  %2838 = vmatpush.bf16.msra.mxu2 %v4872_v44  ;;  %v5614_v33 = vld [vmem:[#allocation8 + $0x3cc] sm:$0xf]  ;;  %v4105_v22 = vld [vmem:[#allocation8 + $0x138] sm:$0xf0]  ;;  %v4396_v23 = vor.u32 %v5602_v15, %v4393_v16 }
 0x16b   :  { %v4444_v43 = vor.u32 %v5614_v33, %v4441_v35  ;;  %v5574_v44 = vld [vmem:[#allocation8 + $0x28c] sm:$0xf]  ;;  %v4377_v33 = vld [vmem:[#allocation8 + $0x358] sm:$0xf0] }
 0x16c   :  { %2826 = vmatpush.bf16.msra.mxu1 %v4728_v59  ;;  %v2568_v46 = vpop.f32.mrf.mxu1  ;;  %v4284_v56 = vor.u32 %v5574_v44, %v4281_v45  ;;  %v5630_v37 = vld [vmem:[#allocation8 + $0x44c] sm:$0xf]  ;;  %v4505_v38 = vld [vmem:[#allocation8 + $0x458] sm:$0xf0] }
 0x16d   :  { %2850 = vmatpush.bf16.msra.mxu3 %v5016_v49  ;;  %v4425_v49 = vld [vmem:[#allocation8 + $0x3b8] sm:$0xf0]  ;;  %v2569_v51 = vadd.f32 %v2568_v46, %v6295_v54  ;;  %v5638_v54 = vld [vmem:[#allocation8 + $0x48c] sm:$0xf] }
 0x16e   :  { %2863 = vmatpush.bf16.msrb.mxu0 %v3996_v55  ;;  %2839 = vmatpush.bf16.msra.mxu2 %v4856_v62  ;;  %v4553_v55 = vld [vmem:[#allocation8 + $0x4b8] sm:$0xf0]  ;;  %v4428_v59 = vor.u32 %v5610_v27, %v4425_v49  ;;  %v5558_v44 = vld [vmem:[#allocation8 + $0x20c] sm:$0xf] }
 0x16f   :  { %2827 = vmatmul.bf16.vlgmr.msra.gmra.mxu1 %v6268_v50  ;;  %v4556_v62 = vor.u32 %v5642_v53, %v4553_v55  ;;  %v4217_v45 = vld [vmem:[#allocation8 + $0x218] sm:$0xf0]  ;;  %v5682_v27 = vld [vmem:[#allocation8 + $0x5ec] sm:$0xf]  ;;  %v4508_v53 = vor.u32 %v5630_v37, %v4505_v38 }
 0x170   :  { %2871 = vmatpush.bf16.msrb.mxu1 %v4204_v63  ;;  %v5606_v63 = vld [vmem:[#allocation8 + $0x38c] sm:$0xf]  ;;  %v4713_v49 = vld [vmem:[#allocation8 + $0x5f8] sm:$0xf0] }
 0x171   :  { %2851 = vmatpush.bf16.msra.mxu3 %v5000_v2  ;;  %2840 = vmatmul.bf16.vlgmr.msra.gmra.mxu2 %v6270_v6  ;;  %v4537_v2 = vld [vmem:[#allocation8 + $0x498] sm:$0xf0]  ;;  %v4412_v8 = vor.u32 %v5606_v63, %v4409_v0  ;;  %v5626_v60 = vld [vmem:[#allocation8 + $0x42c] sm:$0xf]  ;;  %v4716_v63 = vor.u32 %v5682_v27, %v4713_v49 }
 0x172   :  { %2884 = vmatpush.bf16.msrb.mxu2 %v4332_v1  ;;  %2864 = vmatpush.bf16.msrb.mxu0 %v3980_v9  ;;  %v4140_v1 = vor.u32 %v5538_v57, %v4137_v58  ;;  %v5566_v9 = vld [vmem:[#allocation8 + $0x24c] sm:$0xf]  ;;  %v4540_v14 = vor.u32 %v5638_v54, %v4537_v2  ;;  %v4841_v55 = vld [vmem:[#allocation8 + $0x6f8] sm:$0xf0] }
 0x173   :  { %v2581_v7 = vpop.f32.mrf.mxu2  ;;  %v4361_v57 = vld [vmem:[#allocation8 + $0x338] sm:$0xf0]  ;;  %v5678_v0 = vld [vmem:[#allocation8 + $0x5cc] sm:$0xf] }
 0x174   :  { %2872 = vmatpush.bf16.msrb.mxu1 %v4188_v17  ;;  %v2607_v12 = vpop.f32.mrf.mxu0  ;;  %v2570_v13 = vpop.f32.mrf.mxu1  ;;  %v2582_v26 = vadd.f32 %v2581_v7, %v2569_v51  ;;  %v5714_v51 = vld [vmem:[#allocation8 + $0x6ec] sm:$0xf]  ;;  %v4489_v61 = vld [vmem:[#allocation8 + $0x438] sm:$0xf0] }
 0x175   :  { %2852 = vmatpush.bf16.msra.mxu3 %v4984_v21  ;;  %v5530_v21 = vld [vmem:[#allocation8 + $0x12c] sm:$0xf]  ;;  %v4697_v2 = vld [vmem:[#allocation8 + $0x5d8] sm:$0xf0] }
 0x176   :  { %2885 = vmatpush.bf16.msrb.mxu2 %v4316_v20  ;;  %2865 = vmatpush.bf16.msrb.mxu0 %v3964_v24  ;;  %v4252_v20 = vor.u32 %v5566_v9, %v4249_v10  ;;  %v5562_v24 = vld [vmem:[#allocation8 + $0x22c] sm:$0xf]  ;;  %v4700_v15 = vor.u32 %v5678_v0, %v4697_v2  ;;  %v5081_v38 = vld [vmem:[#allocation8 + $0x8d8] sm:$0xf0] }
 0x177   :  { %v5590_v7 = vld [vmem:[#allocation8 + $0x30c] sm:$0xf]  ;;  %v4937_v27 = vld [vmem:[#allocation8 + $0x7b8] sm:$0xf0] }
 0x178   :  { %2853 = vmatmul.bf16.vlgmr.msra.gmra.mxu3 %v6277_v30  ;;  %2873 = vmatpush.bf16.msrb.mxu1 %v4172_v36  ;;  %v4108_v36 = vor.u32 %v5530_v21, %v4105_v22  ;;  %v5622_v9 = vld [vmem:[#allocation8 + $0x40c] sm:$0xf]  ;;  %v4681_v22 = vld [vmem:[#allocation8 + $0x5b8] sm:$0xf0] }
 0x179   :  { %2897 = vmatpush.bf16.msrb.mxu3 %v4460_v25  ;;  %2866 = vmatmul.bf16.vlgmr.msrb.gmra.mxu0 %v6245_v42  ;;  %v4121_v42 = vld [vmem:[#allocation8 + $0x158] sm:$0xf0]  ;;  %v5746_v13 = vld [vmem:[#allocation8 + $0x7ec] sm:$0xf] }
 0x17a   :  { %2910 = vmatpush.bf16.msra.mxu0 %v4588_v32  ;;  %2886 = vmatpush.bf16.msrb.mxu2 %v4300_v39  ;;  %v4124_v17 = vor.u32 %v5534_v4, %v4121_v42  ;;  %v4233_v25 = vld [vmem:[#allocation8 + $0x238] sm:$0xf0]  ;;  %v5598_v32 = vld [vmem:[#allocation8 + $0x34c] sm:$0xf]  ;;  %v2594_v35 = vpop.f32.mrf.mxu3  ;;  %v4492_v42 = vor.u32 %v5626_v60, %v4489_v61 }
 0x17b   :  { %v5526_v39 = vld [vmem:[#allocation8 + $0x10c] sm:$0xf]  ;;  %v2595_v40 = vadd.f32 %v2594_v35, %v2582_v26  ;;  %v4236_v41 = vor.u32 %v5562_v24, %v4233_v25  ;;  %v2583_v46 = vpop.f32.mrf.mxu2  ;;  %v4825_v4 = vld [vmem:[#allocation8 + $0x6d8] sm:$0xf0] }
 0x17c   :  { %2874 = vmatpush.bf16.msrb.mxu1 %v4156_v52  ;;  %v2609_v52 = vpop.f32.mrf.mxu0  ;;  %v5778_v16 = vld [vmem:[#allocation8 + $0x8ec] sm:$0xf]  ;;  %v4953_v35 = vld [vmem:[#allocation8 + $0x7d8] sm:$0xf0] }
 0x17d   :  { %2898 = vmatpush.bf16.msrb.mxu3 %v4444_v43  ;;  %v4089_v43 = vld [vmem:[#allocation8 + $0x118] sm:$0xf0]  ;;  %v6302_v58 = vadd.f32 %v2607_v12, %v2595_v40  ;;  %v5674_v21 = vld [vmem:[#allocation8 + $0x5ac] sm:$0xf] }
 0x17e   :  { %2911 = vmatpush.bf16.msra.mxu0 %v4572_v48  ;;  %2887 = vmatpush.bf16.msrb.mxu2 %v4284_v56  ;;  %v4380_v48 = vor.u32 %v5598_v32, %v4377_v33  ;;  %v5594_v56 = vld [vmem:[#allocation8 + $0x32c] sm:$0xf]  ;;  %v4473_v12 = vld [vmem:[#allocation8 + $0x418] sm:$0xf0] }
 0x17f   :  { %v4364_v54 = vor.u32 %v5594_v56, %v4361_v57  ;;  %v4476_v24 = vor.u32 %v5622_v9, %v4473_v12  ;;  %v5706_v26 = vld [vmem:[#allocation8 + $0x6ac] sm:$0xf]  ;;  %v5065_v52 = vld [vmem:[#allocation8 + $0x8b8] sm:$0xf0] }
 0x180   :  { %2875 = vmatpush.bf16.msrb.mxu1 %v4140_v1  ;;  %v4844_v1 = vor.u32 %v5714_v51, %v4841_v55  ;;  %v5742_v33 = vld [vmem:[#allocation8 + $0x7cc] sm:$0xf]  ;;  %v4649_v57 = vld [vmem:[#allocation8 + $0x578] sm:$0xf0] }
 0x181   :  { %2899 = vmatpush.bf16.msrb.mxu3 %v4428_v59  ;;  %v4092_v59 = vor.u32 %v5526_v39, %v4089_v43  ;;  %v5774_v37 = vld [vmem:[#allocation8 + $0x8cc] sm:$0xf]  ;;  %v5049_v2 = vld [vmem:[#allocation8 + $0x898] sm:$0xf0] }
 0x182   :  { %2912 = vmatpush.bf16.msra.mxu0 %v4556_v62  ;;  %2888 = vmatpush.bf16.msrb.mxu2 %v4268_v3  ;;  %v4220_v62 = vor.u32 %v5558_v44, %v4217_v45  ;;  %v5710_v3 = vld [vmem:[#allocation8 + $0x6cc] sm:$0xf]  ;;  %v2596_v10 = vpop.f32.mrf.mxu3  ;;  %v4793_v44 = vld [vmem:[#allocation8 + $0x698] sm:$0xf0]  ;;  %v5084_v46 = vor.u32 %v5774_v37, %v5081_v38 }
 0x183   :  { %v6304_v18 = vpop.f32.mrf.mxu2  ;;  %v4828_v19 = vor.u32 %v5710_v3, %v4825_v4  ;;  %v5670_v40 = vld [vmem:[#allocation8 + $0x58c] sm:$0xf]  ;;  %v4633_v4 = vld [vmem:[#allocation8 + $0x558] sm:$0xf0] }
 0x184   :  { %2876 = vmatpush.bf16.msrb.mxu1 %v4124_v17  ;;  %v5097_v17 = vld [vmem:[#allocation8 + $0x8f8] sm:$0xf0]  ;;  %v5702_v43 = vld [vmem:[#allocation8 + $0x68c] sm:$0xf] }
 0x185   :  { %2900 = vmatpush.bf16.msrb.mxu3 %v4412_v8  ;;  %v4345_v8 = vld [vmem:[#allocation8 + $0x318] sm:$0xf0]  ;;  %v5100_v32 = vor.u32 %v5778_v16, %v5097_v17  ;;  %v5770_v51 = vld [vmem:[#allocation8 + $0x8ac] sm:$0xf]  ;;  %v4796_v55 = vor.u32 %v5702_v43, %v4793_v44 }
 0x186   :  { %2913 = vmatpush.bf16.msra.mxu0 %v4540_v14  ;;  %2889 = vmatpush.bf16.msrb.mxu2 %v4252_v20  ;;  %v4969_v14 = vld [vmem:[#allocation8 + $0x7f8] sm:$0xf0]  ;;  %v4348_v20 = vor.u32 %v5590_v7, %v4345_v8  ;;  %v5666_v56 = vld [vmem:[#allocation8 + $0x56c] sm:$0xf] }
 0x187   :  { %v4972_v25 = vor.u32 %v5746_v13, %v4969_v14  ;;  %v5698_v61 = vld [vmem:[#allocation8 + $0x66c] sm:$0xf]  ;;  %v4761_v8 = vld [vmem:[#allocation8 + $0x658] sm:$0xf0] }
 0x188   :  { %2877 = vmatpush.bf16.msrb.mxu1 %v4108_v36  ;;  %v4684_v36 = vor.u32 %v5674_v21, %v4681_v22  ;;  %v5734_v0 = vld [vmem:[#allocation8 + $0x78c] sm:$0xf]  ;;  %v4905_v14 = vld [vmem:[#allocation8 + $0x778] sm:$0xf0] }
 0x189   :  { %2901 = vmatpush.bf16.msrb.mxu3 %v4396_v23  ;;  %v6306_v23 = vpop.f32.mrf.mxu0  ;;  %v5662_v3 = vld [vmem:[#allocation8 + $0x54c] sm:$0xf]  ;;  %v5033_v17 = vld [vmem:[#allocation8 + $0x878] sm:$0xf0] }
 0x18a   :  { %2914 = vmatpush.bf16.msra.mxu0 %v4524_v28  ;;  %2890 = vmatpush.bf16.msrb.mxu2 %v4236_v41  ;;  %v4809_v28 = vld [vmem:[#allocation8 + $0x6b8] sm:$0xf0]  ;;  %v6310_v45 = vpop.f32.mrf.mxu3  ;;  %v5694_v7 = vld [vmem:[#allocation8 + $0x64c] sm:$0xf] }
 0x18b   :  { %v4812_v39 = vor.u32 %v5706_v26, %v4809_v28  ;;  %v4665_v41 = vld [vmem:[#allocation8 + $0x598] sm:$0xf0]  ;;  %v5730_v13 = vld [vmem:[#allocation8 + $0x76c] sm:$0xf] }
 0x18c   :  { %2878 = vmatpush.bf16.msrb.mxu1 %v4092_v59  ;;  %v4668_v49 = vor.u32 %v5670_v40, %v4665_v41  ;;  %v5762_v16 = vld [vmem:[#allocation8 + $0x86c] sm:$0xf]  ;;  %v4617_v22 = vld [vmem:[#allocation8 + $0x538] sm:$0xf0] }
 0x18d   :  { %2902 = vmatpush.bf16.msrb.mxu3 %v4380_v48  ;;  %v5738_v48 = vld [vmem:[#allocation8 + $0x7ac] sm:$0xf]  ;;  %v4745_v28 = vld [vmem:[#allocation8 + $0x638] sm:$0xf0] }
 0x18e   :  { %2915 = vmatpush.bf16.msra.mxu0 %v4508_v53  ;;  %2891 = vmatpush.bf16.msrb.mxu2 %v4220_v62  ;;  %v2635_v53 = vpop.f32.mrf.mxu2  ;;  %v4940_v60 = vor.u32 %v5738_v48, %v4937_v27  ;;  %v4777_v62 = vld [vmem:[#allocation8 + $0x678] sm:$0xf0]  ;;  %v5658_v21 = vld [vmem:[#allocation8 + $0x52c] sm:$0xf]  ;;  %v5159_v48 = vld [vmem:[#allocation11 + $0x70] sm:$0xf] }
 0x18f   :  { %2879 = vmatmul.bf16.vlgmr.msrb.gmra.mxu1 %v6248_v47  ;;  %v4956_v47 = vor.u32 %v5742_v33, %v4953_v35  ;;  %v5690_v26 = vld [vmem:[#allocation8 + $0x62c] sm:$0xf]  ;;  %v5036_v33 = vor.u32 %v5762_v16, %v5033_v17  ;;  %v4620_v37 = vor.u32 %v5658_v21, %v4617_v22  ;;  %v4729_v44 = vld [vmem:[#allocation8 + $0x618] sm:$0xf0]  ;;  %v5143_v16 = vld [vmem:[#allocation11 + $0x50] sm:$0xf] }
 0x190   :  { %2923 = vmatpush.bf16.msra.mxu1 %v4716_v63  ;;  %v5068_v63 = vor.u32 %v5770_v51, %v5065_v52  ;;  %v5726_v35 = vld [vmem:[#allocation8 + $0x74c] sm:$0xf]  ;;  %v4748_v41 = vor.u32 %v5690_v26, %v4745_v28  ;;  %v5796_v27 = vld [vmem:[#allocation11 + $0x74] sm:$0xf0]  ;;  %v5207_v21 = vld [vmem:[#allocation11 + $0xd0] sm:$0xf] }
 0x191   :  { %2903 = vmatpush.bf16.msrb.mxu3 %v4364_v54  ;;  %2892 = vmatmul.bf16.vlgmr.msrb.gmra.mxu2 %v6252_v5  ;;  %v6312_v5 = vpop.f32.mrf.mxu1  ;;  %v2661_v59 = vpop.f32.mrf.mxu0  ;;  %v5766_v54 = vld [vmem:[#allocation8 + $0x88c] sm:$0xf]  ;;  %v5812_v52 = vld [vmem:[#allocation11 + $0xf4] sm:$0xf0] }
 0x192   :  { %2936 = vmatpush.bf16.msra.mxu2 %v4844_v1  ;;  %2916 = vmatpush.bf16.msra.mxu0 %v4492_v42  ;;  %v4652_v1 = vor.u32 %v5666_v56, %v4649_v57  ;;  %v2648_v9 = vpop.f32.mrf.mxu3  ;;  %v5052_v12 = vor.u32 %v5766_v54, %v5049_v2  ;;  %v5758_v38 = vld [vmem:[#allocation8 + $0x84c] sm:$0xf]  ;;  %v5151_v54 = vld [vmem:[#allocation11 + $0x60] sm:$0xf]  ;;  %v5792_v17 = vld [vmem:[#allocation11 + $0x54] sm:$0xf0] }
 0x193   :  { %v5654_v40 = vld [vmem:[#allocation8 + $0x50c] sm:$0xf]  ;;  %v5808_v22 = vld [vmem:[#allocation11 + $0xd4] sm:$0xf0]  ;;  %v5144_v26 = vor.u32 %v5792_v17, %v5143_v16  ;;  %v5811_v17 = vld [vmem:[#allocation11 + $0xf4] sm:$0xf] }
 0x194   :  { %2924 = vmatpush.bf16.msra.mxu1 %v4700_v15  ;;  %v4636_v15 = vor.u32 %v5662_v3, %v4633_v4  ;;  %v5686_v43 = vld [vmem:[#allocation8 + $0x60c] sm:$0xf]  ;;  %v5208_v28 = vor.u32 %v5808_v22, %v5207_v21 }
 0x195   :  { %2904 = vmatpush.bf16.msrb.mxu3 %v4348_v20  ;;  %v4764_v20 = vor.u32 %v5694_v7, %v4761_v8  ;;  %v5722_v53 = vld [vmem:[#allocation8 + $0x72c] sm:$0xf]  ;;  %v4857_v8 = vld [vmem:[#allocation8 + $0x718] sm:$0xf0] }
 0x196   :  { %2937 = vmatpush.bf16.msra.mxu2 %v4828_v19  ;;  %2917 = vmatpush.bf16.msra.mxu0 %v4476_v24  ;;  %v6316_v19 = vpop.f32.mrf.mxu2  ;;  %v5754_v59 = vld [vmem:[#allocation8 + $0x82c] sm:$0xf] }
 0x197   :  { %v5794_v2 = vld [vmem:[#allocation11 + $0x64] sm:$0xf0] }
 0x198   :  { %2905 = vmatmul.bf16.vlgmr.msrb.gmra.mxu3 %v6254_v11  ;;  %2925 = vmatpush.bf16.msra.mxu1 %v4684_v36  ;;  %v4921_v11 = vld [vmem:[#allocation8 + $0x798] sm:$0xf0]  ;;  %v5718_v7 = vld [vmem:[#allocation8 + $0x70c] sm:$0xf] }
 0x199   :  { %2949 = vmatpush.bf16.msra.mxu3 %v4972_v25  ;;  %2918 = vmatmul.bf16.vlgmr.msra.gmra.mxu0 %v6261_v31  ;;  %v4780_v31 = vor.u32 %v5698_v61, %v4777_v62  ;;  %v4924_v42 = vor.u32 %v5734_v0, %v4921_v11  ;;  %v2622_v10 = vpop.f32.mrf.mxu1  ;;  %v6318_v24 = vpop.f32.mrf.mxu0  ;;  %v4908_v25 = vor.u32 %v5730_v13, %v4905_v14  ;;  %v4889_v36 = vld [vmem:[#allocation8 + $0x758] sm:$0xf0]  ;;  %v5750_v9 = vld [vmem:[#allocation8 + $0x80c] sm:$0xf] }
 0x19a   :  { %2962 = vmatpush.bf16.msrb.mxu0 %v5100_v32  ;;  %2938 = vmatpush.bf16.msra.mxu2 %v4812_v39  ;;  %v1060_v32 = vperm.slane %v6290_v29, 1  ;;  %v5017_v39 = vld [vmem:[#allocation8 + $0x858] sm:$0xf0]  ;;  %v4732_v62 = vor.u32 %v5686_v43, %v4729_v44  ;;  %v5152_v13 = vor.u32 %v5794_v2, %v5151_v54 }
 0x19b   :  { %v5020_v51 = vor.u32 %v5758_v38, %v5017_v39  ;;  %v6321_v56 = vpop.f32.mrf.mxu3  ;;  %v4985_v10 = vld [vmem:[#allocation8 + $0x818] sm:$0xf0]  ;;  %v5191_v39 = vld [vmem:[#allocation11 + $0xb0] sm:$0xf] }
 0x19c   :  { %2926 = vmatpush.bf16.msra.mxu1 %v4668_v49  ;;  %v5223_v49 = vld [vmem:[#allocation11 + $0xf0] sm:$0xf]  ;;  %v2634_v3 = vadd.f32 %v6304_v18, %v1060_v32  ;;  %v5135_v32 = vld [vmem:[#allocation11 + $0x40] sm:$0xf]  ;;  %v5788_v38 = vld [vmem:[#allocation11 + $0x34] sm:$0xf0] }
 0x19d   :  { %2950 = vmatpush.bf16.msra.mxu3 %v4956_v47  ;;  %v4601_v47 = vld [vmem:[#allocation8 + $0x518] sm:$0xf0]  ;;  %v5224_v11 = vor.u32 %v5812_v52, %v5223_v49  ;;  %v5786_v49 = vld [vmem:[#allocation11 + $0x24] sm:$0xf0]  ;;  %v5279_v52 = vld [vmem:[#allocation11 + $0x160] sm:$0xf] }
 0x19e   :  { %2963 = vmatpush.bf16.msrb.mxu0 %v5084_v46  ;;  %2939 = vmatpush.bf16.msra.mxu2 %v4796_v55  ;;  %v4892_v46 = vor.u32 %v5726_v35, %v4889_v36  ;;  %v4873_v55 = vld [vmem:[#allocation8 + $0x738] sm:$0xf0]  ;;  %v4604_v57 = vor.u32 %v5654_v40, %v4601_v47  ;;  %v2687_v61 = vpop.f32.mrf.mxu2  ;;  %v5199_v36 = vld [vmem:[#allocation11 + $0xc0] sm:$0xf]  ;;  %v5287_v47 = vld [vmem:[#allocation11 + $0x170] sm:$0xf] }
 0x19f   :  { %v5828_v43 = vld [vmem:[#allocation11 + $0x174] sm:$0xf0] }
 0x1a0   :  { %2927 = vmatpush.bf16.msra.mxu1 %v4652_v1  ;;  %v4876_v1 = vor.u32 %v5722_v53, %v4873_v55  ;;  %v5288_v44 = vor.u32 %v5828_v43, %v5287_v47  ;;  %v5826_v53 = vld [vmem:[#allocation11 + $0x164] sm:$0xf0]  ;;  %v5784_v61 = vld [vmem:[#allocation11 + $0x14] sm:$0xf0]  ;;  %v5791_v43 = vld [vmem:[#allocation11 + $0x54] sm:$0xf] }
 0x1a1   :  { %2951 = vmatpush.bf16.msra.mxu3 %v4940_v60  ;;  %v2672_v29 = vpop.f32.mrf.mxu1  ;;  %v5001_v60 = vld [vmem:[#allocation8 + $0x838] sm:$0xf0]  ;;  %v2713_v0 = vpop.f32.mrf.mxu0  ;;  %v5280_v55 = vor.u32 %v5826_v53, %v5279_v52  ;;  %v5789_v52 = vld [vmem:[#allocation11 + $0x44] sm:$0xf]  ;;  %v5137_v53 = vld [vmem:[#allocation11 + $0x48] sm:$0xf0] }
 0x1a2   :  { %2964 = vmatpush.bf16.msrb.mxu0 %v5068_v63  ;;  %2940 = vmatpush.bf16.msra.mxu2 %v4780_v31  ;;  %v5160_v63 = vor.u32 %v5796_v27, %v5159_v48  ;;  %v5215_v31 = vld [vmem:[#allocation11 + $0xe0] sm:$0xf]  ;;  %v5004_v4 = vor.u32 %v5754_v59, %v5001_v60  ;;  %v5111_v60 = vld [vmem:[#allocation11 + $0x10] sm:$0xf] }
 0x1a3   :  { %v5119_v27 = vld [vmem:[#allocation11 + $0x20] sm:$0xf] }
 0x1a4   :  { %2928 = vmatpush.bf16.msra.mxu1 %v4636_v15  ;;  %v4860_v15 = vor.u32 %v5718_v7, %v4857_v8  ;;  %v2621_v7 = vadd.f32 %v6312_v5, %v6302_v58 }
 0x1a5   :  { %2952 = vmatpush.bf16.msra.mxu3 %v4924_v42  ;;  %v5810_v42 = vld [vmem:[#allocation11 + $0xe4] sm:$0xf0] }
 0x1a6   :  { %2965 = vmatpush.bf16.msrb.mxu0 %v5052_v12  ;;  %2941 = vmatpush.bf16.msra.mxu2 %v4764_v20  ;;  %v2647_v12 = vadd.f32 %v6310_v45, %v2634_v3  ;;  %v5216_v14 = vor.u32 %v5810_v42, %v5215_v31  ;;  %v4988_v20 = vor.u32 %v5750_v9, %v4985_v10  ;;  %v5782_v42 = vld [vmem:[#allocation11 + $0x4] sm:$0xf0]  ;;  %v5167_v9 = vld [vmem:[#allocation11 + $0x80] sm:$0xf]  ;;  %v2975_v22 = vmax.f32 %v2621_v7, 0.0 }
 0x1a7   :  { %v5112_v3 = vor.u32 %v5784_v61, %v5111_v60  ;;  %v5798_v10 = vld [vmem:[#allocation11 + $0x84] sm:$0xf0]  ;;  %v5787_v60 = vld [vmem:[#allocation11 + $0x34] sm:$0xf]  ;;  %v5129_v61 = vld [vmem:[#allocation11 + $0x38] sm:$0xf0] }
 0x1a8   :  { %2929 = vmatpush.bf16.msra.mxu1 %v4620_v37  ;;  %v2660_v45 = vadd.f32 %v6306_v23, %v2647_v12  ;;  %v5127_v23 = vld [vmem:[#allocation11 + $0x30] sm:$0xf]  ;;  %v5168_v5 = vor.u32 %v5798_v10, %v5167_v9  ;;  %v5121_v9 = vld [vmem:[#allocation11 + $0x28] sm:$0xf0]  ;;  %v5801_v10 = vld [vmem:[#allocation11 + $0xa4] sm:$0xf] }
 0x1a9   :  { %2953 = vmatpush.bf16.msra.mxu3 %v4908_v25  ;;  %v2674_v18 = vpop.f32.mrf.mxu1  ;;  %v2700_v25 = vpop.f32.mrf.mxu3  ;;  %v5128_v48 = vor.u32 %v5788_v38, %v5127_v23  ;;  %v6339_v23 = vpack.c.bf16 %v2975_v22, %v2975_v22 }
 0x1aa   :  { %2966 = vmatpush.bf16.msrb.mxu0 %v5036_v33  ;;  %2942 = vmatpush.bf16.msra.mxu2 %v4748_v41  ;;  %v5790_v33 = vld [vmem:[#allocation11 + $0x44] sm:$0xf0]  ;;  %v2673_v35 = vadd.f32 %v2672_v29, %v2660_v45  ;;  %v5804_v41 = vld [vmem:[#allocation11 + $0xb4] sm:$0xf0]  ;;  %v5183_v29 = vld [vmem:[#allocation11 + $0xa0] sm:$0xf] }
 0x1ab   :  { %v5136_v37 = vor.u32 %v5790_v33, %v5135_v32  ;;  %v5225_v18 = vld [vmem:[#allocation11 + $0xf8] sm:$0xf0]  ;;  %v5793_v45 = vld [vmem:[#allocation11 + $0x64] sm:$0xf] }
 0x1ac   :  { %2930 = vmatpush.bf16.msra.mxu1 %v4604_v57  ;;  %v2686_v40 = vadd.f32 %v6316_v19, %v2673_v35  ;;  %v5120_v19 = vor.u32 %v5786_v49, %v5119_v27  ;;  %v5228_v33 = vor.u32 %v5811_v17, %v5225_v18  ;;  %v5255_v35 = vld [vmem:[#allocation11 + $0x130] sm:$0xf]  ;;  %v5209_v27 = vld [vmem:[#allocation11 + $0xd8] sm:$0xf0]  ;;  %v5783_v18 = vld [vmem:[#allocation11 + $0x14] sm:$0xf] }
 0x1ad   :  { %2954 = vmatpush.bf16.msra.mxu3 %v4892_v46  ;;  %v5239_v49 = vld [vmem:[#allocation11 + $0x110] sm:$0xf] }
 0x1ae   :  { %2967 = vmatpush.bf16.msrb.mxu0 %v5020_v51  ;;  %2943 = vmatpush.bf16.msra.mxu2 %v4732_v62  ;;  %v5802_v51 = vld [vmem:[#allocation11 + $0xa4] sm:$0xf0]  ;;  %v5175_v62 = vld [vmem:[#allocation11 + $0x90] sm:$0xf] }
 0x1af   :  { %2931 = vmatmul.bf16.vlgmr.msra.gmra.mxu1 %v6264_v34  ;;  %v5806_v34 = vld [vmem:[#allocation11 + $0xc4] sm:$0xf0]  ;;  %v5184_v59 = vor.u32 %v5802_v51, %v5183_v29  ;;  %v5816_v29 = vld [vmem:[#allocation11 + $0x114] sm:$0xf0] }
 0x1b0   :  { %3373 = vmatpush.bf16.msrb.mxu1 %v5160_v63 }
 0x1b1   :  { %2955 = vmatpush.bf16.msra.mxu3 %v4876_v1  ;;  %2944 = vmatmul.bf16.vlgmr.msra.gmra.mxu2 %v6268_v50  ;;  %v5200_v50 = vor.u32 %v5806_v34, %v5199_v36  ;;  %v2724_v46 = vpop.f32.mrf.mxu1  ;;  %v5271_v1 = vld [vmem:[#allocation11 + $0x150] sm:$0xf]  ;;  %v5820_v36 = vld [vmem:[#allocation11 + $0x134] sm:$0xf0]  ;;  %v5809_v34 = vld [vmem:[#allocation11 + $0xe4] sm:$0xf] }
 0x1b2   :  { %3386 = vmatpush.bf16.msrb.mxu2 %v5224_v11  ;;  %2968 = vmatpush.bf16.msrb.mxu0 %v5004_v4  ;;  %v5800_v11 = vld [vmem:[#allocation11 + $0x94] sm:$0xf0]  ;;  %v5103_v4 = vld [vmem:[#allocation11] sm:$0xf] }
 0x1b3   :  { %v2737_v57 = vpop.f32.mrf.mxu2  ;;  %v5176_v8 = vor.u32 %v5800_v11, %v5175_v62  ;;  %v5104_v21 = vor.u32 %v5782_v42, %v5103_v4  ;;  %v5814_v11 = vld [vmem:[#allocation11 + $0x104] sm:$0xf0]  ;;  %v5132_v42 = vor.u32 %v5787_v60, %v5129_v61  ;;  %v5813_v61 = vld [vmem:[#allocation11 + $0x104] sm:$0xf] }
 0x1b4   :  { %3374 = vmatpush.bf16.msrb.mxu1 %v5152_v13  ;;  %v5161_v13 = vld [vmem:[#allocation11 + $0x78] sm:$0xf0] }
 0x1b5   :  { %2956 = vmatpush.bf16.msra.mxu3 %v4860_v15  ;;  %v5822_v15 = vld [vmem:[#allocation11 + $0x144] sm:$0xf0] }
 0x1b6   :  { %3387 = vmatpush.bf16.msrb.mxu2 %v5216_v14  ;;  %2969 = vmatpush.bf16.msrb.mxu0 %v4988_v20  ;;  %v6333_v0 = vpop.f32.mrf.mxu0  ;;  %v5263_v14 = vld [vmem:[#allocation11 + $0x140] sm:$0xf] }
 0x1b7   :  { %v5264_v20 = vor.u32 %v5822_v15, %v5263_v14 }
 0x1b8   :  { %2957 = vmatmul.bf16.vlgmr.msra.gmra.mxu3 %v6270_v6  ;;  %3375 = vmatpush.bf16.msrb.mxu1 %v5144_v26  ;;  %v5192_v6 = vor.u32 %v5804_v41, %v5191_v39  ;;  %v5153_v26 = vld [vmem:[#allocation11 + $0x68] sm:$0xf0]  ;;  %v5247_v39 = vld [vmem:[#allocation11 + $0x120] sm:$0xf] }
 0x1b9   :  { %2970 = vmatmul.bf16.vlgmr.msrb.gmra.mxu0 %v6277_v30  ;;  %3399 = vmatpush.bf16.msrb.mxu3 %v5288_v44  ;;  %v2699_v30 = vadd.f32 %v6321_v56, %v2686_v40  ;;  %v5824_v56 = vld [vmem:[#allocation11 + $0x154] sm:$0xf0]  ;;  %v2726_v31 = vpop.f32.mrf.mxu1  ;;  %v5156_v38 = vor.u32 %v5793_v45, %v5153_v26  ;;  %v5818_v40 = vld [vmem:[#allocation11 + $0x124] sm:$0xf0]  ;;  %v5145_v44 = vld [vmem:[#allocation11 + $0x58] sm:$0xf0] }
 0x1ba   :  { %3388 = vmatpush.bf16.msrb.mxu2 %v5208_v28  ;;  %v5272_v54 = vor.u32 %v5824_v56, %v5271_v1  ;;  %v5827_v1 = vld [vmem:[#allocation11 + $0x174] sm:$0xf]  ;;  %v5289_v31 = vld [vmem:[#allocation11 + $0x178] sm:$0xf0] }
 0x1bb   :  { %v2712_v63 = vadd.f32 %v6318_v24, %v2699_v30  ;;  %v5795_v24 = vld [vmem:[#allocation11 + $0x74] sm:$0xf]  ;;  %v6337_v16 = vpop.f32.mrf.mxu3  ;;  %v2739_v58 = vpop.f32.mrf.mxu2  ;;  %v5148_v30 = vor.u32 %v5791_v43, %v5145_v44  ;;  %v5292_v4 = vor.u32 %v5827_v1, %v5289_v31  ;;  %v5273_v45 = vld [vmem:[#allocation11 + $0x158] sm:$0xf0] }
 0x1bc   :  { %3376 = vmatpush.bf16.msrb.mxu1 %v5136_v37  ;;  %v5164_v25 = vor.u32 %v5795_v24, %v5161_v13  ;;  %v5217_v37 = vld [vmem:[#allocation11 + $0xe8] sm:$0xf0]  ;;  %v5803_v56 = vld [vmem:[#allocation11 + $0xb4] sm:$0xf] }
 0x1bd   :  { %3400 = vmatpush.bf16.msrb.mxu3 %v5280_v55  ;;  %v2725_v2 = vadd.f32 %v2724_v46, %v2712_v63  ;;  %v5220_v47 = vor.u32 %v5809_v34, %v5217_v37  ;;  %v5807_v46 = vld [vmem:[#allocation11 + $0xd4] sm:$0xf]  ;;  %v5240_v55 = vor.u32 %v5816_v29, %v5239_v49  ;;  %v5231_v63 = vld [vmem:[#allocation11 + $0x100] sm:$0xf]  ;;  %v5185_v24 = vld [vmem:[#allocation11 + $0xa8] sm:$0xf0] }
 0x1be   :  { %3389 = vmatpush.bf16.msrb.mxu2 %v5200_v50  ;;  %v2765_v32 = vpop.f32.mrf.mxu0  ;;  %v5256_v50 = vor.u32 %v5820_v36, %v5255_v35  ;;  %v5212_v51 = vor.u32 %v5807_v46, %v5209_v27  ;;  %v5281_v13 = vld [vmem:[#allocation11 + $0x168] sm:$0xf0]  ;;  %v5188_v17 = vor.u32 %v5801_v10, %v5185_v24  ;;  %v5781_v35 = vld [vmem:[#allocation11 + $0x4] sm:$0xf]  ;;  %v5840_v10 = vld [vmem:[#allocation11 + $0x1d4] sm:$0xf0] }
 0x1bf   :  { %v2738_v12 = vadd.f32 %v2737_v57, %v2725_v2  ;;  %v5201_v57 = vld [vmem:[#allocation11 + $0xc8] sm:$0xf0]  ;;  %v5232_v2 = vor.u32 %v5814_v11, %v5231_v63  ;;  %v5797_v34 = vld [vmem:[#allocation11 + $0x84] sm:$0xf] }
 0x1c0   :  { %3377 = vmatpush.bf16.msrb.mxu1 %v5128_v48  ;;  %v5248_v48 = vor.u32 %v5818_v40, %v5247_v39  ;;  %v5105_v36 = vld [vmem:[#allocation11 + $0x8] sm:$0xf0]  ;;  %v5817_v49 = vld [vmem:[#allocation11 + $0x124] sm:$0xf] }
 0x1c1   :  { %3401 = vmatpush.bf16.msrb.mxu3 %v5272_v54  ;;  %v2976_v28 = vmax.f32 %v2738_v12, 0.0  ;;  %v5193_v54 = vld [vmem:[#allocation11 + $0xb8] sm:$0xf0]  ;;  %v5825_v12 = vld [vmem:[#allocation11 + $0x164] sm:$0xf] }
 0x1c2   :  { %3390 = vmatpush.bf16.msrb.mxu2 %v5192_v6  ;;  %v5196_v7 = vor.u32 %v5803_v56, %v5193_v54  ;;  %v5284_v14 = vor.u32 %v5825_v12, %v5281_v13  ;;  %v5169_v37 = vld [vmem:[#allocation11 + $0x88] sm:$0xf0]  ;;  %v5351_v54 = vld [vmem:[#allocation11 + $0x1f0] sm:$0xf] }
 0x1c3   :  { %v6341_v41 = vpack.c.bf16 %v2976_v28, %v2976_v28  ;;  %v2752_v6 = vpop.f32.mrf.mxu3  ;;  %v5172_v43 = vor.u32 %v5797_v34, %v5169_v37  ;;  %v5249_v29 = vld [vmem:[#allocation11 + $0x128] sm:$0xf0]  ;;  %v5295_v37 = vld [vmem:[#allocation11 + $0x180] sm:$0xf] }
 0x1c4   :  { %3378 = vmatpush.bf16.msrb.mxu1 %v5120_v19  ;;  %v5805_v19 = vld [vmem:[#allocation11 + $0xc4] sm:$0xf]  ;;  %v5257_v6 = vld [vmem:[#allocation11 + $0x138] sm:$0xf0] }
 0x1c5   :  { %3402 = vmatpush.bf16.msrb.mxu3 %v5264_v20  ;;  %v5204_v62 = vor.u32 %v5805_v19, %v5201_v57  ;;  %v5113_v20 = vld [vmem:[#allocation11 + $0x18] sm:$0xf0] }
 0x1c6   :  { %3391 = vmatpush.bf16.msrb.mxu2 %v5184_v59  ;;  %v5140_v59 = vor.u32 %v5789_v52, %v5137_v53  ;;  %v5116_v32 = vor.u32 %v5783_v18, %v5113_v20  ;;  %v5252_v52 = vor.u32 %v5817_v49, %v5249_v29  ;;  %v5241_v19 = vld [vmem:[#allocation11 + $0x118] sm:$0xf0]  ;;  %v5839_v29 = vld [vmem:[#allocation11 + $0x1d4] sm:$0xf] }
 0x1c8   :  { %3379 = vmatpush.bf16.msrb.mxu1 %v5112_v3 }
 0x1c9   :  { %3403 = vmatpush.bf16.msrb.mxu3 %v5256_v50  ;;  %v5821_v50 = vld [vmem:[#allocation11 + $0x144] sm:$0xf] }
 0x1ca   :  { %3392 = vmatpush.bf16.msrb.mxu2 %v5176_v8  ;;  %v5785_v8 = vld [vmem:[#allocation11 + $0x24] sm:$0xf] }
 0x1cb   :  { %v5124_v15 = vor.u32 %v5785_v8, %v5121_v9  ;;  %v5335_v9 = vld [vmem:[#allocation11 + $0x1d0] sm:$0xf] }
 0x1cc   :  { %3380 = vmatpush.bf16.msrb.mxu1 %v5104_v21  ;;  %v6345_v3 = vpop.f32.mrf.mxu1  ;;  %v5799_v21 = vld [vmem:[#allocation11 + $0x94] sm:$0xf]  ;;  %v5336_v24 = vor.u32 %v5840_v10, %v5335_v9 }
 0x1cd   :  { %3404 = vmatpush.bf16.msrb.mxu3 %v5248_v48  ;;  %v5819_v48 = vld [vmem:[#allocation11 + $0x134] sm:$0xf] }
 0x1ce   :  { %3393 = vmatpush.bf16.msrb.mxu2 %v5168_v5  ;;  %v5177_v5 = vld [vmem:[#allocation11 + $0x98] sm:$0xf0]  ;;  %v5260_v27 = vor.u32 %v5819_v48, %v5257_v6 }
 0x1cf   :  { %3381 = vmatmul.bf16.vlgmr.msrb.gmra.mxu1 %v6339_v23 }
 0x1d0   :  { %3425 = vmatpush.bf16.msra.mxu1 %v5164_v25  ;;  %v5823_v25 = vld [vmem:[#allocation11 + $0x154] sm:$0xf] }
 0x1d1   :  { %3394 = vmatmul.bf16.vlgmr.msrb.gmra.mxu2 %v6341_v41  ;;  %3405 = vmatpush.bf16.msrb.mxu3 %v5240_v55  ;;  %v5276_v28 = vor.u32 %v5823_v25, %v5273_v45  ;;  %v5815_v55 = vld [vmem:[#allocation11 + $0x114] sm:$0xf]  ;;  %v5836_v25 = vld [vmem:[#allocation11 + $0x1b4] sm:$0xf0]  ;;  %v5311_v45 = vld [vmem:[#allocation11 + $0x1a0] sm:$0xf] }
 0x1d2   :  { %3438 = vmatpush.bf16.msra.mxu2 %v5228_v33  ;;  %v5180_v33 = vor.u32 %v5799_v21, %v5177_v5  ;;  %v5319_v5 = vld [vmem:[#allocation11 + $0x1b0] sm:$0xf] }
 0x1d4   :  { %3426 = vmatpush.bf16.msra.mxu1 %v5156_v38  ;;  %v2789_v22 = vpop.f32.mrf.mxu2  ;;  %v2778_v26 = vpop.f32.mrf.mxu1  ;;  %v5265_v38 = vld [vmem:[#allocation11 + $0x148] sm:$0xf0] }
 0x1d5   :  { %3406 = vmatpush.bf16.msrb.mxu3 %v5232_v2  ;;  %v5268_v40 = vor.u32 %v5821_v50, %v5265_v38  ;;  %v5320_v26 = vor.u32 %v5836_v25, %v5319_v5  ;;  %v5830_v50 = vld [vmem:[#allocation11 + $0x184] sm:$0xf0]  ;;  %v3047_v25 = vld [vmem:[#allocation13] sm:$0x3] }
 0x1d6   :  { %3439 = vmatpush.bf16.msra.mxu2 %v5220_v47  ;;  %v6347_v58 = vpop.f32.mrf.mxu0  ;;  %v5108_v47 = vor.u32 %v5781_v35, %v5105_v36  ;;  %v5303_v35 = vld [vmem:[#allocation11 + $0x190] sm:$0xf]  ;;  %v5832_v36 = vld [vmem:[#allocation11 + $0x194] sm:$0xf0]  ;;  %v5296_v38 = vor.u32 %v5830_v50, %v5295_v37  ;;  %v3050_v37 = vperm.slane %v3047_v25, 1 }
 0x1d7   :  { %v5304_v34 = vor.u32 %v5832_v36, %v5303_v35 }
 0x1d8   :  { %3427 = vmatpush.bf16.msra.mxu1 %v5148_v30  ;;  %v6349_v30 = vld [vmem:[#allocation10] sm:$0xf] }
 0x1d9   :  { %3451 = vmatpush.bf16.msra.mxu3 %v5292_v4 }
 0x1da   :  { %3440 = vmatpush.bf16.msra.mxu2 %v5212_v51  ;;  %v1061_v51 = vperm.slane %v6349_v30, 2 }
 0x1db   :  { %v2802_v39 = vpop.f32.mrf.mxu3 }
 0x1dc   :  { %3428 = vmatpush.bf16.msra.mxu1 %v5140_v59  ;;  %v2791_v44 = vpop.f32.mrf.mxu2  ;;  %v2751_v57 = vadd.f32 %v6337_v16, %v1061_v51  ;;  %v5244_v59 = vor.u32 %v5815_v55, %v5241_v19  ;;  %v5842_v16 = vld [vmem:[#allocation11 + $0x1e4] sm:$0xf0]  ;;  %v5337_v51 = vld [vmem:[#allocation11 + $0x1d8] sm:$0xf0]  ;;  %v5837_v55 = vld [vmem:[#allocation11 + $0x1c4] sm:$0xf] }
 0x1dd   :  { %3452 = vmatpush.bf16.msra.mxu3 %v5284_v14  ;;  %v5327_v14 = vld [vmem:[#allocation11 + $0x1c0] sm:$0xf]  ;;  %v5841_v44 = vld [vmem:[#allocation11 + $0x1e4] sm:$0xf]  ;;  %v5329_v19 = vld [vmem:[#allocation11 + $0x1c8] sm:$0xf0] }
 0x1de   :  { %3441 = vmatpush.bf16.msra.mxu2 %v5204_v62  ;;  %v2817_v46 = vpop.f32.mrf.mxu0  ;;  %v2764_v60 = vadd.f32 %v6333_v0, %v2751_v57  ;;  %v5233_v62 = vld [vmem:[#allocation11 + $0x108] sm:$0xf0]  ;;  %v5332_v57 = vor.u32 %v5837_v55, %v5329_v19 }
 0x1df   :  { %v5236_v11 = vor.u32 %v5813_v61, %v5233_v62  ;;  %v5345_v46 = vld [vmem:[#allocation11 + $0x1e8] sm:$0xf0]  ;;  %v5835_v61 = vld [vmem:[#allocation11 + $0x1b4] sm:$0xf]  ;;  %v5321_v62 = vld [vmem:[#allocation11 + $0x1b8] sm:$0xf0] }
 0x1e0   :  { %3429 = vmatpush.bf16.msra.mxu1 %v5132_v42  ;;  %v2777_v63 = vadd.f32 %v6345_v3, %v2764_v60  ;;  %v5348_v48 = vor.u32 %v5841_v44, %v5345_v46  ;;  %v5860_v44 = vld [vmem:[#allocation14 + $0x78] sm:$0xff]  ;;  %v5851_v46 = vld [vmem:[#allocation14 + $0x30] sm:$0xff]  ;;  %v5846_v55 = vld [vmem:[#allocation14 + $0x8] sm:$0xff] }
 0x1e1   :  { %3453 = vmatpush.bf16.msra.mxu3 %v5276_v28  ;;  %v5834_v28 = vld [vmem:[#allocation11 + $0x1a4] sm:$0xf0] }
 0x1e2   :  { %3442 = vmatpush.bf16.msra.mxu2 %v5196_v7  ;;  %v2790_v56 = vadd.f32 %v2789_v22, %v2777_v63  ;;  %v5324_v63 = vor.u32 %v5835_v61, %v5321_v62  ;;  %v5858_v19 = vld [vmem:[#allocation14 + $0x68] sm:$0xff]  ;;  %v5856_v61 = vld [vmem:[#allocation14 + $0x58] sm:$0xff]  ;;  %v5855_v62 = vld [vmem:[#allocation14 + $0x50] sm:$0xff] }
 0x1e3   :  { %v2804_v53 = vpop.f32.mrf.mxu3 }
 0x1e4   :  { %3430 = vmatpush.bf16.msra.mxu1 %v5124_v15  ;;  %v2803_v31 = vadd.f32 %v2802_v39, %v2790_v56  ;;  %v5838_v15 = vld [vmem:[#allocation11 + $0x1c4] sm:$0xf0] }
 0x1e5   :  { %3454 = vmatpush.bf16.msra.mxu3 %v5268_v40  ;;  %v5328_v18 = vor.u32 %v5838_v15, %v5327_v14  ;;  %v5843_v40 = vld [vmem:[#allocation11 + $0x1f4] sm:$0xf] }
 0x1e6   :  { %3443 = vmatpush.bf16.msra.mxu2 %v5188_v17  ;;  %v2816_v42 = vadd.f32 %v6347_v58, %v2803_v31  ;;  %v5305_v31 = vld [vmem:[#allocation11 + $0x198] sm:$0xf0] }
 0x1e8   :  { %3431 = vmatpush.bf16.msra.mxu1 %v5116_v32 }
 0x1e9   :  { %3455 = vmatpush.bf16.msra.mxu3 %v5260_v27 }
 0x1ea   :  { %3444 = vmatpush.bf16.msra.mxu2 %v5180_v33  ;;  %v5312_v33 = vor.u32 %v5834_v28, %v5311_v45 }
 0x1ec   :  { %3432 = vmatpush.bf16.msra.mxu1 %v5108_v47  ;;  %v2828_v1 = vpop.f32.mrf.mxu1  ;;  %v5353_v47 = vld [vmem:[#allocation11 + $0x1f8] sm:$0xf0] }
 0x1ed   :  { %3456 = vmatpush.bf16.msra.mxu3 %v5252_v52  ;;  %v2829_v3 = vadd.f32 %v2828_v1, %v2816_v42  ;;  %v5340_v52 = vor.u32 %v5839_v29, %v5337_v51  ;;  %v5313_v1 = vld [vmem:[#allocation11 + $0x1a8] sm:$0xf0]  ;;  %v5848_v29 = vld [vmem:[#allocation14 + $0x18] sm:$0xff] }
 0x1ee   :  { %3445 = vmatpush.bf16.msra.mxu2 %v5172_v43  ;;  %v5356_v43 = vor.u32 %v5843_v40, %v5353_v47  ;;  %v5297_v42 = vld [vmem:[#allocation11 + $0x188] sm:$0xf0] }
 0x1ef   :  { %3433 = vmatmul.bf16.vlgmr.msra.gmra.mxu1 %v6339_v23  ;;  %v5844_v23 = vld [vmem:[#allocation11 + $0x1f4] sm:$0xf0] }
 0x1f0   :  { %v5352_v2 = vor.u32 %v5844_v23, %v5351_v54  ;;  %v1062_v23 = vperm.slane %v6349_v30, 3 }
 0x1f1   :  { %3446 = vmatmul.bf16.vlgmr.msra.gmra.mxu2 %v6341_v41  ;;  %3457 = vmatpush.bf16.msra.mxu3 %v5244_v59  ;;  %v5343_v41 = vld [vmem:[#allocation11 + $0x1e0] sm:$0xf] }
 0x1f2   :  { %3412 = vmatpush.bf16.msra.mxu0 %v5352_v2  ;;  %v5344_v4 = vor.u32 %v5842_v16, %v5343_v41  ;;  %v5831_v2 = vld [vmem:[#allocation11 + $0x194] sm:$0xf]  ;;  %3626 = vmatpush.bf16.msrb.mxu2 %v5860_v44 }
 0x1f3   :  { %v5308_v16 = vor.u32 %v5831_v2, %v5305_v31 }
 0x1f4   :  { %v2841_v0 = vpop.f32.mrf.mxu2  ;;  %v2830_v8 = vpop.f32.mrf.mxu1 }
 0x1f5   :  { %3458 = vmatpush.bf16.msra.mxu3 %v5236_v11  ;;  %v2842_v12 = vadd.f32 %v2841_v0, %v2829_v3  ;;  %v5833_v11 = vld [vmem:[#allocation11 + $0x1a4] sm:$0xf] }
 0x1f6   :  { %v6358_v7 = vpop.f32.mrf.mxu0  ;;  %3413 = vmatpush.bf16.msra.mxu0 %v5344_v4  ;;  %v5316_v54 = vor.u32 %v5833_v11, %v5313_v1  ;;  %v5829_v4 = vld [vmem:[#allocation11 + $0x184] sm:$0xf] }
 0x1f7   :  { %v2868_v41 = vadd.f32 %v6358_v7, %v1062_v23  ;;  %v5300_v8 = vor.u32 %v5829_v4, %v5297_v42  ;;  %v5853_v11 = vld [vmem:[#allocation14 + $0x40] sm:$0xff] }
 0x1fa   :  { %3414 = vmatpush.bf16.msra.mxu0 %v5336_v24 }
 0x1fb   :  { %v2854_v13 = vpop.f32.mrf.mxu3 }
 0x1fc   :  { %v2855_v17 = vadd.f32 %v2854_v13, %v2842_v12  ;;  %v2843_v21 = vpop.f32.mrf.mxu2 }
 0x1fe   :  { %v2977_v20 = vmax.f32 %v2855_v17, 0.0  ;;  %v2869_v22 = vpop.f32.mrf.mxu0  ;;  %3415 = vmatpush.bf16.msra.mxu0 %v5328_v18 }
 0x200   :  { %v2981_v58 = vpack.c.bf16 %v2977_v20, %v2977_v20 }
 0x202   :  { %3407 = vmatmul.bf16.vlgmr.msrb.gmra.mxu3 %v2981_v58  ;;  %3416 = vmatpush.bf16.msra.mxu0 %v5320_v26  ;;  %v3049_v26 = vperm.slane %v3047_v25, 0 }
 0x203   :  { %v2856_v32 = vpop.f32.mrf.mxu3 }
 0x206   :  { %3417 = vmatpush.bf16.msra.mxu0 %v5312_v33 }
 0x20a   :  { %3418 = vmatpush.bf16.msra.mxu0 %v5304_v34 }
 0x20c   :  { %v2880_v39 = vpop.f32.mrf.mxu1 }
 0x20d   :  { %v2881_v0 = vadd.f32 %v2880_v39, %v2868_v41 }
 0x20e   :  { %3419 = vmatpush.bf16.msra.mxu0 %v5296_v38 }
 0x212   :  { %3464 = vmatpush.bf16.msrb.mxu0 %v5356_v43  ;;  %3459 = vmatmul.bf16.vlgmr.msra.gmra.mxu3 %v2981_v58  ;;  %v5852_v43 = vld [vmem:[#allocation14 + $0x38] sm:$0xff] }
 0x213   :  { %3613 = vmatpush.bf16.msrb.mxu1 %v5852_v43 }
 0x214   :  { %v2893_v6 = vpop.f32.mrf.mxu2  ;;  %v2882_v49 = vpop.f32.mrf.mxu1 }
 0x215   :  { %v2894_v9 = vadd.f32 %v2893_v6, %v2881_v0  ;;  %v5850_v6 = vld [vmem:[#allocation14 + $0x28] sm:$0xff]  ;;  %v5849_v49 = vld [vmem:[#allocation14 + $0x20] sm:$0xff] }
 0x216   :  { %v2919_v27 = vpop.f32.mrf.mxu0  ;;  %3465 = vmatpush.bf16.msrb.mxu0 %v5348_v48  ;;  %v5859_v48 = vld [vmem:[#allocation14 + $0x70] sm:$0xff] }
 0x217   :  { %3614 = vmatpush.bf16.msrb.mxu1 %v5851_v46  ;;  %3627 = vmatpush.bf16.msrb.mxu2 %v5859_v48 }
 0x21a   :  { %3466 = vmatpush.bf16.msrb.mxu0 %v5340_v52  ;;  %v5847_v52 = vld [vmem:[#allocation14 + $0x10] sm:$0xff] }
 0x21b   :  { %v2906_v53 = vpop.f32.mrf.mxu3  ;;  %3615 = vmatpush.bf16.msrb.mxu1 %v5850_v6  ;;  %3628 = vmatpush.bf16.msrb.mxu2 %v5858_v19 }
 0x21c   :  { %v2895_v59 = vpop.f32.mrf.mxu2  ;;  %v2907_v10 = vadd.f32 %v2906_v53, %v2894_v9 }
 0x21d   :  { %v5845_v59 = vld [vmem:[#allocation14] sm:$0xff] }
 0x21e   :  { %v2921_v60 = vpop.f32.mrf.mxu0  ;;  %3467 = vmatpush.bf16.msrb.mxu0 %v5332_v57  ;;  %v2920_v24 = vadd.f32 %v2919_v27, %v2907_v10  ;;  %v5880_v10 = vld [vmem:[#allocation16] ss:$0 sm:$0xff] }
 0x21f   :  { %3616 = vmatpush.bf16.msrb.mxu1 %v5849_v49  ;;  %v5857_v60 = vld [vmem:[#allocation14 + $0x60] sm:$0xff] }
 0x220   :  { %3629 = vmatpush.bf16.msrb.mxu2 %v5857_v60 }
 0x222   :  { %3468 = vmatpush.bf16.msrb.mxu0 %v5324_v63  ;;  %v5854_v63 = vld [vmem:[#allocation14 + $0x48] sm:$0xff] }
 0x223   :  { %v2908_v56 = vpop.f32.mrf.mxu3  ;;  %3617 = vmatpush.bf16.msrb.mxu1 %v5848_v29 }
 0x224   :  { %3630 = vmatpush.bf16.msrb.mxu2 %v5856_v61 }
 0x226   :  { %3469 = vmatpush.bf16.msrb.mxu0 %v5316_v54 }
 0x227   :  { %3618 = vmatpush.bf16.msrb.mxu1 %v5847_v52 }
 0x228   :  { %3631 = vmatpush.bf16.msrb.mxu2 %v5855_v62 }
 0x22a   :  { %3470 = vmatpush.bf16.msrb.mxu0 %v5308_v16 }
 0x22b   :  { %3619 = vmatpush.bf16.msrb.mxu1 %v5846_v55 }
 0x22c   :  { %v2932_v3 = vpop.f32.mrf.mxu1  ;;  %3632 = vmatpush.bf16.msrb.mxu2 %v5854_v63 }
 0x22d   :  { %v2933_v30 = vadd.f32 %v2932_v3, %v2920_v24 }
 0x22e   :  { %3471 = vmatpush.bf16.msrb.mxu0 %v5300_v8 }
 0x22f   :  { %3620 = vmatpush.bf16.msrb.mxu1 %v5845_v59 }
 0x230   :  { %3633 = vmatpush.bf16.msrb.mxu2 %v5853_v11 }
 0x234   :  { %v2945_v12 = vpop.f32.mrf.mxu2  ;;  %v2934_v14 = vpop.f32.mrf.mxu1 }
 0x235   :  { %v2946_v15 = vadd.f32 %v2945_v12, %v2933_v30 }
 0x236   :  { %v2971_v13 = vpop.f32.mrf.mxu0 }
 0x23b   :  { %v2958_v17 = vpop.f32.mrf.mxu3 }
 0x23c   :  { %v2959_v18 = vadd.f32 %v2958_v17, %v2946_v15  ;;  %v2947_v7 = vpop.f32.mrf.mxu2 }
 0x23e   :  { %v2972_v20 = vadd.f32 %v2971_v13, %v2959_v18  ;;  %v2973_v21 = vpop.f32.mrf.mxu0 }
 0x240   :  { %v2978_v22 = vmax.f32 %v2972_v20, 0.0 }
 0x242   :  { %v2982_v58 = vpack.c.bf16 %v2978_v22, %v2978_v22 }
 0x243   :  { %v2960_v5 = vpop.f32.mrf.mxu3 }
 0x244   :  { %3420 = vmatmul.bf16.vlgmr.msra.gmra.mxu0 %v2982_v58 }
 0x24c   :  { %v3382_v45 = vpop.f32.mrf.mxu1 }
 0x24d   :  { %v3383_v28 = vadd.f32 %v3382_v45, %v3049_v26 }
 0x254   :  { %v3395_v32 = vpop.f32.mrf.mxu2  ;;  %v3384_v35 = vpop.f32.mrf.mxu1  ;;  %3472 = vmatmul.bf16.vlgmr.msrb.gmra.mxu0 %v2982_v58 }
 0x255   :  { %v3396_v33 = vadd.f32 %v3395_v32, %v3383_v28 }
 0x25c   :  { %v3397_v36 = vpop.f32.mrf.mxu2 }
 0x26c   :  { %v3434_v34 = vpop.f32.mrf.mxu1 }
 0x26d   :  { %v3435_v50 = vadd.f32 %v3434_v34, %v3050_v37 }
 0x274   :  { %v3447_v38 = vpop.f32.mrf.mxu2  ;;  %v3436_v40 = vpop.f32.mrf.mxu1 }
 0x275   :  { %v3448_v39 = vadd.f32 %v3447_v38, %v3435_v50 }
 0x27c   :  { %v3449_v47 = vpop.f32.mrf.mxu2 }
 0x285   :  { %v3408_v27 = vpop.f32.mrf.mxu3 }
 0x286   :  { %v3409_v1 = vadd.f32 %v3408_v27, %v3396_v33 }
 0x28d   :  { %v3410_v51 = vpop.f32.mrf.mxu3 }
 0x295   :  { %v3460_v53 = vpop.f32.mrf.mxu3 }
 0x296   :  { %v3461_v41 = vadd.f32 %v3460_v53, %v3448_v39 }
 0x29d   :  { %v3462_v57 = vpop.f32.mrf.mxu3 }
 0x2c1   :  { %v3421_v56 = vpop.f32.mrf.mxu0 }
 0x2c2   :  { %v3422_v54 = vadd.f32 %v3421_v56, %v3409_v1 }
 0x2c4   :  { %v3477_v23 = vmax.f32 %v3422_v54, 0.0 }
 0x2c6   :  { %v3479_v2 = vpack.c.bf16 %v3477_v23, %v3477_v23 }
 0x2c8   :  { %3621 = vmatmul.bf16.vlgmr.msrb.gmra.mxu1 %v3479_v2 }
 0x2c9   :  { %v3423_v31 = vpop.f32.mrf.mxu0 }
 0x2d1   :  { %v3473_v16 = vpop.f32.mrf.mxu0 }
 0x2d2   :  { %v3474_v4 = vadd.f32 %v3473_v16, %v3461_v41 }
 0x2d4   :  { %v3478_v42 = vmax.f32 %v3474_v4, 0.0 }
 0x2d6   :  { %v3480_v0 = vpack.c.bf16 %v3478_v42, %v3478_v42 }
 0x2d8   :  { %3634 = vmatmul.bf16.vlgmr.msrb.gmra.mxu2 %v3480_v0 }
 0x2d9   :  { %v3475_v8 = vpop.f32.mrf.mxu0 }
 0x345   :  { %v3622_v3 = vpop.f32.mrf.mxu1 }
 0x346   :  { %v3623_v24 = vadd.f32 %v5880_v10, %v3622_v3 }
 0x34d   :  { %v3624_v9 = vpop.f32.mrf.mxu1 }
 0x35b   :  { %v3635_v12 = vpop.f32.mrf.mxu2 }
 0x35c   :  { %v3636_v13 = vadd.f32 %v3635_v12, %v3623_v24 }
 0x35e   :  { %3639 = vst [vmem:[#allocation17] sm:$0xff] %v3636_v13 }
 0x35f   :  { %3650 = dma.vmem_to_hbm [thread:$0]  %s3646_s8, 128, %s3648_s13, [#allocation4]  }
 0x363   :  { %v3637_v14 = vpop.f32.mrf.mxu2 }
 0x364   :  { %6132 = dma.done.wait [#allocation4], 128  }
 0x365   :  { %6133 = vsyncadd [#allocation4], 4294967168 }
 0x366   :  { %3655 = vsyncpa [#allocation3], 1 }
 0x367   :  { %3656 = vsyncpa [#allocation6], 1 }
 0x368   :  { %3657 = vsyncpa [#allocation9], 1 }
 0x369   :  { %3658 = vsyncpa [#allocation12], 1 }
 0x36a   :  { %3659 = vsyncpa [#allocation15], 1 }
 0x36b   :  { %3660 = vsyncpa [#allocation4], 1 }

</bundles_post_ra>
